<compile_context>
chip_gen: v7x
topology: tpu7x:2x2x1
jax: 0.10.0
libtpu: 0.0.40
codegen_flags: <defaults>
</compile_context>

<pallas_src>
import functools

import jax
import jax.numpy as jnp
from jax.experimental import pallas as pl
from jax.experimental.pallas import tpu as pltpu

_EPS = 1e-5
_LANE = 128
_DEFAULT_TILE_M = 512          # ~85% of HBM roofline per measured tile curve
_VMEM_LIMIT = 64 * 1024 * 1024  # fits v7x's 64 MiB physical VMEM as well


def _round_up(x, m):
    return (x + m - 1) // m * m


# ----------------------------- Pallas kernels -------------------------------

def _conv_stats_kernel(p_ref, w_ref, z_ref, st_ref):
    """z = p @ w (bf16->f32) stored per tile; accumulate per-Cout sum/sumsq."""
    @pl.when(pl.program_id(0) == 0)
    def _():
        st_ref[...] = jnp.zeros_like(st_ref)
    z = jnp.dot(p_ref[...], w_ref[...], preferred_element_type=jnp.float32)
    z_ref[...] = z
    st_ref[...] += jnp.concatenate(
        [jnp.sum(z, axis=0, keepdims=True),
         jnp.sum(z * z, axis=0, keepdims=True)], axis=0)


def _conv_sc_stats_kernel(p_ref, w_ref, xs_ref, wsc_ref, z_ref, st_ref, stsc_ref):
    """Main conv (stored) + fused 1x1 projection shortcut conv (stats only)."""
    @pl.when(pl.program_id(0) == 0)
    def _():
        st_ref[...] = jnp.zeros_like(st_ref)
        stsc_ref[...] = jnp.zeros_like(stsc_ref)
    z = jnp.dot(p_ref[...], w_ref[...], preferred_element_type=jnp.float32)
    z_ref[...] = z
    st_ref[...] += jnp.concatenate(
        [jnp.sum(z, axis=0, keepdims=True),
         jnp.sum(z * z, axis=0, keepdims=True)], axis=0)
    zsc = jnp.dot(xs_ref[...], wsc_ref[...], preferred_element_type=jnp.float32)
    stsc_ref[...] += jnp.concatenate(
        [jnp.sum(zsc, axis=0, keepdims=True),
         jnp.sum(zsc * zsc, axis=0, keepdims=True)], axis=0)


def _bn_relu_kernel(z_ref, s_ref, b_ref, o_ref):
    o_ref[...] = jnp.maximum(z_ref[...] * s_ref[...] + b_ref[...],
                             0.0).astype(o_ref.dtype)


def _finalize_id_kernel(z_ref, sc_ref, s_ref, b_ref, o_ref):
    y = z_ref[...] * s_ref[...] + b_ref[...] + sc_ref[...]
    o_ref[...] = jnp.maximum(y, 0.0).astype(o_ref.dtype)


def _finalize_proj_kernel(z_ref, xs_ref, wsc_ref, s2_ref, b2_ref,
                          ssc_ref, bsc_ref, o_ref):
    zsc = jnp.dot(xs_ref[...], wsc_ref[...], preferred_element_type=jnp.float32)
    y = (z_ref[...] * s2_ref[...] + b2_ref[...]) \
        + (zsc * ssc_ref[...] + bsc_ref[...])
    o_ref[...] = jnp.maximum(y, 0.0).astype(o_ref.dtype)


# --------------------------- pallas_call wrappers ----------------------------

def _row_spec(tile_m, c):
    return pl.BlockSpec((tile_m, c), lambda i: (i, 0))


def _const_spec(shape):
    return pl.BlockSpec(shape, lambda i: (0, 0))      # resident across M-tiles


def _grid_spec(tile_m, m_pad, in_specs, out_specs):
    return pltpu.PrefetchScalarGridSpec(
        num_scalar_prefetch=0, grid=(m_pad // tile_m,),
        in_specs=in_specs, out_specs=out_specs)


def _cparams(semantics):
    return pltpu.CompilerParams(dimension_semantics=semantics,
                                vmem_limit_bytes=_VMEM_LIMIT)


def _conv_stats_call(patches, w, tile_m):
    m_pad, k = patches.shape
    cp = w.shape[1]
    return pl.pallas_call(
        _conv_stats_kernel,
        out_shape=(jax.ShapeDtypeStruct((m_pad, cp), jnp.float32),
                   jax.ShapeDtypeStruct((2, cp), jnp.float32)),
        grid_spec=_grid_spec(
            tile_m, m_pad,
            in_specs=[_row_spec(tile_m, k), _const_spec((k, cp))],
            out_specs=(_row_spec(tile_m, cp), _const_spec((2, cp)))),
        compiler_params=_cparams(("arbitrary",)),   # stats accumulator revisits
    )(patches, w)


def _conv_sc_stats_call(patches, w, xs, wsc, tile_m):
    m_pad, k = patches.shape
    cp = w.shape[1]
    cin = xs.shape[1]
    return pl.pallas_call(
        _conv_sc_stats_kernel,
        out_shape=(jax.ShapeDtypeStruct((m_pad, cp), jnp.float32),
                   jax.ShapeDtypeStruct((2, cp), jnp.float32),
                   jax.ShapeDtypeStruct((2, cp), jnp.float32)),
        grid_spec=_grid_spec(
            tile_m, m_pad,
            in_specs=[_row_spec(tile_m, k), _const_spec((k, cp)),
                      _row_spec(tile_m, cin), _const_spec((cin, cp))],
            out_specs=(_row_spec(tile_m, cp), _const_spec((2, cp)),
                       _const_spec((2, cp)))),
        compiler_params=_cparams(("arbitrary",)),
    )(patches, w, xs, wsc)


def _bn_relu_call(z, scale, shift, out_dtype, tile_m):
    m_pad, cp = z.shape
    return pl.pallas_call(
        _bn_relu_kernel,
        out_shape=jax.ShapeDtypeStruct((m_pad, cp), out_dtype),
        grid_spec=_grid_spec(
            tile_m, m_pad,
            in_specs=[_row_spec(tile_m, cp), _const_spec((1, cp)),
                      _const_spec((1, cp))],
            out_specs=_row_spec(tile_m, cp)),
        compiler_params=_cparams(("parallel",)),
    )(z, scale, shift)


def _finalize_id_call(z, sc, scale, shift, tile_m):
    m_pad, cp = z.shape
    return pl.pallas_call(
        _finalize_id_kernel,
        out_shape=jax.ShapeDtypeStruct((m_pad, cp), jnp.float32),
        grid_spec=_grid_spec(
            tile_m, m_pad,
            in_specs=[_row_spec(tile_m, cp), _row_spec(tile_m, cp),
                      _const_spec((1, cp)), _const_spec((1, cp))],
            out_specs=_row_spec(tile_m, cp)),
        compiler_params=_cparams(("parallel",)),
    )(z, sc, scale, shift)


def _finalize_proj_call(z, xs, wsc, s2, b2, ssc, bsc, tile_m):
    m_pad, cp = z.shape
    cin = xs.shape[1]
    return pl.pallas_call(
        _finalize_proj_kernel,
        out_shape=jax.ShapeDtypeStruct((m_pad, cp), jnp.float32),
        grid_spec=_grid_spec(
            tile_m, m_pad,
            in_specs=[_row_spec(tile_m, cp), _row_spec(tile_m, cin),
                      _const_spec((cin, cp)),
                      _const_spec((1, cp)), _const_spec((1, cp)),
                      _const_spec((1, cp)), _const_spec((1, cp))],
            out_specs=_row_spec(tile_m, cp)),
        compiler_params=_cparams(("parallel",)),
    )(z, xs, wsc, s2, b2, ssc, bsc)


# ------------------------------- JAX glue ------------------------------------

def _extract_3x3_patches(x_nhwc, stride):
    """Return (N*Ho*Wo, 9*C) im2col rows of the zero-padded input."""
    n, h, w, c = x_nhwc.shape
    xp = jnp.pad(x_nhwc, ((0, 0), (1, 1), (1, 1), (0, 0)))
    ho = (h - 1) // stride + 1
    wo = (w - 1) // stride + 1
    cols = []
    for kh in range(3):
        for kw in range(3):
            sl = xp[:, kh:kh + stride * (ho - 1) + 1:stride,
                    kw:kw + stride * (wo - 1) + 1:stride, :]
            cols.append(sl.reshape(n * ho * wo, c))
    return jnp.concatenate(cols, axis=1), ho, wo


def _conv_w_to_mat(w_oihw, cin_pad, cout_pad):
    """PyTorch Conv2d weight (Cout,Cin,kh,kw) -> (kh*kw*cin_pad, cout_pad)."""
    cout, cin, kh, kw = w_oihw.shape
    wt = jnp.transpose(w_oihw, (2, 3, 1, 0))          # (kh,kw,cin,cout)
    wt = jnp.pad(wt, ((0, 0), (0, 0), (0, cin_pad - cin), (0, cout_pad - cout)))
    return wt.reshape(kh * kw * cin_pad, cout_pad)


def _pad_rows(a, m_pad):
    return jnp.pad(a, ((0, m_pad - a.shape[0]), (0, 0)))


def _bn_scale_shift(stats, gamma, beta, m_real):
    """Global batch-norm scale/shift from accumulated (sum, sumsq)."""
    mean = stats[0] / m_real
    var = jnp.maximum(stats[1] / m_real - mean * mean, 0.0)   # biased variance
    scale = gamma * jax.lax.rsqrt(var + _EPS)
    shift = beta - mean * scale
    return (scale.reshape(1, -1).astype(jnp.float32),
            shift.reshape(1, -1).astype(jnp.float32))


def init_basic_block_params(key, in_planes, planes, stride):
    ks = jax.random.split(key, 8)
    params = {
        "conv1_w": 0.1 * jax.random.normal(ks[0], (planes, in_planes, 3, 3), jnp.float32),
        "bn1_g": 1.0 + 0.1 * jax.random.normal(ks[1], (planes,), jnp.float32),
        "bn1_b": 0.1 * jax.random.normal(ks[2], (planes,), jnp.float32),
        "conv2_w": 0.1 * jax.random.normal(ks[3], (planes, planes, 3, 3), jnp.float32),
        "bn2_g": 1.0 + 0.1 * jax.random.normal(ks[4], (planes,), jnp.float32),
        "bn2_b": 0.1 * jax.random.normal(ks[5], (planes,), jnp.float32),
    }
    if stride != 1 or in_planes != planes:
        params["sc_w"] = 0.1 * jax.random.normal(ks[6], (planes, in_planes, 1, 1), jnp.float32)
        params["sc_g"] = 1.0 + 0.1 * jax.random.normal(ks[7], (planes,), jnp.float32)
        params["sc_b"] = jnp.zeros((planes,), jnp.float32)
    return params


def basic_block_forward(params, x_nchw, in_planes, planes, stride,
                        tile_m=_DEFAULT_TILE_M):
    n, c, h, w = x_nchw.shape
    assert c == in_planes
    cp = _round_up(planes, _LANE)                      # lane-dense channels
    x_nhwc = jnp.transpose(x_nchw, (0, 2, 3, 1)).astype(jnp.float32)

    # ---- conv1 (3x3, stride) : matmul + global BN stats ----
    p1, ho, wo = _extract_3x3_patches(x_nhwc.astype(jnp.bfloat16), stride)
    m_real = n * ho * wo
    m_pad = _round_up(m_real, tile_m)
    p1 = _pad_rows(p1, m_pad)
    w1 = _conv_w_to_mat(params["conv1_w"], in_planes, cp).astype(jnp.bfloat16)
    z1, st1 = _conv_stats_call(p1, w1, tile_m)

    g1 = jnp.pad(params["bn1_g"], (0, cp - planes))
    b1 = jnp.pad(params["bn1_b"], (0, cp - planes))
    s1, sh1 = _bn_scale_shift(st1, g1, b1, m_real)
    out1 = _bn_relu_call(z1, s1, sh1, jnp.bfloat16, tile_m)   # (m_pad, cp) bf16

    # ---- conv2 (3x3, stride 1) patches + BN2 params ----
    out1_nhwc = out1[:m_real].reshape(n, ho, wo, cp)
    p2, _, _ = _extract_3x3_patches(out1_nhwc, 1)
    p2 = _pad_rows(p2, m_pad)
    w2 = _conv_w_to_mat(params["conv2_w"], cp, cp).astype(jnp.bfloat16)
    g2 = jnp.pad(params["bn2_g"], (0, cp - planes))
    b2 = jnp.pad(params["bn2_b"], (0, cp - planes))

    has_proj = (stride != 1) or (in_planes != planes)
    if has_proj:
        # projection shortcut fused into the conv2 stats + finalize passes
        xs = x_nhwc[:, ::stride, ::stride, :].reshape(m_real, in_planes)
        xs_bf = _pad_rows(xs.astype(jnp.bfloat16), m_pad)
        wsc = _conv_w_to_mat(params["sc_w"], in_planes, cp).astype(jnp.bfloat16)
        z2, st2, stsc = _conv_sc_stats_call(p2, w2, xs_bf, wsc, tile_m)

        gsc = jnp.pad(params["sc_g"], (0, cp - planes))
        bsc = jnp.pad(params["sc_b"], (0, cp - planes))
        s2, sh2 = _bn_scale_shift(st2, g2, b2, m_real)
        ssc, shsc = _bn_scale_shift(stsc, gsc, bsc, m_real)
        y = _finalize_proj_call(z2, xs_bf, wsc, s2, sh2, ssc, shsc, tile_m)
    else:
        z2, st2 = _conv_stats_call(p2, w2, tile_m)
        s2, sh2 = _bn_scale_shift(st2, g2, b2, m_real)
        x_pad = jnp.pad(x_nhwc.reshape(m_real, in_planes),
                        ((0, m_pad - m_real), (0, cp - in_planes)))
        y = _finalize_id_call(z2, x_pad, s2, sh2, tile_m)

    y = y[:m_real, :planes].reshape(n, ho, wo, planes)
    return jnp.transpose(y, (0, 3, 1, 2))              # back to NCHW


# ----------------------------- pure-JAX reference -----------------------------

def _ref_forward(params, x_nchw, in_planes, planes, stride):
    def conv(x, w, s, pad):
        return jax.lax.conv_general_dilated(
            x, w, window_strides=(s, s), padding=pad,
            dimension_numbers=("NCHW", "OIHW", "NCHW"))

    def bn(x, g, b):
        mean = jnp.mean(x, axis=(0, 2, 3), keepdims=True)
        var = jnp.mean((x - mean) ** 2, axis=(0, 2, 3), keepdims=True)
        return ((x - mean) * jax.lax.rsqrt(var + _EPS)
                * g.reshape(1, -1, 1, 1) + b.reshape(1, -1, 1, 1))

    out = jax.nn.relu(bn(conv(x_nchw, params["conv1_w"], stride, ((1, 1), (1, 1))),
                         params["bn1_g"], params["bn1_b"]))
    out = bn(conv(out, params["conv2_w"], 1, ((1, 1), (1, 1))),
             params["bn2_g"], params["bn2_b"])
    if stride != 1 or in_planes != planes:
        sc = bn(conv(x_nchw, params["sc_w"], stride, "VALID"),
                params["sc_g"], params["sc_b"])
    else:
        sc = x_nchw
    return jax.nn.relu(out + sc)


if __name__ == "__main__":
    key = jax.random.PRNGKey(0)
    k_x, k_p, k_x2, k_p2 = jax.random.split(key, 4)

    # ---- config A: projection shortcut path (in_planes != planes) ----
    N, CIN, COUT, H, W, STRIDE = 2, 4, 8, 16, 16, 1
    x = jax.random.normal(k_x, (N, CIN, H, W), jnp.float32)     # NCHW like PyTorch
    params = init_basic_block_params(k_p, CIN, COUT, STRIDE)
    fwd_a = jax.jit(functools.partial(basic_block_forward, in_planes=CIN,
                                      planes=COUT, stride=STRIDE, tile_m=128))
    y = jax.block_until_ready(fwd_a(params, x))
    assert y.shape == (N, COUT, H, W)
    assert bool(jnp.isfinite(y).all()) and bool(jnp.all(y >= 0.0))
    y_ref = _ref_forward(params, x, CIN, COUT, STRIDE)
    assert float(jnp.max(jnp.abs(y - y_ref))) < 0.3   # bf16-matmul tolerance

    # ---- config B: identity shortcut path ----
    N2, C2 = 2, 8
    x2 = jax.random.normal(k_x2, (N2, C2, H, W), jnp.float32)
    params2 = init_basic_block_params(k_p2, C2, C2, 1)
    fwd_b = jax.jit(functools.partial(basic_block_forward, in_planes=C2,
                                      planes=C2, stride=1, tile_m=256))
    y2 = jax.block_until_ready(fwd_b(params2, x2))
    assert y2.shape == (N2, C2, H, W)
    assert bool(jnp.isfinite(y2).all()) and bool(jnp.all(y2 >= 0.0))
    y2_ref = _ref_forward(params2, x2, C2, C2, 1)
    assert float(jnp.max(jnp.abs(y2 - y2_ref))) < 0.3

    print("KERNEL_OK")
</pallas_src>

<mosaic_0001>
module attributes {stable_mosaic.version = 11 : i64} {
  func.func @_conv_stats_kernel(%arg0: i32, %arg1: memref<128x36xbf16, #tpu.memory_space<vmem>>, %arg2: memref<36x128xbf16, #tpu.memory_space<vmem>>, %arg3: memref<128x128xf32, #tpu.memory_space<vmem>>, %arg4: memref<2x128xf32, #tpu.memory_space<vmem>>) attributes {dimension_semantics = [#tpu.dimension_semantics<arbitrary>], iteration_bounds = array<i64: 4>, scalar_prefetch = 0 : i64, scratch_operands = 0 : i64, tpu.core_type = #tpu.core_type<tc>, window_params = [{transform_indices = @transform_0, window_bounds = array<i64: 128, 36>}, {pipeline_mode = #tpu.pipeline_mode<synchronous>, transform_indices = @transform_1, window_bounds = array<i64: 36, 128>}, {transform_indices = @transform_2, window_bounds = array<i64: 128, 128>}, {pipeline_mode = #tpu.pipeline_mode<synchronous>, transform_indices = @transform_3, window_bounds = array<i64: 2, 128>}]} {
    %c0_i32 = arith.constant 0 : i32
    %0 = arith.cmpi eq, %arg0, %c0_i32 : i32
    %1 = arith.extui %0 : i1 to i32
    %c0_i32_0 = arith.constant 0 : i32
    %2 = arith.cmpi ne, %1, %c0_i32_0 : i32
    scf.if %2 {
      %cst_12 = arith.constant 0.000000e+00 : f32
      %16 = vector.broadcast %cst_12 : f32 to vector<2x128xf32>
      %c0_13 = arith.constant 0 : index
      %c0_14 = arith.constant 0 : index
      %17 = vector.load %arg4[%c0_13, %c0_14] : memref<2x128xf32, #tpu.memory_space<vmem>>, vector<2x128xf32>
      tpu.vector_store %arg4[%c0_13, %c0_14], %16 {strides = array<i32>} : memref<2x128xf32, #tpu.memory_space<vmem>>, vector<2x128xf32>,
    } else {
    }
    %c0 = arith.constant 0 : index
    %c0_1 = arith.constant 0 : index
    %3 = vector.load %arg1[%c0, %c0_1] : memref<128x36xbf16, #tpu.memory_space<vmem>>, vector<128x36xbf16>
    %c0_2 = arith.constant 0 : index
    %c0_3 = arith.constant 0 : index
    %4 = vector.load %arg2[%c0_2, %c0_3] : memref<36x128xbf16, #tpu.memory_space<vmem>>, vector<36x128xbf16>
    %cst = arith.constant dense<0.000000e+00> : vector<128x128xf32>
    %5 = tpu.matmul %3, %4, %cst {dimension_numbers = #tpu.dot_dimension_numbers<[1], [0], [0], [1], [0, 0, 1, 1], [], []>} : vector<128x36xbf16>, vector<36x128xbf16>, vector<128x128xf32> -> vector<128x128xf32>
    %c0_4 = arith.constant 0 : index
    %c0_5 = arith.constant 0 : index
    %6 = vector.load %arg3[%c0_4, %c0_5] : memref<128x128xf32, #tpu.memory_space<vmem>>, vector<128x128xf32>
    tpu.vector_store %arg3[%c0_4, %c0_5], %5 {strides = array<i32>} : memref<128x128xf32, #tpu.memory_space<vmem>>, vector<128x128xf32>,
    %c0_6 = arith.constant 0 : index
    %c0_7 = arith.constant 0 : index
    %7 = vector.load %arg4[%c0_6, %c0_7] : memref<2x128xf32, #tpu.memory_space<vmem>>, vector<2x128xf32>
    %cst_8 = arith.constant dense<0.000000e+00> : vector<128xf32>
    %8 = vector.multi_reduction <add>, %5, %cst_8 [0] : vector<128x128xf32> to vector<128xf32>
    %9 = vector.shape_cast %8 : vector<128xf32> to vector<1x128xf32>
    %10 = arith.mulf %5, %5 : vector<128x128xf32>
    %cst_9 = arith.constant dense<0.000000e+00> : vector<128xf32>
    %11 = vector.multi_reduction <add>, %10, %cst_9 [0] : vector<128x128xf32> to vector<128xf32>
    %12 = vector.shape_cast %11 : vector<128xf32> to vector<1x128xf32>
    %13 = tpu.concatenate %9, %12 in 0 : vector<1x128xf32>, vector<1x128xf32> -> vector<2x128xf32>
    %14 = arith.addf %7, %13 : vector<2x128xf32>
    %c0_10 = arith.constant 0 : index
    %c0_11 = arith.constant 0 : index
    %15 = vector.load %arg4[%c0_10, %c0_11] : memref<2x128xf32, #tpu.memory_space<vmem>>, vector<2x128xf32>
    tpu.vector_store %arg4[%c0_10, %c0_11], %14 {strides = array<i32>} : memref<2x128xf32, #tpu.memory_space<vmem>>, vector<2x128xf32>,
    return
  }
  func.func @transform_0(%arg0: i32) -> (i32, i32) {
    %c0_i32 = arith.constant 0 : i32
    %c0_i32_0 = arith.constant 0 : i32
    return %arg0, %c0_i32 : i32, i32
  }
  func.func @transform_1(%arg0: i32) -> (i32, i32) {
    %c0_i32 = arith.constant 0 : i32
    %c0_i32_0 = arith.constant 0 : i32
    %c0_i32_1 = arith.constant 0 : i32
    return %c0_i32, %c0_i32_0 : i32, i32
  }
  func.func @transform_2(%arg0: i32) -> (i32, i32) {
    %c0_i32 = arith.constant 0 : i32
    %c0_i32_0 = arith.constant 0 : i32
    return %arg0, %c0_i32 : i32, i32
  }
  func.func @transform_3(%arg0: i32) -> (i32, i32) {
    %c0_i32 = arith.constant 0 : i32
    %c0_i32_0 = arith.constant 0 : i32
    %c0_i32_1 = arith.constant 0 : i32
    return %c0_i32, %c0_i32_0 : i32, i32
  }
}

module attributes {stable_mosaic.version = 11 : i64} {
  func.func @_bn_relu_kernel(%arg0: i32, %arg1: memref<128x128xf32, #tpu.memory_space<vmem>>, %arg2: memref<1x128xf32, #tpu.memory_space<vmem>>, %arg3: memref<1x128xf32, #tpu.memory_space<vmem>>, %arg4: memref<128x128xbf16, #tpu.memory_space<vmem>>) attributes {dimension_semantics = [#tpu.dimension_semantics<parallel>], iteration_bounds = array<i64: 4>, scalar_prefetch = 0 : i64, scratch_operands = 0 : i64, tpu.core_type = #tpu.core_type<tc>, window_params = [{transform_indices = @transform_0, window_bounds = array<i64: 128, 128>}, {pipeline_mode = #tpu.pipeline_mode<synchronous>, transform_indices = @transform_1, window_bounds = array<i64: 1, 128>}, {pipeline_mode = #tpu.pipeline_mode<synchronous>, transform_indices = @transform_2, window_bounds = array<i64: 1, 128>}, {transform_indices = @transform_3, window_bounds = array<i64: 128, 128>}]} {
    %c0 = arith.constant 0 : index
    %c0_0 = arith.constant 0 : index
    %0 = vector.load %arg1[%c0, %c0_0] : memref<128x128xf32, #tpu.memory_space<vmem>>, vector<128x128xf32>
    %c0_1 = arith.constant 0 : index
    %c0_2 = arith.constant 0 : index
    %1 = vector.load %arg2[%c0_1, %c0_2] : memref<1x128xf32, #tpu.memory_space<vmem>>, vector<1x128xf32>
    %2 = vector.broadcast %1 : vector<1x128xf32> to vector<128x128xf32>
    %3 = arith.mulf %0, %2 : vector<128x128xf32>
    %c0_3 = arith.constant 0 : index
    %c0_4 = arith.constant 0 : index
    %4 = vector.load %arg3[%c0_3, %c0_4] : memref<1x128xf32, #tpu.memory_space<vmem>>, vector<1x128xf32>
    %5 = vector.broadcast %4 : vector<1x128xf32> to vector<128x128xf32>
    %6 = arith.addf %3, %5 : vector<128x128xf32>
    %cst = arith.constant 0.000000e+00 : f32
    %7 = vector.broadcast %cst : f32 to vector<128x128xf32>
    %8 = arith.maximumf %6, %7 : vector<128x128xf32>
    %9 = arith.truncf %8 : vector<128x128xf32> to vector<128x128xbf16>
    %c0_5 = arith.constant 0 : index
    %c0_6 = arith.constant 0 : index
    %10 = vector.load %arg4[%c0_5, %c0_6] : memref<128x128xbf16, #tpu.memory_space<vmem>>, vector<128x128xbf16>
    tpu.vector_store %arg4[%c0_5, %c0_6], %9 {strides = array<i32>} : memref<128x128xbf16, #tpu.memory_space<vmem>>, vector<128x128xbf16>,
    return
  }
  func.func @transform_0(%arg0: i32) -> (i32, i32) {
    %c0_i32 = arith.constant 0 : i32
    %c0_i32_0 = arith.constant 0 : i32
    return %arg0, %c0_i32 : i32, i32
  }
  func.func @transform_1(%arg0: i32) -> (i32, i32) {
    %c0_i32 = arith.constant 0 : i32
    %c0_i32_0 = arith.constant 0 : i32
    %c0_i32_1 = arith.constant 0 : i32
    return %c0_i32, %c0_i32_0 : i32, i32
  }
  func.func @transform_2(%arg0: i32) -> (i32, i32) {
    %c0_i32 = arith.constant 0 : i32
    %c0_i32_0 = arith.constant 0 : i32
    %c0_i32_1 = arith.constant 0 : i32
    return %c0_i32, %c0_i32_0 : i32, i32
  }
  func.func @transform_3(%arg0: i32) -> (i32, i32) {
    %c0_i32 = arith.constant 0 : i32
    %c0_i32_0 = arith.constant 0 : i32
    return %arg0, %c0_i32 : i32, i32
  }
}

module attributes {stable_mosaic.version = 11 : i64} {
  func.func @_conv_sc_stats_kernel(%arg0: i32, %arg1: memref<128x1152xbf16, #tpu.memory_space<vmem>>, %arg2: memref<1152x128xbf16, #tpu.memory_space<vmem>>, %arg3: memref<128x4xbf16, #tpu.memory_space<vmem>>, %arg4: memref<4x128xbf16, #tpu.memory_space<vmem>>, %arg5: memref<128x128xf32, #tpu.memory_space<vmem>>, %arg6: memref<2x128xf32, #tpu.memory_space<vmem>>, %arg7: memref<2x128xf32, #tpu.memory_space<vmem>>) attributes {dimension_semantics = [#tpu.dimension_semantics<arbitrary>], iteration_bounds = array<i64: 4>, scalar_prefetch = 0 : i64, scratch_operands = 0 : i64, tpu.core_type = #tpu.core_type<tc>, window_params = [{transform_indices = @transform_0, window_bounds = array<i64: 128, 1152>}, {pipeline_mode = #tpu.pipeline_mode<synchronous>, transform_indices = @transform_1, window_bounds = array<i64: 1152, 128>}, {transform_indices = @transform_2, window_bounds = array<i64: 128, 4>}, {pipeline_mode = #tpu.pipeline_mode<synchronous>, transform_indices = @transform_3, window_bounds = array<i64: 4, 128>}, {transform_indices = @transform_4, window_bounds = array<i64: 128, 128>}, {pipeline_mode = #tpu.pipeline_mode<synchronous>, transform_indices = @transform_5, window_bounds = array<i64: 2, 128>}, {pipeline_mode = #tpu.pipeline_mode<synchronous>, transform_indices = @transform_6, window_bounds = array<i64: 2, 128>}]} {
    %c0_i32 = arith.constant 0 : i32
    %0 = arith.cmpi eq, %arg0, %c0_i32 : i32
    %1 = arith.extui %0 : i1 to i32
    %c0_i32_0 = arith.constant 0 : i32
    %2 = arith.cmpi ne, %1, %c0_i32_0 : i32
    scf.if %2 {
      %cst_23 = arith.constant 0.000000e+00 : f32
      %28 = vector.broadcast %cst_23 : f32 to vector<2x128xf32>
      %c0_24 = arith.constant 0 : index
      %c0_25 = arith.constant 0 : index
      %29 = vector.load %arg6[%c0_24, %c0_25] : memref<2x128xf32, #tpu.memory_space<vmem>>, vector<2x128xf32>
      tpu.vector_store %arg6[%c0_24, %c0_25], %28 {strides = array<i32>} : memref<2x128xf32, #tpu.memory_space<vmem>>, vector<2x128xf32>,
      %cst_26 = arith.constant 0.000000e+00 : f32
      %30 = vector.broadcast %cst_26 : f32 to vector<2x128xf32>
      %c0_27 = arith.constant 0 : index
      %c0_28 = arith.constant 0 : index
      %31 = vector.load %arg7[%c0_27, %c0_28] : memref<2x128xf32, #tpu.memory_space<vmem>>, vector<2x128xf32>
      tpu.vector_store %arg7[%c0_27, %c0_28], %30 {strides = array<i32>} : memref<2x128xf32, #tpu.memory_space<vmem>>, vector<2x128xf32>,
    } else {
    }
    %c0 = arith.constant 0 : index
    %c0_1 = arith.constant 0 : index
    %3 = vector.load %arg1[%c0, %c0_1] : memref<128x1152xbf16, #tpu.memory_space<vmem>>, vector<128x1152xbf16>
    %c0_2 = arith.constant 0 : index
    %c0_3 = arith.constant 0 : index
    %4 = vector.load %arg2[%c0_2, %c0_3] : memref<1152x128xbf16, #tpu.memory_space<vmem>>, vector<1152x128xbf16>
    %cst = arith.constant dense<0.000000e+00> : vector<128x128xf32>
    %5 = tpu.matmul %3, %4, %cst {dimension_numbers = #tpu.dot_dimension_numbers<[1], [0], [0], [1], [0, 0, 1, 1], [], []>} : vector<128x1152xbf16>, vector<1152x128xbf16>, vector<128x128xf32> -> vector<128x128xf32>
    %c0_4 = arith.constant 0 : index
    %c0_5 = arith.constant 0 : index
    %6 = vector.load %arg5[%c0_4, %c0_5] : memref<128x128xf32, #tpu.memory_space<vmem>>, vector<128x128xf32>
    tpu.vector_store %arg5[%c0_4, %c0_5], %5 {strides = array<i32>} : memref<128x128xf32, #tpu.memory_space<vmem>>, vector<128x128xf32>,
    %c0_6 = arith.constant 0 : index
    %c0_7 = arith.constant 0 : index
    %7 = vector.load %arg6[%c0_6, %c0_7] : memref<2x128xf32, #tpu.memory_space<vmem>>, vector<2x128xf32>
    %cst_8 = arith.constant dense<0.000000e+00> : vector<128xf32>
    %8 = vector.multi_reduction <add>, %5, %cst_8 [0] : vector<128x128xf32> to vector<128xf32>
    %9 = vector.shape_cast %8 : vector<128xf32> to vector<1x128xf32>
    %10 = arith.mulf %5, %5 : vector<128x128xf32>
    %cst_9 = arith.constant dense<0.000000e+00> : vector<128xf32>
    %11 = vector.multi_reduction <add>, %10, %cst_9 [0] : vector<128x128xf32> to vector<128xf32>
    %12 = vector.shape_cast %11 : vector<128xf32> to vector<1x128xf32>
    %13 = tpu.concatenate %9, %12 in 0 : vector<1x128xf32>, vector<1x128xf32> -> vector<2x128xf32>
    %14 = arith.addf %7, %13 : vector<2x128xf32>
    %c0_10 = arith.constant 0 : index
    %c0_11 = arith.constant 0 : index
    %15 = vector.load %arg6[%c0_10, %c0_11] : memref<2x128xf32, #tpu.memory_space<vmem>>, vector<2x128xf32>
    tpu.vector_store %arg6[%c0_10, %c0_11], %14 {strides = array<i32>} : memref<2x128xf32, #tpu.memory_space<vmem>>, vector<2x128xf32>,
    %c0_12 = arith.constant 0 : index
    %c0_13 = arith.constant 0 : index
    %16 = vector.load %arg3[%c0_12, %c0_13] : memref<128x4xbf16, #tpu.memory_space<vmem>>, vector<128x4xbf16>
    %c0_14 = arith.constant 0 : index
    %c0_15 = arith.constant 0 : index
    %17 = vector.load %arg4[%c0_14, %c0_15] : memref<4x128xbf16, #tpu.memory_space<vmem>>, vector<4x128xbf16>
    %cst_16 = arith.constant dense<0.000000e+00> : vector<128x128xf32>
    %18 = tpu.matmul %16, %17, %cst_16 {dimension_numbers = #tpu.dot_dimension_numbers<[1], [0], [0], [1], [0, 0, 1, 1], [], []>} : vector<128x4xbf16>, vector<4x128xbf16>, vector<128x128xf32> -> vector<128x128xf32>
    %c0_17 = arith.constant 0 : index
    %c0_18 = arith.constant 0 : index
    %19 = vector.load %arg7[%c0_17, %c0_18] : memref<2x128xf32, #tpu.memory_space<vmem>>, vector<2x128xf32>
    %cst_19 = arith.constant dense<0.000000e+00> : vector<128xf32>
    %20 = vector.multi_reduction <add>, %18, %cst_19 [0] : vector<128x128xf32> to vector<128xf32>
    %21 = vector.shape_cast %20 : vector<128xf32> to vector<1x128xf32>
    %22 = arith.mulf %18, %18 : vector<128x128xf32>
    %cst_20 = arith.constant dense<0.000000e+00> : vector<128xf32>
    %23 = vector.multi_reduction <add>, %22, %cst_20 [0] : vector<128x128xf32> to vector<128xf32>
    %24 = vector.shape_cast %23 : vector<128xf32> to vector<1x128xf32>
    %25 = tpu.concatenate %21, %24 in 0 : vector<1x128xf32>, vector<1x128xf32> -> vector<2x128xf32>
    %26 = arith.addf %19, %25 : vector<2x128xf32>
    %c0_21 = arith.constant 0 : index
    %c0_22 = arith.constant 0 : index
    %27 = vector.load %arg7[%c0_21, %c0_22] : memref<2x128xf32, #tpu.memory_space<vmem>>, vector<2x128xf32>
    tpu.vector_store %arg7[%c0_21, %c0_22], %26 {strides = array<i32>} : memref<2x128xf32, #tpu.memory_space<vmem>>, vector<2x128xf32>,
    return
  }
  func.func @transform_0(%arg0: i32) -> (i32, i32) {
    %c0_i32 = arith.constant 0 : i32
    %c0_i32_0 = arith.constant 0 : i32
    return %arg0, %c0_i32 : i32, i32
  }
  func.func @transform_1(%arg0: i32) -> (i32, i32) {
    %c0_i32 = arith.constant 0 : i32
    %c0_i32_0 = arith.constant 0 : i32
    %c0_i32_1 = arith.constant 0 : i32
    return %c0_i32, %c0_i32_0 : i32, i32
  }
  func.func @transform_2(%arg0: i32) -> (i32, i32) {
    %c0_i32 = arith.constant 0 : i32
    %c0_i32_0 = arith.constant 0 : i32
    return %arg0, %c0_i32 : i32, i32
  }
  func.func @transform_3(%arg0: i32) -> (i32, i32) {
    %c0_i32 = arith.constant 0 : i32
    %c0_i32_0 = arith.constant 0 : i32
    %c0_i32_1 = arith.constant 0 : i32
    return %c0_i32, %c0_i32_0 : i32, i32
  }
  func.func @transform_4(%arg0: i32) -> (i32, i32) {
    %c0_i32 = arith.constant 0 : i32
    %c0_i32_0 = arith.constant 0 : i32
    return %arg0, %c0_i32 : i32, i32
  }
  func.func @transform_5(%arg0: i32) -> (i32, i32) {
    %c0_i32 = arith.constant 0 : i32
    %c0_i32_0 = arith.constant 0 : i32
    %c0_i32_1 = arith.constant 0 : i32
    return %c0_i32, %c0_i32_0 : i32, i32
  }
  func.func @transform_6(%arg0: i32) -> (i32, i32) {
    %c0_i32 = arith.constant 0 : i32
    %c0_i32_0 = arith.constant 0 : i32
    %c0_i32_1 = arith.constant 0 : i32
    return %c0_i32, %c0_i32_0 : i32, i32
  }
}

module attributes {stable_mosaic.version = 11 : i64} {
  func.func @_finalize_proj_kernel(%arg0: i32, %arg1: memref<128x128xf32, #tpu.memory_space<vmem>>, %arg2: memref<128x4xbf16, #tpu.memory_space<vmem>>, %arg3: memref<4x128xbf16, #tpu.memory_space<vmem>>, %arg4: memref<1x128xf32, #tpu.memory_space<vmem>>, %arg5: memref<1x128xf32, #tpu.memory_space<vmem>>, %arg6: memref<1x128xf32, #tpu.memory_space<vmem>>, %arg7: memref<1x128xf32, #tpu.memory_space<vmem>>, %arg8: memref<128x128xf32, #tpu.memory_space<vmem>>) attributes {dimension_semantics = [#tpu.dimension_semantics<parallel>], iteration_bounds = array<i64: 4>, scalar_prefetch = 0 : i64, scratch_operands = 0 : i64, tpu.core_type = #tpu.core_type<tc>, window_params = [{transform_indices = @transform_0, window_bounds = array<i64: 128, 128>}, {transform_indices = @transform_1, window_bounds = array<i64: 128, 4>}, {pipeline_mode = #tpu.pipeline_mode<synchronous>, transform_indices = @transform_2, window_bounds = array<i64: 4, 128>}, {pipeline_mode = #tpu.pipeline_mode<synchronous>, transform_indices = @transform_3, window_bounds = array<i64: 1, 128>}, {pipeline_mode = #tpu.pipeline_mode<synchronous>, transform_indices = @transform_4, window_bounds = array<i64: 1, 128>}, {pipeline_mode = #tpu.pipeline_mode<synchronous>, transform_indices = @transform_5, window_bounds = array<i64: 1, 128>}, {pipeline_mode = #tpu.pipeline_mode<synchronous>, transform_indices = @transform_6, window_bounds = array<i64: 1, 128>}, {transform_indices = @transform_7, window_bounds = array<i64: 128, 128>}]} {
    %c0 = arith.constant 0 : index
    %c0_0 = arith.constant 0 : index
    %0 = vector.load %arg2[%c0, %c0_0] : memref<128x4xbf16, #tpu.memory_space<vmem>>, vector<128x4xbf16>
    %c0_1 = arith.constant 0 : index
    %c0_2 = arith.constant 0 : index
    %1 = vector.load %arg3[%c0_1, %c0_2] : memref<4x128xbf16, #tpu.memory_space<vmem>>, vector<4x128xbf16>
    %cst = arith.constant dense<0.000000e+00> : vector<128x128xf32>
    %2 = tpu.matmul %0, %1, %cst {dimension_numbers = #tpu.dot_dimension_numbers<[1], [0], [0], [1], [0, 0, 1, 1], [], []>} : vector<128x4xbf16>, vector<4x128xbf16>, vector<128x128xf32> -> vector<128x128xf32>
    %c0_3 = arith.constant 0 : index
    %c0_4 = arith.constant 0 : index
    %3 = vector.load %arg1[%c0_3, %c0_4] : memref<128x128xf32, #tpu.memory_space<vmem>>, vector<128x128xf32>
    %c0_5 = arith.constant 0 : index
    %c0_6 = arith.constant 0 : index
    %4 = vector.load %arg4[%c0_5, %c0_6] : memref<1x128xf32, #tpu.memory_space<vmem>>, vector<1x128xf32>
    %5 = vector.broadcast %4 : vector<1x128xf32> to vector<128x128xf32>
    %6 = arith.mulf %3, %5 : vector<128x128xf32>
    %c0_7 = arith.constant 0 : index
    %c0_8 = arith.constant 0 : index
    %7 = vector.load %arg5[%c0_7, %c0_8] : memref<1x128xf32, #tpu.memory_space<vmem>>, vector<1x128xf32>
    %8 = vector.broadcast %7 : vector<1x128xf32> to vector<128x128xf32>
    %9 = arith.addf %6, %8 : vector<128x128xf32>
    %c0_9 = arith.constant 0 : index
    %c0_10 = arith.constant 0 : index
    %10 = vector.load %arg6[%c0_9, %c0_10] : memref<1x128xf32, #tpu.memory_space<vmem>>, vector<1x128xf32>
    %11 = vector.broadcast %10 : vector<1x128xf32> to vector<128x128xf32>
    %12 = arith.mulf %2, %11 : vector<128x128xf32>
    %c0_11 = arith.constant 0 : index
    %c0_12 = arith.constant 0 : index
    %13 = vector.load %arg7[%c0_11, %c0_12] : memref<1x128xf32, #tpu.memory_space<vmem>>, vector<1x128xf32>
    %14 = vector.broadcast %13 : vector<1x128xf32> to vector<128x128xf32>
    %15 = arith.addf %12, %14 : vector<128x128xf32>
    %16 = arith.addf %9, %15 : vector<128x128xf32>
    %cst_13 = arith.constant 0.000000e+00 : f32
    %17 = vector.broadcast %cst_13 : f32 to vector<128x128xf32>
    %18 = arith.maximumf %16, %17 : vector<128x128xf32>
    %c0_14 = arith.constant 0 : index
    %c0_15 = arith.constant 0 : index
    %19 = vector.load %arg8[%c0_14, %c0_15] : memref<128x128xf32, #tpu.memory_space<vmem>>, vector<128x128xf32>
    tpu.vector_store %arg8[%c0_14, %c0_15], %18 {strides = array<i32>} : memref<128x128xf32, #tpu.memory_space<vmem>>, vector<128x128xf32>,
    return
  }
  func.func @transform_0(%arg0: i32) -> (i32, i32) {
    %c0_i32 = arith.constant 0 : i32
    %c0_i32_0 = arith.constant 0 : i32
    return %arg0, %c0_i32 : i32, i32
  }
  func.func @transform_1(%arg0: i32) -> (i32, i32) {
    %c0_i32 = arith.constant 0 : i32
    %c0_i32_0 = arith.constant 0 : i32
    return %arg0, %c0_i32 : i32, i32
  }
  func.func @transform_2(%arg0: i32) -> (i32, i32) {
    %c0_i32 = arith.constant 0 : i32
    %c0_i32_0 = arith.constant 0 : i32
    %c0_i32_1 = arith.constant 0 : i32
    return %c0_i32, %c0_i32_0 : i32, i32
  }
  func.func @transform_3(%arg0: i32) -> (i32, i32) {
    %c0_i32 = arith.constant 0 : i32
    %c0_i32_0 = arith.constant 0 : i32
    %c0_i32_1 = arith.constant 0 : i32
    return %c0_i32, %c0_i32_0 : i32, i32
  }
  func.func @transform_4(%arg0: i32) -> (i32, i32) {
    %c0_i32 = arith.constant 0 : i32
    %c0_i32_0 = arith.constant 0 : i32
    %c0_i32_1 = arith.constant 0 : i32
    return %c0_i32, %c0_i32_0 : i32, i32
  }
  func.func @transform_5(%arg0: i32) -> (i32, i32) {
    %c0_i32 = arith.constant 0 : i32
    %c0_i32_0 = arith.constant 0 : i32
    %c0_i32_1 = arith.constant 0 : i32
    return %c0_i32, %c0_i32_0 : i32, i32
  }
  func.func @transform_6(%arg0: i32) -> (i32, i32) {
    %c0_i32 = arith.constant 0 : i32
    %c0_i32_0 = arith.constant 0 : i32
    %c0_i32_1 = arith.constant 0 : i32
    return %c0_i32, %c0_i32_0 : i32, i32
  }
  func.func @transform_7(%arg0: i32) -> (i32, i32) {
    %c0_i32 = arith.constant 0 : i32
    %c0_i32_0 = arith.constant 0 : i32
    return %arg0, %c0_i32 : i32, i32
  }
}

</mosaic_0001>

<bundles_post_ra>
// kernel: basic_block_forward.5
= control target key start
LH: loop header
LB: loop body
LE: loop exit
PB: predicated region body
PF: predicated region fallthrough
CT: control target
= control target key end

     0   :  { %8 = vsyncpa [#allocation3], 0  ;;  %s1136_s0 = inlined_call_operand.hbm [shape: f32[512,128], index: 0, kind: input, shape index: {}]   ;;  %s1137_s1 = inlined_call_operand.hbm [shape: f32[1,128], index: 1, kind: input, shape index: {}]   ;;  %s1138_s2 = inlined_call_operand.hbm [shape: f32[1,128], index: 2, kind: input, shape index: {}]   ;;  %s1139_s3 = inlined_call_operand.hbm [shape: bf16[512,128], index: 3, kind: output, shape index: {}]  }
   0x1   :  { %10 = vsyncpa [#allocation3 + $0x1], 0 }
   0x2   :  { %11 = vsyncpa [#allocation6], 0 }
   0x3   :  { %12 = vsyncpa [#allocation4], 0 }
   0x4   :  { %14 = vsyncpa [#allocation4 + $0x1], 0  ;;  %s838_s12 = smov 0   ;;  %s840_s13 = smov 0  }
   0x5   :  { %s842_s14 = smov 0   ;;  %s844_s15 = smov 0  }
   0x6 LB: > { %s859_s16 = sadd.s32 4294967295, %s808_s15   ;;  %s480_s17 = sadd.s32 4294967294, %s808_s15   ;;  %s808_s15 = sphi %s844_s15, %s1162_s15   ;;  %s804_s14 = sphi %s842_s14, %s1161_s14   ;;  %s800_s13 = sphi %s840_s13, %s1160_s13   ;;  %s796_s12 = sphi %s838_s12, %s1159_s12  }
   0x7   : > { %s863_s18 = sadd.s32 1, %s808_s15   ;;  %s27_s19 = sadd.s32 1, %s804_s14 }
   0x8   : > { %s24_s20 = ssub.s32 %s808_s15, %s863_s18  ;;  %p34_p0 = scmp.ne.s32.totalorder %s804_s14, %s800_s13 }
   0x9   : > { %p25_p1 = scmp.eq.s32.totalorder %s24_s20, 0  ;;  %p35_p2 = scmp.eq.s32.totalorder %s808_s15, 0 }
   0xa   : > { %p40_p3 = scmp.ne.s32.totalorder %s800_s13, %s796_s12  ;;  %p1140_p4 = scmp.eq.s32.totalorder %s859_s16, 0 }
   0xb   : > { %s875_s21 = scalar_select %p25_p1, %s804_s14, %s27_s19  }
   0xc   : > { %p877_p5 = por %p35_p2, %p34_p0  ;;  %p883_p6 = por %p1140_p4, %p40_p3 }
   0xd   : > { %p106_p7 = scmp.eq.s32.totalorder %s859_s16, 3  ;;  %p112_p8 = scmp.eq.s32.totalorder %s480_s17, 3 }
   0xe   : > { %s1146_s23 = scalar_select %p883_p6, 1, 0 }
   0xf   : > { %p481_p9 = scmp.ge.s32.totalorder %s808_s15, 1  ;;  %p119_p10 = scmp.lt.s32.totalorder %s808_s15, 5 }
  0x10   : > { %p890_p11 = por %p106_p7, %p34_p0  ;;  %p894_p12 = por %p112_p8, %p40_p3 }
  0x11   : > { %p898_p13 = pnand %p481_p9, %p119_p10  ;;  %s810_s27 = smov [#allocation5]  }
  0x12   : > { %s1147_s24 = scalar_select %p890_p11, 1, 0 }
  0x13   : > { %s1148_s25 = scalar_select %p894_p12, 1, 0 }
  0x14   : > { %s1149_s26 = scalar_select %p898_p13, 1, 0 }
  0x15   : > { %p593_p1 = pneg %p898_p13  ;;  %s132_s28 = sshll.u32 %s810_s27, 4  ;;  %s133_s28 = int_to_ptr.vmem [resolvable:$true] %s132_s28 }
  0x16   : > { %p610_p2 = scmp.lt.s32.totalorder %s808_s15, 4  ;;  %s811_s4 = smov [#allocation7]  }
  0x17   : > { %p907_p0 = pnand %p593_p1, %p1140_p4  ;;  %s143_s5 = sshll.u32 %s811_s4, 4  ;;  %s917_s5 = int_to_ptr.vmem [resolvable:$true] %s143_s5 }
  0x18   : > { %p913_p3 = pnand %p610_p2, %p877_p5  ;;  %s652_s8 = scalar_lea.hbm %s1137_s1, 16 }
  0x19   : > { %p653_p7 = scmp.ne.s32.totalorder %s1137_s1, %s652_s8  ;;  %p654_p8 = pneg %p907_p0 }
  0x1a   : > { %s1151_s30 = scalar_select %p913_p3, 1, 0 }
  0x1b   : > { %p655_p5 = pnand %p654_p8, %p653_p7  ;;  %p659_p10 = scmp.lt.u32.totalorder %s652_s8, %s1137_s1 }
  0x1d   : > { %p656_p9 = pneg %p655_p5 }
  0x1f   : > { %p661_p1 = pnand %p659_p10, %p656_p9 }
  0x21   : > { %664 = shalt.err (!%p661_p1)
}
  0x22   : > { %s665_s19 = scalar_lea.vmem %s133_s28, 16  ;;  %s672_s20 = scalar_lea.vmem %s133_s28, 32 }
  0x23   : > { %p666_p2 = scmp.ne.s32.totalorder %s133_s28, %s665_s19  ;;  %p673_p11 = scmp.lt.s32.totalorder %s133_s28, %s133_s28 }
  0x24   : > { %p674_p6 = scmp.lt.s32.totalorder %s672_s20, %s665_s19 }
  0x25   : > { %p668_p4 = pnand %p666_p2, %p654_p8 }
  0x26   : > { %p675_p13 = por %p674_p6, %p673_p11 }
  0x27   : > { %p669_p12 = pneg %p668_p4 }
  0x29   : > { %p676_p3 = pnand %p675_p13, %p669_p12 }
  0x2b   : > { %679 = shalt.err (!%p676_p3)
}
  0x2c   : > { %596 = dma.hbm_to_vmem [thread:$0]  (!%p907_p0), %s1137_s1, 16, %s133_s28, [#allocation6]  }
  0x2d   : > { %s154_s4 = sand.u32 1, %s804_s14   ;;  %s680_s8 = scalar_lea.hbm %s1138_s2, 16 }
  0x2e   : > { %p681_p4 = scmp.ne.s32.totalorder %s1138_s2, %s680_s8  ;;  %p687_p12 = scmp.lt.u32.totalorder %s680_s8, %s1138_s2 }
  0x30   : > { %p683_p6 = pnand %p681_p4, %p654_p8 }
  0x32   : > { %p684_p11 = pneg %p683_p6 }
  0x34   : > { %p689_p13 = pnand %p687_p12, %p684_p11 }
  0x36   : > { %692 = shalt.err (!%p689_p13)
}
  0x37   : > { %s693_s28 = scalar_lea.vmem %s917_s5, 16  ;;  %s700_s19 = scalar_lea.vmem %s917_s5, 32 }
  0x38   : > { %p694_p3 = scmp.ne.s32.totalorder %s917_s5, %s693_s28  ;;  %p701_p9 = scmp.lt.s32.totalorder %s917_s5, %s917_s5 }
  0x39   : > { %p702_p10 = scmp.lt.s32.totalorder %s700_s19, %s693_s28 }
  0x3a   : > { %p696_p7 = pnand %p694_p3, %p654_p8 }
  0x3b   : > { %p703_p1 = por %p702_p10, %p701_p9 }
  0x3c   : > { %p697_p5 = pneg %p696_p7 }
  0x3e   : > { %p704_p2 = pnand %p703_p1, %p697_p5 }
  0x40   : > { %707 = shalt.err (!%p704_p2)
}
  0x41   : > { %599 = dma.hbm_to_vmem [thread:$0]  (!%p907_p0), %s1138_s2, 16, %s917_s5, [#allocation6]  }
  0x42   : > { %s485_s27 = sshll.u32 %s154_s4, 7  ;;  %s516_s6 = sshll.u32 %s808_s15, 11 }
  0x43   : > { %s972_s9 = scalar_lea.hbm %s1136_s0, %s516_s6  ;;  %s158_s29 = scalar_lea.vmem [#allocation2], %s485_s27 }
  0x44   : > { %s165_s10 = sshll.u32 %s158_s29, 4  ;;  %s976_s11 = scalar_lea.sflag [#allocation3], %s154_s4  ;;  %s974_s10 = int_to_ptr.vmem [resolvable:$true] %s165_s10 }
  0x45   : > { %s708_s17 = scalar_lea.hbm %s972_s9, 2048  ;;  %p1152_p0 = scmp.ne.s32.totalorder %s1151_s30, 0 }
  0x46   : > { %p709_p8 = scmp.ne.s32.totalorder %s972_s9, %s708_s17  ;;  %s713_s19 = scalar_lea.hbm %s1136_s0, 8192 }
  0x47   : > { %p710_p4 = pneg %p1152_p0  ;;  %p714_p12 = scmp.lt.u32.totalorder %s972_s9, %s1136_s0 }
  0x48   : > { %p715_p13 = scmp.lt.u32.totalorder %s713_s19, %s708_s17  ;;  %p717_p7 = scmp.lt.u32.totalorder %s708_s17, %s972_s9 }
  0x49   : > { %p711_p6 = pnand %p710_p4, %p709_p8 }
  0x4a   : > { %p716_p3 = por %p715_p13, %p714_p12 }
  0x4b   : > { %p712_p11 = pneg %p711_p6 }
  0x4c   : > { %p718_p5 = por %p717_p7, %p716_p3 }
  0x4e   : > { %p719_p9 = pnand %p718_p5, %p712_p11 }
  0x50   : > { %722 = shalt.err (!%p719_p9)
}
  0x51   : > { %s723_s4 = scalar_lea.vmem %s974_s10, 2048  ;;  %s812_s27 = smov [#allocation2]  }
  0x52   : > { %p724_p10 = scmp.ne.s32.totalorder %s974_s10, %s723_s4  ;;  %s728_s6 = sshll.u32 %s812_s27, 4  ;;  %s729_s6 = int_to_ptr.vmem [resolvable:$false] %s728_s6 }
  0x53   : > { %s730_s7 = scalar_lea.vmem %s729_s6, 4096  ;;  %p731_p8 = scmp.lt.s32.totalorder %s974_s10, %s729_s6 }
  0x54   : > { %p726_p1 = pnand %p724_p10, %p710_p4  ;;  %p732_p6 = scmp.lt.s32.totalorder %s730_s7, %s723_s4 }
  0x56   : > { %p727_p2 = pneg %p726_p1  ;;  %p733_p12 = por %p732_p6, %p731_p8 }
  0x58   : > { %p734_p13 = pnand %p733_p12, %p727_p2 }
  0x5a   : > { %737 = shalt.err (!%p734_p13)
}
  0x5b   : > { %s813_s8 = smov 128   ;;  %s814_s29 = smov 8  }
  0x5c   : > { %603 = dma.hbm_to_vmem [thread:$0]  (!%p1152_p0), %s972_s9, 2048, %s974_s10, %s976_s11, %s813_s8, %s813_s8, %s814_s29  }
  0x5d   : > { %p1153_p4 = scmp.ne.s32.totalorder %s1149_s26, 0 }
  0x5e   : > { %s1007_s17 = sand.u32 (!%p1153_p4), 1, %s800_s13   ;;  %p1154_p11 = scmp.ne.s32.totalorder (!%p1153_p4), %s1146_s23, 0 }
  0x5f   : > { %177 = sbr.rel (%p1153_p4) target bundleno = 142 (0x8e), region = 32  ;;  %s489_s5 = sshll.u32 (!%p1153_p4), %s1007_s17, 7 }
  0x60   : > { %s180_s28 = scalar_lea.sflag (!%p1153_p4), [#allocation3], %s1007_s17  ;;  %s1011_s19 = scalar_lea.vmem (!%p1153_p4), [#allocation2], %s489_s5 }
  0x66   : > { %783 = dma.done.wait (%p1154_p11), %s180_s28, 2048  }
  0x67   : > { %785 = vsyncadd (%p1154_p11), %s180_s28, 4294965248  ;;  %p1155_p0 = scmp.eq.s32.totalorder %s859_s16, 0 }
  0x69   : > { %787 = dma.done.wait (%p1155_p0), [#allocation6], 32   ;;  %p1156_p3 = pmov %p1155_p0 }
  0x6a   : > { %v216_v0 = vld [vmem:[%s1011_s19] sm:$0xff]  ;;  %v217_v1 = vld [vmem:[%s1011_s19 + $0x8] sm:$0xff]  ;;  %v218_v6 = vld [vmem:[%s1011_s19 + $0x10] sm:$0xff]  ;;  %s492_s23 = sshll.u32 %s1007_s17, 6  ;;  %s533_s9 = sshll.u32 %s859_s16, 10 }
  0x6b   : > { %789 = vsyncadd (%p1156_p3), [#allocation6], 4294967264  ;;  %v1023_v2 = vld [vmem:[#allocation5] ss:$0 sm:$0xff]  ;;  %v1027_v5 = vld [vmem:[#allocation7] ss:$0 sm:$0xff]  ;;  %s1091_s20 = scalar_lea.hbm %s1139_s3, %s533_s9 }
  0x6c   : > { %v239_v3 = vmul.f32 %v1023_v2, %v216_v0  ;;  %v240_v4 = vmul.f32 %v1023_v2, %v217_v1  ;;  %v219_v7 = vld [vmem:[%s1011_s19 + $0x18] sm:$0xff]  ;;  %v241_v8 = vmul.f32 %v1023_v2, %v218_v6  ;;  %v220_v10 = vld [vmem:[%s1011_s19 + $0x20] sm:$0xff]  ;;  %v221_v11 = vld [vmem:[%s1011_s19 + $0x28] sm:$0xff]  ;;  %s1061_s26 = scalar_lea.vmem [#allocation8], %s492_s23  ;;  %s375_s16 = scalar_lea.sflag [#allocation4], %s1007_s17 }
  0x6d   : > { %v242_v9 = vmul.f32 %v1023_v2, %v219_v7  ;;  %v222_v12 = vld [vmem:[%s1011_s19 + $0x30] sm:$0xff]  ;;  %v243_v15 = vmul.f32 %v1023_v2, %v220_v10  ;;  %v244_v16 = vmul.f32 %v1023_v2, %v221_v11  ;;  %v223_v17 = vld [vmem:[%s1011_s19 + $0x38] sm:$0xff]  ;;  %v224_v22 = vld [vmem:[%s1011_s19 + $0x40] sm:$0xff]  ;;  %s388_s30 = sshll.u32 %s1061_s26, 4  ;;  %p1157_p5 = scmp.ne.s32.totalorder %s1147_s24, 0  ;;  %s1085_s30 = int_to_ptr.vmem [resolvable:$true] %s388_s30 }
  0x6e   : > { %v262_v13 = vadd.f32 %v1027_v5, %v239_v3  ;;  %v263_v14 = vadd.f32 %v1027_v5, %v240_v4  ;;  %v264_v18 = vadd.f32 %v1027_v5, %v241_v8  ;;  %v245_v20 = vmul.f32 %v1023_v2, %v222_v12  ;;  %v225_v27 = vld [vmem:[%s1011_s19 + $0x48] sm:$0xff]  ;;  %v226_v32 = vld [vmem:[%s1011_s19 + $0x50] sm:$0xff]  ;;  %v227_v33 = vld [vmem:[%s1011_s19 + $0x58] sm:$0xff]  ;;  %s738_s22 = scalar_lea.vmem %s1085_s30, 1024  ;;  %s815_s4 = smov [#allocation8]  }
  0x6f   : > { %v265_v19 = vadd.f32 %v1027_v5, %v242_v9  ;;  %v246_v21 = vmul.f32 %v1023_v2, %v223_v17  ;;  %v266_v25 = vadd.f32 %v1027_v5, %v243_v15  ;;  %v267_v26 = vadd.f32 %v1027_v5, %v244_v16  ;;  %v228_v38 = vld [vmem:[%s1011_s19 + $0x60] sm:$0xff]  ;;  %v229_v39 = vld [vmem:[%s1011_s19 + $0x68] sm:$0xff]  ;;  %v230_v44 = vld [vmem:[%s1011_s19 + $0x70] sm:$0xff]  ;;  %p739_p7 = scmp.ne.s32.totalorder %s1085_s30, %s738_s22  ;;  %s742_s27 = sshll.u32 %s815_s4, 4  ;;  %s743_s27 = int_to_ptr.vmem [resolvable:$false] %s742_s27 }
  0x70   : > { %v278_v23 = vmax.f32 %v262_v13, 0.0  ;;  %v279_v24 = vmax.f32 %v263_v14, 0.0  ;;  %v280_v28 = vmax.f32 %v264_v18, 0.0  ;;  %v268_v30 = vadd.f32 %v1027_v5, %v245_v20  ;;  %v231_v49 = vld [vmem:[%s1011_s19 + $0x78] sm:$0xff]  ;;  %s744_s6 = scalar_lea.vmem %s743_s27, 2048  ;;  %p745_p1 = scmp.lt.s32.totalorder %s1085_s30, %s743_s27 }
  0x71   : > { %v281_v29 = vmax.f32 %v265_v19, 0.0  ;;  %v269_v31 = vadd.f32 %v1027_v5, %v246_v21  ;;  %v282_v35 = vmax.f32 %v266_v25, 0.0  ;;  %v283_v36 = vmax.f32 %v267_v26, 0.0  ;;  %p740_p9 = pnand %p739_p7, %p1157_p5  ;;  %p746_p2 = scmp.lt.s32.totalorder %s744_s6, %s738_s22 }
  0x72   : > { %v537_v34 = vpack.c.bf16 %v279_v24, %v278_v23  ;;  %v247_v37 = vmul.f32 %v1023_v2, %v224_v22  ;;  %v284_v41 = vmax.f32 %v268_v30, 0.0  ;;  %v248_v43 = vmul.f32 %v1023_v2, %v225_v27 }
  0x73   : > { %v542_v40 = vpack.c.bf16 %v281_v29, %v280_v28  ;;  %v285_v42 = vmax.f32 %v269_v31, 0.0  ;;  %v547_v45 = vpack.c.bf16 %v283_v36, %v282_v35  ;;  %v249_v47 = vmul.f32 %v1023_v2, %v226_v32  ;;  %p741_p10 = pneg %p740_p9  ;;  %p747_p8 = por %p746_p2, %p745_p1 }
  0x74   : > { %538 = vst [vmem:[%s1061_s26] sm:$0xff] %v537_v34   ;;  %v270_v46 = vadd.f32 %v1027_v5, %v247_v37  ;;  %v250_v48 = vmul.f32 %v1023_v2, %v227_v33  ;;  %v271_v51 = vadd.f32 %v1027_v5, %v248_v43  ;;  %v251_v52 = vmul.f32 %v1023_v2, %v228_v38 }
  0x75   : > { %574 = vst [vmem:[%s1061_s26 + $0x8] sm:$0xff] %v542_v40   ;;  %v552_v50 = vpack.c.bf16 %v285_v42, %v284_v41  ;;  %v252_v53 = vmul.f32 %v1023_v2, %v229_v39  ;;  %575 = vst [vmem:[%s1061_s26 + $0x10] sm:$0xff] %v547_v45   ;;  %v272_v55 = vadd.f32 %v1027_v5, %v249_v47  ;;  %p748_p6 = pnand %p747_p8, %p741_p10 }
  0x76   : > { %v286_v54 = vmax.f32 %v270_v46, 0.0  ;;  %v273_v56 = vadd.f32 %v1027_v5, %v250_v48  ;;  %v253_v57 = vmul.f32 %v1023_v2, %v230_v44  ;;  %v287_v58 = vmax.f32 %v271_v51, 0.0 }
  0x77   : > { %576 = vst [vmem:[%s1061_s26 + $0x18] sm:$0xff] %v552_v50   ;;  %v274_v59 = vadd.f32 %v1027_v5, %v251_v52  ;;  %v275_v60 = vadd.f32 %v1027_v5, %v252_v53  ;;  %v254_v61 = vmul.f32 %v1023_v2, %v231_v49  ;;  %v288_v62 = vmax.f32 %v272_v55, 0.0 }
  0x78   : > { %v289_v63 = vmax.f32 %v273_v56, 0.0  ;;  %v276_v0 = vadd.f32 %v1027_v5, %v253_v57  ;;  %v557_v1 = vpack.c.bf16 %v287_v58, %v286_v54 }
  0x79   : > { %v290_v3 = vmax.f32 %v274_v59, 0.0  ;;  %v291_v4 = vmax.f32 %v275_v60, 0.0  ;;  %v277_v6 = vadd.f32 %v1027_v5, %v254_v61 }
  0x7a   : > { %v562_v7 = vpack.c.bf16 %v289_v63, %v288_v62  ;;  %v292_v8 = vmax.f32 %v276_v0, 0.0  ;;  %577 = vst [vmem:[%s1061_s26 + $0x20] sm:$0xff] %v557_v1  }
  0x7b   : > { %v567_v2 = vpack.c.bf16 %v291_v4, %v290_v3  ;;  %v293_v9 = vmax.f32 %v277_v6, 0.0 }
  0x7c   : > { %578 = vst [vmem:[%s1061_s26 + $0x28] sm:$0xff] %v562_v7  }
  0x7d   : > { %579 = vst [vmem:[%s1061_s26 + $0x30] sm:$0xff] %v567_v2   ;;  %v572_v5 = vpack.c.bf16 %v293_v9, %v292_v8 }
  0x7f   : > { %580 = vst [vmem:[%s1061_s26 + $0x38] sm:$0xff] %v572_v5  }
  0x80   : > { %751 = shalt.err (!%p748_p6)
}
  0x81   : > { %s752_s7 = scalar_lea.hbm %s1091_s20, 1024  ;;  %s756_s5 = scalar_lea.hbm %s1139_s3, 4096 }
  0x82   : > { %p753_p12 = scmp.ne.s32.totalorder %s1091_s20, %s752_s7  ;;  %p757_p11 = scmp.lt.u32.totalorder %s1091_s20, %s1139_s3 }
  0x83   : > { %p758_p0 = scmp.lt.u32.totalorder %s756_s5, %s752_s7  ;;  %p760_p7 = scmp.lt.u32.totalorder %s752_s7, %s1091_s20 }
  0x84   : > { %p754_p13 = pnand %p753_p12, %p1157_p5 }
  0x85   : > { %p759_p3 = por %p758_p0, %p757_p11 }
  0x86   : > { %p755_p4 = pneg %p754_p13 }
  0x87   : > { %p761_p9 = por %p760_p7, %p759_p3 }
  0x89   : > { %p762_p10 = pnand %p761_p9, %p755_p4 }
  0x8b   : > { %765 = shalt.err (!%p762_p10)
}
  0x8c   : > { %s816_s23 = smov 64   ;;  %s817_s26 = smov 4  }
  0x8d   : > { %591 = dma.vmem_to_hbm [thread:$0]  (%p1157_p5), %s1085_s30, 1024, %s1091_s20, %s375_s16, %s816_s23, %s816_s23, %s817_s26  }
  0x8e PF: > { %p613_p1 = scmp.ge.s32.totalorder %s808_s15, 2  ;;  %s403_s9 = sand.u32 1, %s796_s12  }
  0x8f   : > { %p1158_p2 = scmp.ne.s32.totalorder %s1148_s25, 0  ;;  %s404_s10 = scalar_lea.sflag [#allocation4], %s403_s9 }
  0x91   : > { %p605_p8 = pnand %p613_p1, %p1158_p2 }
  0x93   : > { %791 = dma.done.wait (!%p605_p8), %s404_s10, 1024  }
  0x94   : > { %793 = vsyncadd (!%p605_p8), %s404_s10, 4294966272  ;;  %p17_p6 = scmp.ge.s32.totalorder %s863_s18, 6   ;;  %s1159_s12 = smov %s800_s13 }
  0x95   : > { %s1160_s13 = smov %s804_s14  ;;  %s1161_s14 = smov %s875_s21 }
  0x96   : > { %s1162_s15 = smov %s863_s18  ;;  %19 = sbr.rel (!%p17_p6) target bundleno = 6 (0x6), region = 85 }
  0x9d   :  { %409 = vsyncpa [#allocation3], 1 }
  0x9e   :  { %411 = vsyncpa [#allocation3 + $0x1], 1 }
  0x9f   :  { %412 = vsyncpa [#allocation6], 1 }
  0xa0   :  { %413 = vsyncpa [#allocation4], 1 }
  0xa1   :  { %415 = vsyncpa [#allocation4 + $0x1], 1 }

// kernel: basic_block_forward.4
= control target key start
LH: loop header
LB: loop body
LE: loop exit
PB: predicated region body
PF: predicated region fallthrough
CT: control target
= control target key end

     0   :  { %9 = vsyncpa [#allocation3], 0  ;;  %s1264_s0 = inlined_call_operand.hbm [shape: bf16[512,36], index: 0, kind: input, shape index: {}]   ;;  %s1265_s1 = inlined_call_operand.hbm [shape: bf16[36,128], index: 1, kind: input, shape index: {}]   ;;  %s1266_s2 = inlined_call_operand.hbm [shape: f32[512,128], index: 2, kind: output, shape index: {0}]   ;;  %s1267_s3 = inlined_call_operand.hbm [shape: f32[2,128], index: 3, kind: output, shape index: {1}]  }
   0x1   :  { %11 = vsyncpa [#allocation3 + $0x1], 0 }
   0x2   :  { %12 = vsyncpa [#allocation6], 0 }
   0x3   :  { %13 = vsyncpa [#allocation4], 0 }
   0x4   :  { %15 = vsyncpa [#allocation4 + $0x1], 0 }
   0x5   :  { %16 = vsyncpa [#allocation9], 0  ;;  %s961_s12 = smov 0   ;;  %s963_s13 = smov 0  }
   0x6   :  { %s965_s14 = smov 0   ;;  %s967_s15 = smov 0  }
   0x7 LB: > { %s982_s16 = sadd.s32 4294967295, %s930_s15   ;;  %s611_s17 = sadd.s32 4294967294, %s930_s15   ;;  %s930_s15 = sphi %s967_s15, %s1292_s15   ;;  %s926_s14 = sphi %s965_s14, %s1291_s14   ;;  %s922_s13 = sphi %s963_s13, %s1290_s13   ;;  %s918_s12 = sphi %s961_s12, %s1289_s12  }
   0x8   : > { %p42_p0 = scmp.ne.s32.totalorder %s922_s13, %s918_s12  ;;  %p1268_p1 = scmp.eq.s32.totalorder %s982_s16, 0 }
   0x9   : > { %p93_p3 = scmp.eq.s32.totalorder %s611_s17, 3  ;;  %p612_p5 = scmp.ge.s32.totalorder %s930_s15, 1 }
   0xa   : > { %p991_p4 = por %p1268_p1, %p42_p0  ;;  %p121_p7 = scmp.lt.s32.totalorder %s930_s15, 5 }
   0xb   : > { %p996_p6 = por %p93_p3, %p42_p0  ;;  %s932_s21 = smov [#allocation5]  }
   0xc   : > { %s1271_s18 = scalar_select %p991_p4, 1, 0 }
   0xd   : > { %s1272_s19 = scalar_select %p996_p6, 1, 0 }
   0xe   : > { %p1002_p9 = pnand %p612_p5, %p121_p7  ;;  %s133_s22 = sshll.u32 %s932_s21, 4  ;;  %s134_s22 = int_to_ptr.vmem [resolvable:$true] %s133_s22 }
   0xf   : > { %s1015_s24 = sadd.s32 1, %s930_s15   ;;  %s29_s25 = sadd.s32 1, %s926_s14 }
  0x10   : > { %s1273_s20 = scalar_select %p1002_p9, 1, 0 }
  0x11   : > { %p704_p10 = pneg %p1002_p9  ;;  %s26_s26 = ssub.s32 %s930_s15, %s1015_s24 }
  0x12   : > { %s772_s29 = scalar_lea.hbm %s1265_s1, 320 }
  0x13   : > { %p1010_p11 = pnand %p704_p10, %p1268_p1  ;;  %p773_p12 = scmp.ne.s32.totalorder %s1265_s1, %s772_s29 }
  0x14   : > { %p779_p5 = scmp.lt.u32.totalorder %s772_s29, %s1265_s1 }
  0x15   : > { %p774_p13 = pneg %p1010_p11 }
  0x17   : > { %p775_p0 = pnand %p774_p13, %p773_p12 }
  0x19   : > { %p776_p3 = pneg %p775_p0 }
  0x1b   : > { %p781_p7 = pnand %p779_p5, %p776_p3 }
  0x1d   : > { %784 = shalt.err (!%p781_p7)
}
  0x1e   : > { %s785_s7 = scalar_lea.vmem %s134_s22, 320  ;;  %p793_p2 = scmp.lt.s32.totalorder %s134_s22, %s134_s22 }
  0x1f   : > { %p786_p10 = scmp.ne.s32.totalorder %s134_s22, %s785_s7  ;;  %p794_p6 = scmp.lt.s32.totalorder %s785_s7, %s785_s7 }
  0x21   : > { %p788_p8 = pnand %p786_p10, %p774_p13  ;;  %p795_p4 = por %p794_p6, %p793_p2 }
  0x23   : > { %p789_p1 = pneg %p788_p8 }
  0x25   : > { %p796_p9 = pnand %p795_p4, %p789_p1 }
  0x27   : > { %799 = shalt.err (!%p796_p9)
}
  0x28   : > { %s933_s8 = smov 64   ;;  %s934_s9 = smov 4  }
  0x29   : > { %707 = dma.hbm_to_vmem [thread:$0]  (!%p1010_p11), %s1265_s1, 320, %s134_s22, [#allocation6], %s933_s8, %s933_s8, %s934_s9  }
  0x2a   : > { %p27_p1 = scmp.eq.s32.totalorder %s26_s26, 0  ;;  %p36_p2 = scmp.ne.s32.totalorder %s926_s14, %s922_s13 }
  0x2b   : > { %p37_p4 = scmp.eq.s32.totalorder %s930_s15, 0  ;;  %p717_p6 = scmp.lt.s32.totalorder %s930_s15, 4 }
  0x2c   : > { %s1044_s17 = scalar_select %p27_p1, %s926_s14, %s29_s25  }
  0x2d   : > { %p38_p8 = por %p37_p4, %p36_p2  ;;  %p1275_p9 = scmp.eq.s32.totalorder %s982_s16, 3 }
  0x2e   : > { %s147_s23 = sand.u32 1, %s926_s14   ;;  %s649_s27 = sshll.u32 %s930_s15, 10 }
  0x2f   : > { %p1048_p12 = por %p1275_p9, %p36_p2  ;;  %s615_s28 = sshll.u32 %s147_s23, 6 }
  0x30   : > { %s1057_s4 = scalar_lea.hbm %s1264_s0, %s649_s27  ;;  %s151_s22 = scalar_lea.vmem [#allocation2], %s615_s28 }
  0x31   : > { %s158_s25 = sshll.u32 %s151_s22, 4  ;;  %p1059_p11 = pnand %p717_p6, %p38_p8  ;;  %s1063_s25 = int_to_ptr.vmem [resolvable:$true] %s158_s25 }
  0x32   : > { %s1065_s5 = scalar_lea.sflag [#allocation3], %s147_s23  ;;  %s800_s6 = scalar_lea.hbm %s1057_s4, 1024 }
  0x33   : > { %p801_p13 = scmp.ne.s32.totalorder %s1057_s4, %s800_s6  ;;  %p802_p0 = pneg %p1059_p11 }
  0x34   : > { %s805_s11 = scalar_lea.hbm %s1264_s0, 4096  ;;  %p806_p7 = scmp.lt.u32.totalorder %s1057_s4, %s1264_s0 }
  0x35   : > { %p803_p3 = pnand %p802_p0, %p801_p13  ;;  %p807_p10 = scmp.lt.u32.totalorder %s805_s11, %s800_s6 }
  0x36   : > { %p809_p2 = scmp.lt.u32.totalorder %s800_s6, %s1057_s4 }
  0x37   : > { %p804_p5 = pneg %p803_p3  ;;  %p808_p1 = por %p807_p10, %p806_p7 }
  0x39   : > { %p810_p4 = por %p809_p2, %p808_p1 }
  0x3b   : > { %p811_p6 = pnand %p810_p4, %p804_p5 }
  0x3d   : > { %814 = shalt.err (!%p811_p6)
}
  0x3e   : > { %s815_s23 = scalar_lea.vmem %s1063_s25, 1024  ;;  %s935_s29 = smov [#allocation2]  }
  0x3f   : > { %p816_p8 = scmp.ne.s32.totalorder %s1063_s25, %s815_s23  ;;  %s820_s30 = sshll.u32 %s935_s29, 4  ;;  %s821_s30 = int_to_ptr.vmem [resolvable:$false] %s820_s30 }
  0x40   : > { %s822_s22 = scalar_lea.vmem %s821_s30, 2048  ;;  %p823_p3 = scmp.lt.s32.totalorder %s1063_s25, %s821_s30 }
  0x41   : > { %p818_p9 = pnand %p816_p8, %p802_p0  ;;  %p824_p7 = scmp.lt.s32.totalorder %s822_s22, %s815_s23 }
  0x43   : > { %p819_p13 = pneg %p818_p9  ;;  %p825_p10 = por %p824_p7, %p823_p3 }
  0x45   : > { %p826_p1 = pnand %p825_p10, %p819_p13 }
  0x47   : > { %829 = shalt.err (!%p826_p1)
}
  0x48   : > { %711 = dma.hbm_to_vmem [thread:$0]  (!%p1059_p11), %s1057_s4, 1024, %s1063_s25, %s1065_s5, %s933_s8, %s933_s8, %s934_s9  }
  0x49   : > { %p1278_p0 = scmp.ne.s32.totalorder %s1273_s20, 0 }
  0x4a   : > { %s1099_s6 = sand.u32 (!%p1278_p0), 1, %s922_s13   ;;  %p1279_p5 = scmp.ne.s32.totalorder (!%p1278_p0), %s1271_s18, 0 }
  0x4b   : > { %170 = sbr.rel (%p1278_p0) target bundleno = 399 (0x18f), region = 28  ;;  %s619_s7 = sshll.u32 (!%p1278_p0), %s1099_s6, 6 }
  0x4c   : > { %s173_s10 = scalar_lea.sflag (!%p1278_p0), [#allocation3], %s1099_s6  ;;  %s1103_s11 = scalar_lea.vmem (!%p1278_p0), [#allocation2], %s619_s7 }
  0x52   : > { %901 = dma.done.wait (%p1279_p5), %s173_s10, 1024  }
  0x53   : > { %903 = vsyncadd (%p1279_p5), %s173_s10, 4294966272  ;;  %p1280_p11 = scmp.eq.s32.totalorder %s982_s16, 0 }
  0x55   : > { %905 = dma.done.wait (%p1280_p11), [#allocation6], 320   ;;  %p1281_p2 = pmov %p1280_p11 }
  0x56   : > { %s621_s20 = sshll.u32 %s1099_s6, 7  ;;  %p1282_p4 = scmp.ne.s32.totalorder %s982_s16, 0 }
  0x57   : > { %907 = vsyncadd (%p1281_p2), [#allocation6], 4294966976  ;;  %s1114_s8 = scalar_lea.vmem [#allocation7], %s621_s20  ;;  %v936_v0 = vmov (!%p1282_p4), 0.0  }
  0x58   : > { %209 = sbr.rel (%p1282_p4) target bundleno = 95 (0x5f), region = 40  ;;  %210 = vst [vmem:[#allocation8] sm:$0x3] (!%p1282_p4), %v936_v0 }
  0x5f PF: > { %v761_v1 = vld [vmem:[#allocation5] sm:$0xff]   ;;  %v762_v2 = vld [vmem:[#allocation5 + $0x8] sm:$0xff]   ;;  %vm287_vm0 = vcmask 293888   ;;  %v763_v3 = vld [vmem:[#allocation5 + $0x10] ss:$0 sps:$4 sm:$0x33]  }
  0x60   : > { %662 = vmatprep.subr.bf16.mxu0 %v761_v1  ;;  %v764_v4 = vld [vmem:[%s1103_s11] sm:$0xff]   ;;  %684 = vmatprep.subr.bf16.mxu1 %v761_v1  ;;  %vm312_vm1 = vcmask 1041408   ;;  %v765_v7 = vld [vmem:[%s1103_s11 + $0x8] sm:$0xff]   ;;  %v766_v9 = vld [vmem:[%s1103_s11 + $0x10] sm:$0xff]   ;;  %s650_s18 = sshll.u32 %s982_s16, 11  ;;  %s506_s9 = sshll.u32 %s1114_s8, 4  ;;  %s1168_s9 = int_to_ptr.vmem [resolvable:$true] %s506_s9 }
  0x61   : > { %663 = vmatpush3.bf16.msra.mxu0 %v761_v1  ;;  %687 = vmatpush3.bf16.msra.mxu1 %v761_v1  ;;  %v768_v5 = vld [vmem:[%s1103_s11 + $0x20] sm:$0xff]   ;;  %v314_v6 = vsel %vm312_vm1, %v763_v3, 0  ;;  %v769_v8 = vld [vmem:[%s1103_s11 + $0x28] sm:$0xff]   ;;  %v770_v10 = vld [vmem:[%s1103_s11 + $0x30] sm:$0xff]   ;;  %s1166_s26 = scalar_lea.hbm %s1266_s2, %s650_s18  ;;  %s493_s5 = scalar_lea.sflag [#allocation4], %s1099_s6 }
  0x62   : > { %664 = vmatprep.subr.bf16.mxu0 %v762_v2  ;;  %668 = vmatprep.mubr.msk.bf16.mxu0 %vm287_vm0, %v764_v4  ;;  %v767_v11 = vld [vmem:[%s1103_s11 + $0x18] sm:$0xff]   ;;  %s830_s27 = scalar_lea.vmem %s1168_s9, 2048  ;;  %s937_s28 = smov [#allocation7]  }
  0x63   : > { %685 = vmatprep.subr.bf16.mxu1 %v762_v2  ;;  %676 = vmatprep.mubr.msk.bf16.mxu1 %vm287_vm0, %v768_v5  ;;  %v771_v12 = vld [vmem:[%s1103_s11 + $0x38] sm:$0xff]   ;;  %p831_p6 = scmp.ne.s32.totalorder %s1168_s9, %s830_s27  ;;  %s834_s23 = sshll.u32 %s937_s28, 4  ;;  %s835_s23 = int_to_ptr.vmem [resolvable:$false] %s834_s23 }
  0x64   : > { %s836_s29 = scalar_lea.vmem %s835_s23, 4096  ;;  %p837_p13 = scmp.lt.s32.totalorder %s1168_s9, %s835_s23 }
  0x65   : > { %665 = vmatpush3.bf16.msra.mxu0 %v762_v2  ;;  %688 = vmatpush3.bf16.msra.mxu1 %v762_v2  ;;  %p832_p8 = pnand %p831_p6, %p1048_p12  ;;  %p838_p3 = scmp.lt.s32.totalorder %s836_s29, %s830_s27 }
  0x66   : > { %690 = vmatprep.subr.msk.bf16.mxu0 %vm312_vm1, %v763_v3  ;;  %691 = vmatprep.subr.msk.bf16.mxu1 %vm312_vm1, %v763_v3 }
  0x67   : > { %p833_p9 = pneg %p832_p8  ;;  %p839_p7 = por %p838_p3, %p837_p13 }
  0x69   : > { %667 = vmatpush3.bf16.msra.mxu0 %v314_v6  ;;  %689 = vmatpush3.bf16.msra.mxu1 %v314_v6  ;;  %p840_p10 = pnand %p839_p7, %p833_p9 }
  0x6c   : > { %669 = vmatmul.mubr.msk.bf16.vlgmr.msra.gmra.mrb[0].mxu0 %vm287_vm0, %v765_v7  ;;  %677 = vmatmul.mubr.msk.bf16.vlgmr.msra.gmra.mrb[0].mxu1 %vm287_vm0, %v769_v8 }
  0x6d   : > { %672 = vmatprep.mubr.msk.bf16.mxu0 %vm287_vm0, %v766_v9  ;;  %680 = vmatprep.mubr.msk.bf16.mxu1 %vm287_vm0, %v770_v10 }
  0x74   : > { %673 = vmatmul.mubr.msk.bf16.gmra.mrb[4].mxu0 %vm287_vm0, %v767_v11  ;;  %681 = vmatmul.mubr.msk.bf16.gmra.mrb[4].mxu1 %vm287_vm0, %v771_v12 }
 0x13f   : > { %v670_v13 = vpop.f32.mrb[0].mxu0  ;;  %v1134_v14 = vpop.f32.mrb[0].mxu1 }
 0x140   : > { %415 = vst [vmem:[%s1114_s8 + $0x10] sm:$0xff] %v670_v13  ;;  %v350_v15 = vpop.f32.mrb[1].mxu0  ;;  %423 = vst [vmem:[%s1114_s8 + $0x50] sm:$0xff] %v1134_v14  ;;  %v1139_v16 = vpop.f32.mrb[1].mxu1  ;;  %v453_v24 = vmul.f32 %v670_v13, %v670_v13 }
 0x141   : > { %413 = vst [vmem:[%s1114_s8] sm:$0xff] %v350_v15  ;;  %v671_v17 = vpop.f32.mrb[2].mxu0  ;;  %421 = vst [vmem:[%s1114_s8 + $0x40] sm:$0xff] %v1139_v16  ;;  %v1144_v18 = vpop.f32.mrb[2].mxu1  ;;  %v451_v21 = vmul.f32 %v350_v15, %v350_v15 }
 0x142   : > { %416 = vst [vmem:[%s1114_s8 + $0x18] sm:$0xff] %v671_v17  ;;  %v353_v19 = vpop.f32.mrb[3].mxu0  ;;  %424 = vst [vmem:[%s1114_s8 + $0x58] sm:$0xff] %v1144_v18  ;;  %v1149_v20 = vpop.f32.mrb[3].mxu1  ;;  %v454_v27 = vmul.f32 %v671_v17, %v671_v17 }
 0x143   : > { %414 = vst [vmem:[%s1114_s8 + $0x8] sm:$0xff] %v353_v19  ;;  %v430_v22 = vadd.f32 %v353_v19, %v350_v15  ;;  %v452_v23 = vmul.f32 %v353_v19, %v353_v19  ;;  %422 = vst [vmem:[%s1114_s8 + $0x48] sm:$0xff] %v1149_v20 }
 0x145   : > { %v431_v25 = vadd.f32 %v670_v13, %v430_v22  ;;  %v467_v26 = vadd.f32 %v452_v23, %v451_v21 }
 0x147   : > { %v468_v28 = vadd.f32 %v467_v26, %v453_v24  ;;  %v674_v29 = vpop.f32.mrb[4].mxu0  ;;  %v432_v30 = vadd.f32 %v671_v17, %v431_v25  ;;  %v1156_v31 = vpop.f32.mrb[4].mxu1 }
 0x148   : > { %419 = vst [vmem:[%s1114_s8 + $0x30] sm:$0xff] %v674_v29  ;;  %v366_v32 = vpop.f32.mrb[5].mxu0  ;;  %427 = vst [vmem:[%s1114_s8 + $0x70] sm:$0xff] %v1156_v31  ;;  %v1161_v33 = vpop.f32.mrb[5].mxu1 }
 0x149   : > { %417 = vst [vmem:[%s1114_s8 + $0x20] sm:$0xff] %v366_v32  ;;  %v433_v34 = vadd.f32 %v432_v30, %v366_v32  ;;  %v455_v35 = vmul.f32 %v366_v32, %v366_v32  ;;  %v469_v36 = vadd.f32 %v468_v28, %v454_v27  ;;  %v675_v37 = vpop.f32.mrb[6].mxu0  ;;  %425 = vst [vmem:[%s1114_s8 + $0x60] sm:$0xff] %v1161_v33  ;;  %v1173_v38 = vpop.f32.mrb[6].mxu1 }
 0x14a   : > { %420 = vst [vmem:[%s1114_s8 + $0x38] sm:$0xff] %v675_v37  ;;  %v369_v39 = vpop.f32.mrb[7].mxu0  ;;  %428 = vst [vmem:[%s1114_s8 + $0x78] sm:$0xff] %v1173_v38  ;;  %v401_v40 = vpop.f32.mrb[7].mxu1 }
 0x14b   : > { %v470_v41 = vadd.f32 %v469_v36, %v455_v35  ;;  %418 = vst [vmem:[%s1114_s8 + $0x28] sm:$0xff] %v369_v39  ;;  %v434_v42 = vadd.f32 %v433_v34, %v369_v39  ;;  %v456_v43 = vmul.f32 %v369_v39, %v369_v39  ;;  %426 = vst [vmem:[%s1114_s8 + $0x68] sm:$0xff] %v401_v40 }
 0x14c   : > { %843 = shalt.err (!%p840_p10)
}
 0x14d   : > { %s844_s30 = scalar_lea.hbm %s1166_s26, 2048  ;;  %s848_s10 = scalar_lea.hbm %s1266_s2, 8192 }
 0x14e   : > { %p845_p1 = scmp.ne.s32.totalorder %s1166_s26, %s844_s30  ;;  %p849_p11 = scmp.lt.u32.totalorder %s1166_s26, %s1266_s2 }
 0x14f   : > { %p850_p2 = scmp.lt.u32.totalorder %s848_s10, %s844_s30  ;;  %p852_p6 = scmp.lt.u32.totalorder %s844_s30, %s1166_s26 }
 0x150   : > { %p846_p0 = pnand %p845_p1, %p1048_p12 }
 0x151   : > { %p851_p4 = por %p850_p2, %p849_p11 }
 0x152   : > { %p847_p5 = pneg %p846_p0 }
 0x153   : > { %p853_p8 = por %p852_p6, %p851_p4 }
 0x155   : > { %p854_p9 = pnand %p853_p8, %p847_p5 }
 0x157   : > { %857 = shalt.err (!%p854_p9)
}
 0x158   : > { %s938_s8 = smov 128   ;;  %s939_s18 = smov 8   ;;  %v457_v44 = vmul.f32 %v674_v29, %v674_v29  ;;  %v435_v45 = vadd.f32 %v674_v29, %v434_v42  ;;  %v471_v46 = vadd.f32 %v470_v41, %v456_v43  ;;  %v458_v47 = vmul.f32 %v675_v37, %v675_v37  ;;  %v429_v21 = vld [vmem:[#allocation8] sm:$0x3] }
 0x159   : > { %698 = dma.vmem_to_hbm [thread:$0]  (%p1048_p12), %s1168_s9, 2048, %s1166_s26, %s493_s5, %s938_s8, %s938_s8, %s939_s18   ;;  %v459_v50 = vmul.f32 %v1139_v16, %v1139_v16  ;;  %v460_v55 = vmul.f32 %v1149_v20, %v1149_v20  ;;  %v461_v56 = vmul.f32 %v1134_v14, %v1134_v14  ;;  %v462_v59 = vmul.f32 %v1144_v18, %v1144_v18 }
 0x15a   : > { %v472_v48 = vadd.f32 %v471_v46, %v457_v44  ;;  %v436_v49 = vadd.f32 %v675_v37, %v435_v45  ;;  %v463_v62 = vmul.f32 %v1161_v33, %v1161_v33  ;;  %v464_v3 = vmul.f32 %v401_v40, %v401_v40  ;;  %s940_s21 = smov [#allocation8]   ;;  %p1283_p13 = scmp.eq.s32.totalorder %s982_s16, 3 }
 0x15b   : > { %v465_v4 = vmul.f32 %v1156_v31, %v1156_v31  ;;  %v466_v7 = vmul.f32 %v1173_v38, %v1173_v38  ;;  %vm488_vm2 = vcmask 1040384   ;;  %s520_s6 = sshll.u32 %s940_s21, 4  ;;  %s521_s6 = int_to_ptr.vmem [resolvable:$true] %s520_s6 }
 0x15c   : > { %v437_v51 = vadd.f32 %v436_v49, %v1139_v16  ;;  %v473_v52 = vadd.f32 %v472_v48, %v458_v47  ;;  %s858_s9 = scalar_lea.vmem %s521_s6, 32  ;;  %p865_p10 = scmp.lt.s32.totalorder %s521_s6, %s521_s6 }
 0x15d   : > { %p859_p12 = scmp.ne.s32.totalorder %s521_s6, %s858_s9  ;;  %p866_p1 = scmp.lt.s32.totalorder %s858_s9, %s858_s9 }
 0x15e   : > { %v474_v53 = vadd.f32 %v473_v52, %v459_v50  ;;  %v438_v54 = vadd.f32 %v437_v51, %v1149_v20 }
 0x15f   : > { %p860_p3 = pnand %p859_p12, %p1283_p13  ;;  %p867_p0 = por %p866_p1, %p865_p10 }
 0x160   : > { %v439_v57 = vadd.f32 %v1134_v14, %v438_v54  ;;  %v475_v58 = vadd.f32 %v474_v53, %v460_v55 }
 0x161   : > { %p861_p7 = pneg %p860_p3 }
 0x162   : > { %v476_v60 = vadd.f32 %v475_v58, %v461_v56  ;;  %v440_v61 = vadd.f32 %v1144_v18, %v439_v57 }
 0x163   : > { %p868_p5 = pnand %p867_p0, %p861_p7 }
 0x164   : > { %v441_v63 = vadd.f32 %v440_v61, %v1161_v33  ;;  %v477_v0 = vadd.f32 %v476_v60, %v462_v59 }
 0x166   : > { %v478_v1 = vadd.f32 %v477_v0, %v463_v62  ;;  %v442_v2 = vadd.f32 %v441_v63, %v401_v40 }
 0x168   : > { %v443_v5 = vadd.f32 %v1156_v31, %v442_v2  ;;  %v479_v6 = vadd.f32 %v478_v1, %v464_v3 }
 0x16a   : > { %v444_v8 = vadd.f32 %v1173_v38, %v443_v5  ;;  %v480_v9 = vadd.f32 %v479_v6, %v465_v4 }
 0x16c   : > { %v445_v10 = vrot.slane %v444_v8, 4  ;;  %v481_v11 = vadd.f32 %v480_v9, %v466_v7 }
 0x16e   : > { %v446_v12 = vadd.f32 %v445_v10, %v444_v8  ;;  %v482_v13 = vrot.slane %v481_v11, 4 }
 0x170   : > { %v447_v14 = vrot.slane %v446_v12, 2  ;;  %v483_v15 = vadd.f32 %v482_v13, %v481_v11 }
 0x172   : > { %v448_v16 = vadd.f32 %v447_v14, %v446_v12  ;;  %v484_v17 = vrot.slane %v483_v15, 2 }
 0x174   : > { %v449_v18 = vrot.slane %v448_v16, 1  ;;  %v485_v19 = vadd.f32 %v484_v17, %v483_v15 }
 0x176   : > { %v486_v20 = vrot.slane %v485_v19, 1  ;;  %v450_v22 = vadd.f32 %v449_v18, %v448_v16 }
 0x178   : > { %v487_v23 = vadd.f32 %v486_v20, %v485_v19 }
 0x17a   : > { %v489_v24 = vsel %vm488_vm2, %v450_v22, %v487_v23 }
 0x17b   : > { %v490_v25 = vadd.f32 %v489_v24, %v429_v21 }
 0x17d   : > { %491 = vst [vmem:[#allocation8] sm:$0x3] %v490_v25 }
 0x17e   : > { %871 = shalt.err (!%p868_p5)
}
 0x17f   : > { %s872_s26 = scalar_lea.hbm %s1267_s3, 32  ;;  %p1284_p2 = pmov %p1283_p13 }
 0x180   : > { %p873_p11 = scmp.ne.s32.totalorder %s1267_s3, %s872_s26  ;;  %p878_p8 = scmp.lt.u32.totalorder %s872_s26, %s1267_s3 }
 0x182   : > { %p874_p4 = pnand %p873_p11, %p1284_p2 }
 0x184   : > { %p875_p6 = pneg %p874_p4 }
 0x186   : > { %p880_p9 = pnand %p878_p8, %p875_p6 }
 0x188   : > { %883 = shalt.err (!%p880_p9)
}
 0x189   : > { %p1285_p12 = pmov %p1284_p2  ;;  %p1286_p13 = pmov %p1284_p2 }
 0x18b   : > { %700 = dma.vmem_to_hbm [thread:$0]  (%p1285_p12), %s521_s6, 32, %s1267_s3, [#allocation9]  }
 0x18c   : > { %909 = dma.done.wait (%p1286_p13), [#allocation9], 32   ;;  %p1287_p3 = pmov %p1284_p2 }
 0x18e   : > { %911 = vsyncadd (%p1287_p3), [#allocation9], 4294967264 }
 0x18f PF: > { %p721_p7 = scmp.ge.s32.totalorder %s930_s15, 2  ;;  %s536_s22 = sand.u32 1, %s918_s12  }
 0x190   : > { %p1288_p10 = scmp.ne.s32.totalorder %s1272_s19, 0  ;;  %s537_s7 = scalar_lea.sflag [#allocation4], %s536_s22 }
 0x192   : > { %p713_p1 = pnand %p721_p7, %p1288_p10 }
 0x194   : > { %913 = dma.done.wait (!%p713_p1), %s537_s7, 2048  }
 0x195   : > { %915 = vsyncadd (!%p713_p1), %s537_s7, 4294965248  ;;  %p19_p0 = scmp.ge.s32.totalorder %s1015_s24, 6   ;;  %s1289_s12 = smov %s922_s13 }
 0x196   : > { %s1290_s13 = smov %s926_s14  ;;  %s1291_s14 = smov %s1044_s17 }
 0x197   : > { %s1292_s15 = smov %s1015_s24  ;;  %21 = sbr.rel (!%p19_p0) target bundleno = 7 (0x7), region = 89 }
 0x19e   :  { %542 = vsyncpa [#allocation3], 1 }
 0x19f   :  { %544 = vsyncpa [#allocation3 + $0x1], 1 }
 0x1a0   :  { %545 = vsyncpa [#allocation6], 1 }
 0x1a1   :  { %546 = vsyncpa [#allocation4], 1 }
 0x1a2   :  { %548 = vsyncpa [#allocation4 + $0x1], 1 }
 0x1a3   :  { %549 = vsyncpa [#allocation9], 1 }

// kernel: basic_block_forward.7
= control target key start
LH: loop header
LB: loop body
LE: loop exit
PB: predicated region body
PF: predicated region fallthrough
CT: control target
= control target key end

     0   :  { %s1893_s0 = inlined_call_operand.hbm [shape: f32[512,128], index: 0, kind: input, shape index: {}]   ;;  %s1894_s1 = inlined_call_operand.hbm [shape: bf16[512,4], index: 1, kind: input, shape index: {}]   ;;  %s1895_s2 = inlined_call_operand.hbm [shape: bf16[4,128], index: 2, kind: input, shape index: {}]   ;;  %s1896_s3 = inlined_call_operand.hbm [shape: f32[1,128], index: 3, kind: input, shape index: {}]   ;;  %s1897_s4 = inlined_call_operand.hbm [shape: f32[1,128], index: 4, kind: input, shape index: {}]   ;;  %s1898_s5 = inlined_call_operand.hbm [shape: f32[1,128], index: 5, kind: input, shape index: {}]   ;;  %s1899_s6 = inlined_call_operand.hbm [shape: f32[1,128], index: 6, kind: input, shape index: {}]   ;;  %s1900_s7 = inlined_call_operand.hbm [shape: f32[512,128], index: 7, kind: output, shape index: {}]  }
   0x1   :  { %1904 = sst [smem:[#allocation21_spill]] %s1893_s0 }
   0x2   :  { %1905 = sst [smem:[#allocation22_spill]] %s1895_s2 }
   0x3   :  { %1906 = sst [smem:[#allocation23_spill]] %s1896_s3 }
   0x4   :  { %1907 = sst [smem:[#allocation24_spill]] %s1897_s4 }
   0x5   :  { %1908 = sst [smem:[#allocation25_spill]] %s1898_s5 }
   0x6   :  { %12 = vsyncpa [#allocation3], 0 }
   0x7   :  { %14 = vsyncpa [#allocation3 + $0x1], 0 }
   0x8   :  { %15 = vsyncpa [#allocation6], 0 }
   0x9   :  { %17 = vsyncpa [#allocation6 + $0x1], 0 }
   0xa   :  { %18 = vsyncpa [#allocation9], 0 }
   0xb   :  { %19 = vsyncpa [#allocation12], 0 }
   0xc   :  { %20 = vsyncpa [#allocation4], 0 }
   0xd   :  { %22 = vsyncpa [#allocation4 + $0x1], 0  ;;  %s1435_s24 = smov 0   ;;  %s1437_s25 = smov 0  }
   0xe   :  { %s1439_s26 = smov 0   ;;  %s1441_s27 = smov 0  }
   0xf LB: > { %s1381_s28 = smov [#allocation7]   ;;  %s1456_s30 = sadd.s32 4294967295, %s1379_s27   ;;  %s1379_s27 = sphi %s1441_s27, %s1934_s27   ;;  %s1375_s26 = sphi %s1439_s26, %s1933_s26   ;;  %s1371_s25 = sphi %s1437_s25, %s1932_s25   ;;  %s1367_s24 = sphi %s1435_s24, %s1931_s24  }
  0x10   : > { %s229_s29 = sshll.u32 %s1381_s28, 4  ;;  %p900_p0 = scmp.ge.s32.totalorder %s1379_s27, 1  ;;  %s1461_s29 = int_to_ptr.vmem [resolvable:$true] %s229_s29 }
  0x11   : > { %p1901_p1 = scmp.eq.s32.totalorder %s1456_s30, 0  ;;  %p216_p2 = scmp.lt.s32.totalorder %s1379_s27, 5 }
  0x12   : > { %s1382_s9 = smov [#allocation8]   ;;  %s1383_s11 = smov [#allocation11]  }
  0x13   : > { %p1463_p3 = pnand %p900_p0, %p216_p2  ;;  %s240_s10 = sshll.u32 %s1382_s9, 4  ;;  %s1469_s10 = int_to_ptr.vmem [resolvable:$true] %s240_s10 }
  0x14   : > { %s262_s12 = sshll.u32 %s1383_s11, 4  ;;  %s1384_s14 = smov [#allocation10]   ;;  %s1477_s12 = int_to_ptr.vmem [resolvable:$true] %s262_s12 }
  0x15   : > { %s1909_s8 = scalar_select %p1463_p3, 1, 0 }
  0x16   : > { %p1007_p4 = pneg %p1463_p3  ;;  %s1479_s15 = sshll.u32 %s1384_s14, 4  ;;  %s252_s15 = int_to_ptr.vmem [resolvable:$true] %s1479_s15 }
  0x17   : > { %s1911_s2 = sld [smem:[#allocation22_spill]] }
  0x18   : > { %p1473_p5 = pnand %p1007_p4, %p1901_p1 }
  0x1a   : > { %p1489_p7 = pneg %p1473_p5 }
  0x1d   : > { %s1097_s18 = scalar_lea.hbm %s1911_s2, 32 }
  0x1e   : > { %p1098_p6 = scmp.ne.s32.totalorder %s1911_s2, %s1097_s18  ;;  %p1104_p10 = scmp.lt.u32.totalorder %s1097_s18, %s1911_s2 }
  0x20   : > { %p1100_p8 = pnand %p1489_p7, %p1098_p6 }
  0x22   : > { %p1101_p9 = pneg %p1100_p8 }
  0x24   : > { %p1106_p11 = pnand %p1104_p10, %p1101_p9 }
  0x26   : > { %1109 = shalt.err (!%p1106_p11)
}
  0x27   : > { %s1110_s28 = scalar_lea.vmem %s1461_s29, 32  ;;  %p1118_p2 = scmp.lt.s32.totalorder %s1461_s29, %s1461_s29 }
  0x28   : > { %p1111_p12 = scmp.ne.s32.totalorder %s1461_s29, %s1110_s28  ;;  %p1119_p4 = scmp.lt.s32.totalorder %s1110_s28, %s1110_s28 }
  0x2a   : > { %p1113_p13 = pnand %p1111_p12, %p1489_p7  ;;  %p1120_p6 = por %p1119_p4, %p1118_p2 }
  0x2c   : > { %p1114_p0 = pneg %p1113_p13 }
  0x2e   : > { %p1121_p8 = pnand %p1120_p6, %p1114_p0 }
  0x30   : > { %1124 = shalt.err (!%p1121_p8)
}
  0x31   : > { %1010 = dma.hbm_to_vmem [thread:$0]  (!%p1473_p5), %s1911_s2, 32, %s1461_s29, [#allocation6]  }
  0x32   : > { %s1913_s3 = sld [smem:[#allocation23_spill]] }
  0x38   : > { %s1125_s17 = scalar_lea.hbm %s1913_s3, 16 }
  0x39   : > { %p1126_p9 = scmp.ne.s32.totalorder %s1913_s3, %s1125_s17  ;;  %p1132_p12 = scmp.lt.u32.totalorder %s1125_s17, %s1913_s3 }
  0x3b   : > { %p1128_p10 = pnand %p1126_p9, %p1489_p7 }
  0x3d   : > { %p1129_p11 = pneg %p1128_p10 }
  0x3f   : > { %p1134_p13 = pnand %p1132_p12, %p1129_p11 }
  0x41   : > { %1137 = shalt.err (!%p1134_p13)
}
  0x42   : > { %s1138_s29 = scalar_lea.vmem %s1469_s10, 16  ;;  %s1145_s23 = scalar_lea.vmem %s1469_s10, 32 }
  0x43   : > { %p1139_p0 = scmp.ne.s32.totalorder %s1469_s10, %s1138_s29  ;;  %p1146_p6 = scmp.lt.s32.totalorder %s1469_s10, %s1469_s10 }
  0x44   : > { %p1147_p8 = scmp.lt.s32.totalorder %s1145_s23, %s1138_s29 }
  0x45   : > { %p1141_p2 = pnand %p1139_p0, %p1489_p7 }
  0x46   : > { %p1148_p9 = por %p1147_p8, %p1146_p6 }
  0x47   : > { %p1142_p4 = pneg %p1141_p2 }
  0x49   : > { %p1149_p10 = pnand %p1148_p9, %p1142_p4 }
  0x4b   : > { %1152 = shalt.err (!%p1149_p10)
}
  0x4c   : > { %1013 = dma.hbm_to_vmem [thread:$0]  (!%p1473_p5), %s1913_s3, 16, %s1469_s10, [#allocation9]  }
  0x4d   : > { %s1914_s5 = sld [smem:[#allocation25_spill]] }
  0x53   : > { %s1153_s16 = scalar_lea.hbm %s1914_s5, 16 }
  0x54   : > { %p1154_p11 = scmp.ne.s32.totalorder %s1914_s5, %s1153_s16  ;;  %p1160_p0 = scmp.lt.u32.totalorder %s1153_s16, %s1914_s5 }
  0x56   : > { %p1156_p12 = pnand %p1154_p11, %p1489_p7 }
  0x58   : > { %p1157_p13 = pneg %p1156_p12 }
  0x5a   : > { %p1162_p2 = pnand %p1160_p0, %p1157_p13 }
  0x5c   : > { %1165 = shalt.err (!%p1162_p2)
}
  0x5d   : > { %s1166_s10 = scalar_lea.vmem %s1477_s12, 16  ;;  %s1173_s22 = scalar_lea.vmem %s1477_s12, 32 }
  0x5e   : > { %p1167_p4 = scmp.ne.s32.totalorder %s1477_s12, %s1166_s10  ;;  %p1174_p9 = scmp.lt.s32.totalorder %s1477_s12, %s1477_s12 }
  0x5f   : > { %p1175_p10 = scmp.lt.s32.totalorder %s1173_s22, %s1166_s10 }
  0x60   : > { %p1169_p6 = pnand %p1167_p4, %p1489_p7 }
  0x61   : > { %p1176_p11 = por %p1175_p10, %p1174_p9 }
  0x62   : > { %p1170_p8 = pneg %p1169_p6 }
  0x64   : > { %p1177_p12 = pnand %p1176_p11, %p1170_p8 }
  0x66   : > { %1180 = shalt.err (!%p1177_p12)
}
  0x67   : > { %1019 = dma.hbm_to_vmem [thread:$0]  (!%p1473_p5), %s1914_s5, 16, %s1477_s12, [#allocation12]  }
  0x68   : > { %s1385_s28 = smov [#allocation13]   ;;  %s1915_s4 = sld [smem:[#allocation24_spill]] }
  0x69   : > { %s273_s9 = sshll.u32 %s1385_s28, 4  ;;  %s274_s9 = int_to_ptr.vmem [resolvable:$true] %s273_s9 }
  0x6e   : > { %s1181_s16 = scalar_lea.hbm %s1915_s4, 16 }
  0x6f   : > { %p1182_p13 = scmp.ne.s32.totalorder %s1915_s4, %s1181_s16  ;;  %p1188_p4 = scmp.lt.u32.totalorder %s1181_s16, %s1915_s4 }
  0x71   : > { %p1184_p0 = pnand %p1182_p13, %p1489_p7 }
  0x73   : > { %p1185_p2 = pneg %p1184_p0 }
  0x75   : > { %p1190_p6 = pnand %p1188_p4, %p1185_p2 }
  0x77   : > { %1193 = shalt.err (!%p1190_p6)
}
  0x78   : > { %s1194_s12 = scalar_lea.vmem %s252_s15, 16  ;;  %s1201_s10 = scalar_lea.vmem %s252_s15, 32 }
  0x79   : > { %p1195_p8 = scmp.ne.s32.totalorder %s252_s15, %s1194_s12  ;;  %p1202_p11 = scmp.lt.s32.totalorder %s252_s15, %s252_s15 }
  0x7a   : > { %p1203_p12 = scmp.lt.s32.totalorder %s1201_s10, %s1194_s12 }
  0x7b   : > { %p1197_p9 = pnand %p1195_p8, %p1489_p7 }
  0x7c   : > { %p1204_p1 = por %p1203_p12, %p1202_p11 }
  0x7d   : > { %p1198_p10 = pneg %p1197_p9 }
  0x7f   : > { %p1205_p3 = pnand %p1204_p1, %p1198_p10 }
  0x81   : > { %1208 = shalt.err (!%p1205_p3)
}
  0x82   : > { %1016 = dma.hbm_to_vmem [thread:$0]  (!%p1473_p5), %s1915_s4, 16, %s252_s15, [#allocation9]  }
  0x83   : > { %s1209_s11 = scalar_lea.hbm %s1899_s6, 16 }
  0x84   : > { %p1210_p13 = scmp.ne.s32.totalorder %s1899_s6, %s1209_s11  ;;  %p1216_p3 = scmp.lt.u32.totalorder %s1209_s11, %s1899_s6 }
  0x86   : > { %p1212_p0 = pnand %p1210_p13, %p1489_p7 }
  0x88   : > { %p1213_p1 = pneg %p1212_p0 }
  0x8a   : > { %p1218_p2 = pnand %p1216_p3, %p1213_p1 }
  0x8c   : > { %1221 = shalt.err (!%p1218_p2)
}
  0x8d   : > { %s1222_s19 = scalar_lea.vmem %s274_s9, 16  ;;  %s1229_s15 = scalar_lea.vmem %s274_s9, 32 }
  0x8e   : > { %p1223_p4 = scmp.ne.s32.totalorder %s274_s9, %s1222_s19  ;;  %p1230_p9 = scmp.lt.s32.totalorder %s274_s9, %s274_s9 }
  0x8f   : > { %p1231_p10 = scmp.lt.s32.totalorder %s1229_s15, %s1222_s19 }
  0x90   : > { %p1225_p6 = pnand %p1223_p4, %p1489_p7 }
  0x91   : > { %p1232_p11 = por %p1231_p10, %p1230_p9 }
  0x92   : > { %p1226_p8 = pneg %p1225_p6 }
  0x94   : > { %p1233_p12 = pnand %p1232_p11, %p1226_p8 }
  0x96   : > { %1236 = shalt.err (!%p1233_p12)
}
  0x97   : > { %1022 = dma.hbm_to_vmem [thread:$0]  (!%p1473_p5), %s1899_s6, 16, %s274_s9, [#allocation12]  }
  0x98   : > { %s899_s21 = sadd.s32 4294967294, %s1379_s27   ;;  %s1597_s13 = sadd.s32 1, %s1379_s27  }
  0x99   : > { %s35_s10 = sadd.s32 1, %s1375_s26  ;;  %s32_s22 = ssub.s32 %s1379_s27, %s1597_s13 }
  0x9a   : > { %p42_p7 = scmp.ne.s32.totalorder %s1375_s26, %s1371_s25  ;;  %p33_p13 = scmp.eq.s32.totalorder %s32_s22, 0 }
  0x9b   : > { %p43_p0 = scmp.eq.s32.totalorder %s1379_s27, 0  ;;  %p48_p1 = scmp.ne.s32.totalorder %s1371_s25, %s1367_s24 }
  0x9c   : > { %p203_p3 = scmp.eq.s32.totalorder %s1456_s30, 3  ;;  %p1916_p4 = scmp.eq.s32.totalorder %s1456_s30, 0 }
  0x9d   : > { %s1609_s29 = scalar_select %p33_p13, %s1375_s26, %s35_s10  }
  0x9e   : > { %p44_p2 = por %p43_p0, %p42_p7  ;;  %p1613_p6 = por %p1916_p4, %p48_p1 }
  0x9f   : > { %p1617_p5 = por %p203_p3, %p42_p7  ;;  %p209_p8 = scmp.eq.s32.totalorder %s899_s21, 3 }
  0xa0   : > { %p1039_p9 = scmp.lt.s32.totalorder %s1379_s27, 4  ;;  %s1623_s28 = sand.u32 1, %s1375_s26  }
  0xa1   : > { %s1918_s9 = scalar_select %p1617_p5, 1, 0 }
  0xa2   : > { %p1625_p10 = por %p209_p8, %p48_p1  ;;  %s907_s14 = sshll.u32 %s1623_s28, 7 }
  0xa3   : > { %s947_s16 = sshll.u32 %s1379_s27, 11  ;;  %s1920_s0 = sld [smem:[#allocation21_spill]] }
  0xa4   : > { %s1919_s11 = scalar_select %p1625_p10, 1, 0 }
  0xa5   : > { %s288_s15 = scalar_lea.vmem [#allocation2], %s907_s14  ;;  %p1636_p11 = pnand %p1039_p9, %p44_p2 }
  0xa6   : > { %s295_s20 = sshll.u32 %s288_s15, 4  ;;  %s285_s21 = scalar_lea.sflag [#allocation3], %s1623_s28  ;;  %s1640_s20 = int_to_ptr.vmem [resolvable:$true] %s295_s20 }
  0xa7   : > { %p1239_p7 = pneg %p1636_p11 }
  0xa9   : > { %s1634_s19 = scalar_lea.hbm %s1920_s0, %s947_s16  ;;  %s1242_s16 = scalar_lea.hbm %s1920_s0, 8192 }
  0xaa   : > { %s1237_s10 = scalar_lea.hbm %s1634_s19, 2048  ;;  %p1243_p1 = scmp.lt.u32.totalorder %s1634_s19, %s1920_s0 }
  0xab   : > { %p1238_p12 = scmp.ne.s32.totalorder %s1634_s19, %s1237_s10  ;;  %p1244_p3 = scmp.lt.u32.totalorder %s1242_s16, %s1237_s10 }
  0xac   : > { %p1246_p4 = scmp.lt.u32.totalorder %s1237_s10, %s1634_s19 }
  0xad   : > { %p1240_p13 = pnand %p1239_p7, %p1238_p12  ;;  %p1245_p2 = por %p1244_p3, %p1243_p1 }
  0xaf   : > { %p1241_p0 = pneg %p1240_p13  ;;  %p1247_p8 = por %p1246_p4, %p1245_p2 }
  0xb1   : > { %p1248_p9 = pnand %p1247_p8, %p1241_p0 }
  0xb3   : > { %1251 = shalt.err (!%p1248_p9)
}
  0xb4   : > { %s1252_s15 = scalar_lea.vmem %s1640_s20, 2048  ;;  %s1386_s22 = smov [#allocation2]  }
  0xb5   : > { %p1253_p12 = scmp.ne.s32.totalorder %s1640_s20, %s1252_s15  ;;  %s1257_s14 = sshll.u32 %s1386_s22, 4  ;;  %s1258_s14 = int_to_ptr.vmem [resolvable:$false] %s1257_s14 }
  0xb6   : > { %s1259_s17 = scalar_lea.vmem %s1258_s14, 4096  ;;  %p1260_p5 = scmp.lt.s32.totalorder %s1640_s20, %s1258_s14 }
  0xb7   : > { %p1255_p13 = pnand %p1253_p12, %p1239_p7  ;;  %p1261_p1 = scmp.lt.s32.totalorder %s1259_s17, %s1252_s15 }
  0xb9   : > { %p1256_p10 = pneg %p1255_p13  ;;  %p1262_p3 = por %p1261_p1, %p1260_p5 }
  0xbb   : > { %p1263_p2 = pnand %p1262_p3, %p1256_p10 }
  0xbd   : > { %1266 = shalt.err (!%p1263_p2)
}
  0xbe   : > { %s1387_s10 = smov 128   ;;  %s1388_s16 = smov 8  }
  0xbf   : > { %1026 = dma.hbm_to_vmem [thread:$0]  (!%p1636_p11), %s1634_s19, 2048, %s1640_s20, %s285_s21, %s1387_s10, %s1387_s10, %s1388_s16  }
  0xc0   : > { %s305_s18 = sand.u32 1, %s1379_s27   ;;  %s910_s22 = sshll.u32 %s1623_s28, 6 }
  0xc1   : > { %s948_s14 = sshll.u32 %s1379_s27, 10  ;;  %s309_s15 = scalar_lea.vmem [#allocation5], %s910_s22 }
  0xc2   : > { %s316_s17 = sshll.u32 %s309_s15, 4  ;;  %s1676_s3 = scalar_lea.hbm %s1894_s1, %s948_s14  ;;  %s1678_s17 = int_to_ptr.vmem [resolvable:$true] %s316_s17 }
  0xc3   : > { %s1680_s4 = scalar_lea.sflag [#allocation6], %s305_s18  ;;  %s1267_s5 = scalar_lea.hbm %s1676_s3, 1024 }
  0xc4   : > { %p1268_p5 = scmp.ne.s32.totalorder %s1676_s3, %s1267_s5  ;;  %s1272_s0 = scalar_lea.hbm %s1894_s1, 4096 }
  0xc5   : > { %p1273_p4 = scmp.lt.u32.totalorder %s1676_s3, %s1894_s1  ;;  %p1274_p8 = scmp.lt.u32.totalorder %s1272_s0, %s1267_s5 }
  0xc6   : > { %p1270_p10 = pnand %p1268_p5, %p1239_p7  ;;  %p1276_p12 = scmp.lt.u32.totalorder %s1267_s5, %s1676_s3 }
  0xc7   : > { %p1275_p9 = por %p1274_p8, %p1273_p4 }
  0xc8   : > { %p1271_p0 = pneg %p1270_p10 }
  0xc9   : > { %p1277_p13 = por %p1276_p12, %p1275_p9 }
  0xcb   : > { %p1278_p1 = pnand %p1277_p13, %p1271_p0 }
  0xcd   : > { %1281 = shalt.err (!%p1278_p1)
}
  0xce   : > { %s1282_s21 = scalar_lea.vmem %s1678_s17, 1024  ;;  %s1389_s10 = smov [#allocation5]  }
  0xcf   : > { %p1283_p3 = scmp.ne.s32.totalorder %s1678_s17, %s1282_s21  ;;  %s1287_s16 = sshll.u32 %s1389_s10, 4  ;;  %s1288_s16 = int_to_ptr.vmem [resolvable:$false] %s1287_s16 }
  0xd0   : > { %s1289_s18 = scalar_lea.vmem %s1288_s16, 2048  ;;  %p1290_p10 = scmp.lt.s32.totalorder %s1678_s17, %s1288_s16 }
  0xd1   : > { %p1285_p2 = pnand %p1283_p3, %p1239_p7  ;;  %p1291_p4 = scmp.lt.s32.totalorder %s1289_s18, %s1282_s21 }
  0xd3   : > { %p1286_p5 = pneg %p1285_p2  ;;  %p1292_p8 = por %p1291_p4, %p1290_p10 }
  0xd5   : > { %p1293_p9 = pnand %p1292_p8, %p1286_p5 }
  0xd7   : > { %1296 = shalt.err (!%p1293_p9)
}
  0xd8   : > { %s1390_s5 = smov 64   ;;  %s1391_s22 = smov 4  }
  0xd9   : > { %1029 = dma.hbm_to_vmem [thread:$0]  (!%p1636_p11), %s1676_s3, 1024, %s1678_s17, %s1680_s4, %s1390_s5, %s1390_s5, %s1391_s22  }
  0xda   : > { %p1922_p7 = scmp.ne.s32.totalorder %s1909_s8, 0 }
  0xdb   : > { %s1709_s14 = sand.u32 (!%p1922_p7), 1, %s1371_s25  }
  0xdc   : > { %328 = sbr.rel (%p1922_p7) target bundleno = 493 (0x1ed), region = 48  ;;  %s914_s15 = sshll.u32 (!%p1922_p7), %s1709_s14, 7 }
  0xdd   : > { %s331_s28 = scalar_lea.sflag (!%p1922_p7), [#allocation3], %s1709_s14  ;;  %s1715_s19 = scalar_lea.vmem (!%p1922_p7), [#allocation2], %s914_s15 }
  0xe3   : > { %1342 = dma.done.wait (%p1613_p6), %s331_s28, 2048  }
  0xe4   : > { %1344 = vsyncadd (%p1613_p6), %s331_s28, 4294965248  ;;  %s339_s3 = sand.u32 1, %s1456_s30   ;;  %s915_s4 = sshll.u32 %s1709_s14, 6 }
  0xe5   : > { %s340_s8 = scalar_lea.sflag [#allocation6], %s339_s3  ;;  %s343_s12 = scalar_lea.vmem [#allocation5], %s915_s4 }
  0xe6   : > { %1346 = dma.done.wait (%p1613_p6), %s340_s8, 1024  }
  0xe7   : > { %1348 = vsyncadd (%p1613_p6), %s340_s8, 4294966272  ;;  %p1923_p11 = scmp.eq.s32.totalorder %s1456_s30, 0 }
  0xe9   : > { %1350 = dma.done.wait (%p1923_p11), [#allocation6], 32   ;;  %p1924_p0 = pmov %p1923_p11 }
  0xeb   : > { %1352 = vsyncadd (%p1924_p0), [#allocation6], 4294967264  ;;  %p1925_p12 = pmov %p1924_p0 }
  0xec   : > { %p1926_p13 = pmov %p1924_p0 }
  0xed   : > { %1354 = dma.done.wait (%p1925_p12), [#allocation9], 32  }
  0xee   : > { %1356 = vsyncadd (%p1926_p13), [#allocation9], 4294967264  ;;  %p1927_p1 = pmov %p1924_p0 }
  0xef   : > { %p1928_p3 = pmov %p1924_p0 }
  0xf0   : > { %1358 = dma.done.wait (%p1927_p1), [#allocation12], 32  }
  0xf1   : > { %1360 = vsyncadd (%p1928_p3), [#allocation12], 4294967264  ;;  %vm485_vm0 = vcmask 1041408   ;;  %vm460_vm1 = vcmask 31744   ;;  %v419_v0 = vld [vmem:[#allocation7] sm:$0x3] }
  0xf2   : > { %979 = vmatprep.subr.msk.bf16.mxu0 %vm485_vm0, %v419_v0  ;;  %980 = vmatprep.subr.msk.bf16.mxu1 %vm485_vm0, %v419_v0  ;;  %v487_v1 = vsel %vm485_vm0, %v419_v0, 0  ;;  %v1089_v2 = vld [vmem:[%s343_s12] sm:$0xff]   ;;  %v1091_v4 = vld [vmem:[%s343_s12 + $0x8] sm:$0xff]   ;;  %v1093_v6 = vld [vmem:[%s343_s12 + $0x10] sm:$0xff]   ;;  %s1801_s23 = scalar_lea.vmem [#allocation14], %s914_s15  ;;  %s949_s17 = sshll.u32 %s1456_s30, 11 }
  0xf3   : > { %960 = vmatpush3.bf16.msra.mxu0 %v487_v1  ;;  %978 = vmatpush3.bf16.msra.mxu1 %v487_v1  ;;  %v1090_v3 = vld [vmem:[%s343_s12 + $0x20] sm:$0xff]   ;;  %v1092_v5 = vld [vmem:[%s343_s12 + $0x28] sm:$0xff]   ;;  %v1094_v7 = vld [vmem:[%s343_s12 + $0x30] sm:$0xff]   ;;  %s756_s0 = sshll.u32 %s1801_s23, 4  ;;  %s1843_s20 = scalar_lea.hbm %s1900_s7, %s949_s17  ;;  %s1845_s0 = int_to_ptr.vmem [resolvable:$true] %s756_s0 }
  0xf4   : > { %961 = vmatprep.mubr.msk.bf16.mxu0 %vm460_vm1, %v1089_v2  ;;  %969 = vmatprep.mubr.msk.bf16.mxu1 %vm460_vm1, %v1090_v3  ;;  %v1095_v8 = vld [vmem:[%s343_s12 + $0x18] sm:$0xff]   ;;  %v588_v10 = vld [vmem:[%s1715_s19 + $0x10] sm:$0xff]  ;;  %v938_v11 = vld [vmem:[#allocation8] ss:$0 sm:$0xff]  ;;  %s743_s21 = scalar_lea.sflag [#allocation4], %s1709_s14  ;;  %s1297_s10 = scalar_lea.vmem %s1845_s0, 2048 }
  0xf5   : > { %v1096_v9 = vld [vmem:[%s343_s12 + $0x38] sm:$0xff]   ;;  %v596_v12 = vld [vmem:[%s1715_s19 + $0x50] sm:$0xff]  ;;  %v586_v13 = vld [vmem:[%s1715_s19] sm:$0xff]  ;;  %v611_v19 = vmul.f32 %v938_v11, %v588_v10  ;;  %p1298_p6 = scmp.ne.s32.totalorder %s1845_s0, %s1297_s10  ;;  %p1929_p2 = scmp.ne.s32.totalorder %s1918_s9, 0 }
  0xf6   : > { %962 = vmatmul.mubr.msk.bf16.vlgmr.msra.gmra.mrb[0].mxu0 %vm460_vm1, %v1091_v4  ;;  %970 = vmatmul.mubr.msk.bf16.vlgmr.msra.gmra.mrb[0].mxu1 %vm460_vm1, %v1092_v5  ;;  %v594_v14 = vld [vmem:[%s1715_s19 + $0x40] sm:$0xff]  ;;  %v589_v16 = vld [vmem:[%s1715_s19 + $0x18] sm:$0xff]  ;;  %v587_v18 = vld [vmem:[%s1715_s19 + $0x8] sm:$0xff]  ;;  %v619_v23 = vmul.f32 %v938_v11, %v596_v12  ;;  %v609_v24 = vmul.f32 %v938_v11, %v586_v13  ;;  %s1392_s16 = smov [#allocation14]  }
  0xf7   : > { %965 = vmatprep.mubr.msk.bf16.mxu0 %vm460_vm1, %v1093_v6  ;;  %973 = vmatprep.mubr.msk.bf16.mxu1 %vm460_vm1, %v1094_v7  ;;  %v939_v15 = vld [vmem:[#allocation10] ss:$0 sm:$0xff]  ;;  %v597_v17 = vld [vmem:[%s1715_s19 + $0x58] sm:$0xff]  ;;  %v595_v20 = vld [vmem:[%s1715_s19 + $0x48] sm:$0xff]  ;;  %v617_v28 = vmul.f32 %v938_v11, %v594_v14  ;;  %v612_v29 = vmul.f32 %v938_v11, %v589_v16  ;;  %v610_v33 = vmul.f32 %v938_v11, %v587_v18  ;;  %p1299_p5 = pnand %p1298_p6, %p1929_p2  ;;  %s1301_s18 = sshll.u32 %s1392_s16, 4  ;;  %s1302_s18 = int_to_ptr.vmem [resolvable:$false] %s1301_s18 }
  0xf8   : > { %v592_v21 = vld [vmem:[%s1715_s19 + $0x30] sm:$0xff]  ;;  %v590_v25 = vld [vmem:[%s1715_s19 + $0x20] sm:$0xff]  ;;  %v593_v27 = vld [vmem:[%s1715_s19 + $0x38] sm:$0xff]  ;;  %v620_v30 = vmul.f32 %v938_v11, %v597_v17  ;;  %v618_v34 = vmul.f32 %v938_v11, %v595_v20  ;;  %v634_v38 = vadd.f32 %v939_v15, %v611_v19  ;;  %v642_v43 = vadd.f32 %v939_v15, %v619_v23  ;;  %s1303_s5 = scalar_lea.vmem %s1302_s18, 4096  ;;  %p1304_p4 = scmp.lt.s32.totalorder %s1845_s0, %s1302_s18 }
  0xf9   : > { %v600_v22 = vld [vmem:[%s1715_s19 + $0x70] sm:$0xff]  ;;  %v598_v26 = vld [vmem:[%s1715_s19 + $0x60] sm:$0xff]  ;;  %v601_v31 = vld [vmem:[%s1715_s19 + $0x78] sm:$0xff]  ;;  %v615_v35 = vmul.f32 %v938_v11, %v592_v21  ;;  %v613_v39 = vmul.f32 %v938_v11, %v590_v25  ;;  %v616_v41 = vmul.f32 %v938_v11, %v593_v27  ;;  %v632_v44 = vadd.f32 %v939_v15, %v609_v24  ;;  %p1300_p10 = pneg %p1299_p5  ;;  %p1305_p8 = scmp.lt.s32.totalorder %s1303_s5, %s1297_s10 }
  0xfa   : > { %v591_v32 = vld [vmem:[%s1715_s19 + $0x28] sm:$0xff]  ;;  %v623_v36 = vmul.f32 %v938_v11, %v600_v22  ;;  %v621_v40 = vmul.f32 %v938_v11, %v598_v26  ;;  %v1763_v42 = vld [vmem:[#allocation11] ss:$0 sm:$0xff]  ;;  %v624_v45 = vmul.f32 %v938_v11, %v601_v31  ;;  %v640_v47 = vadd.f32 %v939_v15, %v617_v28 }
  0xfb   : > { %v599_v37 = vld [vmem:[%s1715_s19 + $0x68] sm:$0xff]  ;;  %v614_v46 = vmul.f32 %v938_v11, %v591_v32  ;;  %v635_v48 = vadd.f32 %v939_v15, %v612_v29  ;;  %v643_v49 = vadd.f32 %v939_v15, %v620_v30  ;;  %v633_v53 = vadd.f32 %v939_v15, %v610_v33  ;;  %p1306_p9 = por %p1305_p8, %p1304_p4 }
  0xfc   : > { %v622_v50 = vmul.f32 %v938_v11, %v599_v37  ;;  %v1765_v52 = vld [vmem:[#allocation13] ss:$0 sm:$0xff]  ;;  %v641_v54 = vadd.f32 %v939_v15, %v618_v34  ;;  %v1767_v55 = vadd.f32 %v939_v15, %v615_v35  ;;  %v1769_v56 = vadd.f32 %v939_v15, %v623_v36 }
  0xfd   : > { %v1772_v60 = vadd.f32 %v939_v15, %v613_v39  ;;  %v1774_v61 = vadd.f32 %v939_v15, %v621_v40  ;;  %v1776_v62 = vadd.f32 %v939_v15, %v616_v41  ;;  %v1780_v3 = vadd.f32 %v939_v15, %v624_v45  ;;  %p1307_p7 = pnand %p1306_p9, %p1300_p10 }
  0xfe   : > { %966 = vmatmul.mubr.msk.bf16.gmra.mrb[4].mxu0 %vm460_vm1, %v1095_v8  ;;  %974 = vmatmul.mubr.msk.bf16.gmra.mrb[4].mxu1 %vm460_vm1, %v1096_v9  ;;  %v1782_v4 = vadd.f32 %v939_v15, %v614_v46  ;;  %v1787_v10 = vadd.f32 %v939_v15, %v622_v50 }
 0x1c9   : > { %v963_v51 = vpop.f32.mrb[0].mxu0  ;;  %v971_v58 = vpop.f32.mrb[0].mxu1 }
 0x1ca   : > { %v657_v57 = vmul.f32 %v963_v51, %v1763_v42  ;;  %v523_v59 = vpop.f32.mrb[1].mxu0  ;;  %v665_v63 = vmul.f32 %v971_v58, %v1763_v42  ;;  %v555_v1 = vpop.f32.mrb[1].mxu1 }
 0x1cb   : > { %v655_v0 = vmul.f32 %v1763_v42, %v523_v59  ;;  %v964_v2 = vpop.f32.mrb[2].mxu0  ;;  %v663_v6 = vmul.f32 %v1763_v42, %v555_v1  ;;  %v972_v8 = vpop.f32.mrb[2].mxu1 }
 0x1cc   : > { %v680_v5 = vadd.f32 %v1765_v52, %v657_v57  ;;  %v658_v7 = vmul.f32 %v964_v2, %v1763_v42  ;;  %v526_v9 = vpop.f32.mrb[3].mxu0  ;;  %v688_v11 = vadd.f32 %v1765_v52, %v665_v63  ;;  %v666_v13 = vmul.f32 %v972_v8, %v1763_v42  ;;  %v558_v16 = vpop.f32.mrb[3].mxu1 }
 0x1cd   : > { %v678_v12 = vadd.f32 %v1765_v52, %v655_v0  ;;  %v656_v14 = vmul.f32 %v1763_v42, %v526_v9  ;;  %v686_v18 = vadd.f32 %v1765_v52, %v663_v6  ;;  %v664_v20 = vmul.f32 %v1763_v42, %v558_v16 }
 0x1ce   : > { %v696_v17 = vadd.f32 %v680_v5, %v634_v38  ;;  %v681_v19 = vadd.f32 %v1765_v52, %v658_v7  ;;  %v704_v21 = vadd.f32 %v688_v11, %v642_v43  ;;  %v689_v22 = vadd.f32 %v1765_v52, %v666_v13 }
 0x1cf   : > { %v694_v15 = vadd.f32 %v678_v12, %v632_v44  ;;  %v679_v23 = vadd.f32 %v1765_v52, %v656_v14  ;;  %v702_v25 = vadd.f32 %v686_v18, %v640_v47  ;;  %v687_v27 = vadd.f32 %v1765_v52, %v664_v20 }
 0x1d0   : > { %v712_v24 = vmax.f32 %v696_v17, 0.0  ;;  %v697_v26 = vadd.f32 %v681_v19, %v635_v48  ;;  %v720_v28 = vmax.f32 %v704_v21, 0.0  ;;  %v705_v30 = vadd.f32 %v689_v22, %v643_v49 }
 0x1d1   : > { %v710_v29 = vmax.f32 %v694_v15, 0.0  ;;  %v695_v31 = vadd.f32 %v679_v23, %v633_v53  ;;  %v967_v32 = vpop.f32.mrb[4].mxu0  ;;  %v718_v33 = vmax.f32 %v702_v25, 0.0  ;;  %v703_v35 = vadd.f32 %v687_v27, %v641_v54  ;;  %v975_v37 = vpop.f32.mrb[4].mxu1 }
 0x1d2   : > { %728 = vst [vmem:[%s1801_s23 + $0x10] sm:$0xff] %v712_v24  ;;  %v713_v34 = vmax.f32 %v697_v26, 0.0  ;;  %v661_v36 = vmul.f32 %v967_v32, %v1763_v42  ;;  %v539_v38 = vpop.f32.mrb[5].mxu0  ;;  %736 = vst [vmem:[%s1801_s23 + $0x50] sm:$0xff] %v720_v28  ;;  %v721_v39 = vmax.f32 %v705_v30, 0.0  ;;  %v669_v41 = vmul.f32 %v975_v37, %v1763_v42  ;;  %v571_v44 = vpop.f32.mrb[5].mxu1 }
 0x1d3   : > { %726 = vst [vmem:[%s1801_s23] sm:$0xff] %v710_v29  ;;  %v711_v40 = vmax.f32 %v695_v31, 0.0  ;;  %v659_v43 = vmul.f32 %v1763_v42, %v539_v38  ;;  %v968_v45 = vpop.f32.mrb[6].mxu0  ;;  %734 = vst [vmem:[%s1801_s23 + $0x40] sm:$0xff] %v718_v33  ;;  %v719_v46 = vmax.f32 %v703_v35, 0.0  ;;  %v667_v48 = vmul.f32 %v1763_v42, %v571_v44  ;;  %v976_v50 = vpop.f32.mrb[6].mxu1 }
 0x1d4   : > { %729 = vst [vmem:[%s1801_s23 + $0x18] sm:$0xff] %v713_v34  ;;  %v684_v47 = vadd.f32 %v1765_v52, %v661_v36  ;;  %v662_v49 = vmul.f32 %v968_v45, %v1763_v42  ;;  %v542_v51 = vpop.f32.mrb[7].mxu0  ;;  %737 = vst [vmem:[%s1801_s23 + $0x58] sm:$0xff] %v721_v39  ;;  %v692_v53 = vadd.f32 %v1765_v52, %v669_v41  ;;  %v574_v59 = vpop.f32.mrb[7].mxu1 }
 0x1d5   : > { %727 = vst [vmem:[%s1801_s23 + $0x8] sm:$0xff] %v711_v40  ;;  %v682_v54 = vadd.f32 %v1765_v52, %v659_v43  ;;  %v670_v57 = vmul.f32 %v976_v50, %v1763_v42  ;;  %v660_v58 = vmul.f32 %v1763_v42, %v542_v51  ;;  %735 = vst [vmem:[%s1801_s23 + $0x48] sm:$0xff] %v719_v46 }
 0x1d6   : > { %v700_v63 = vadd.f32 %v684_v47, %v1767_v55  ;;  %v690_v0 = vadd.f32 %v1765_v52, %v667_v48  ;;  %v685_v1 = vadd.f32 %v1765_v52, %v662_v49  ;;  %v668_v2 = vmul.f32 %v1763_v42, %v574_v59 }
 0x1d7   : > { %v708_v5 = vadd.f32 %v692_v53, %v1769_v56  ;;  %v698_v6 = vadd.f32 %v682_v54, %v1772_v60  ;;  %v693_v7 = vadd.f32 %v1765_v52, %v670_v57  ;;  %v683_v8 = vadd.f32 %v1765_v52, %v660_v58 }
 0x1d8   : > { %v716_v9 = vmax.f32 %v700_v63, 0.0  ;;  %v706_v55 = vadd.f32 %v690_v0, %v1774_v61  ;;  %v701_v11 = vadd.f32 %v685_v1, %v1776_v62  ;;  %v691_v12 = vadd.f32 %v1765_v52, %v668_v2 }
 0x1d9   : > { %v724_v42 = vmax.f32 %v708_v5, 0.0  ;;  %v714_v56 = vmax.f32 %v698_v6, 0.0  ;;  %v709_v60 = vadd.f32 %v693_v7, %v1780_v3  ;;  %v699_v13 = vadd.f32 %v683_v8, %v1782_v4 }
 0x1da   : > { %732 = vst [vmem:[%s1801_s23 + $0x30] sm:$0xff] %v716_v9  ;;  %v722_v61 = vmax.f32 %v706_v55, 0.0  ;;  %v717_v14 = vmax.f32 %v701_v11, 0.0  ;;  %v707_v62 = vadd.f32 %v691_v12, %v1787_v10 }
 0x1db   : > { %740 = vst [vmem:[%s1801_s23 + $0x70] sm:$0xff] %v724_v42  ;;  %730 = vst [vmem:[%s1801_s23 + $0x20] sm:$0xff] %v714_v56  ;;  %v725_v52 = vmax.f32 %v709_v60, 0.0  ;;  %v715_v16 = vmax.f32 %v699_v13, 0.0 }
 0x1dc   : > { %738 = vst [vmem:[%s1801_s23 + $0x60] sm:$0xff] %v722_v61  ;;  %733 = vst [vmem:[%s1801_s23 + $0x38] sm:$0xff] %v717_v14  ;;  %v723_v3 = vmax.f32 %v707_v62, 0.0 }
 0x1dd   : > { %741 = vst [vmem:[%s1801_s23 + $0x78] sm:$0xff] %v725_v52  ;;  %731 = vst [vmem:[%s1801_s23 + $0x28] sm:$0xff] %v715_v16 }
 0x1de   : > { %739 = vst [vmem:[%s1801_s23 + $0x68] sm:$0xff] %v723_v3 }
 0x1df   : > { %1310 = shalt.err (!%p1307_p7)
}
 0x1e0   : > { %s1311_s22 = scalar_lea.hbm %s1843_s20, 2048  ;;  %s1315_s19 = scalar_lea.hbm %s1900_s7, 8192 }
 0x1e1   : > { %p1312_p11 = scmp.ne.s32.totalorder %s1843_s20, %s1311_s22  ;;  %p1316_p13 = scmp.lt.u32.totalorder %s1843_s20, %s1900_s7 }
 0x1e2   : > { %p1317_p1 = scmp.lt.u32.totalorder %s1315_s19, %s1311_s22  ;;  %p1319_p6 = scmp.lt.u32.totalorder %s1311_s22, %s1843_s20 }
 0x1e3   : > { %p1313_p0 = pnand %p1312_p11, %p1929_p2 }
 0x1e4   : > { %p1318_p3 = por %p1317_p1, %p1316_p13 }
 0x1e5   : > { %p1314_p12 = pneg %p1313_p0 }
 0x1e6   : > { %p1320_p5 = por %p1319_p6, %p1318_p3 }
 0x1e8   : > { %p1321_p10 = pnand %p1320_p5, %p1314_p12 }
 0x1ea   : > { %1324 = shalt.err (!%p1321_p10)
}
 0x1eb   : > { %s1393_s8 = smov 128   ;;  %s1394_s12 = smov 8  }
 0x1ec   : > { %1005 = dma.vmem_to_hbm [thread:$0]  (%p1929_p2), %s1845_s0, 2048, %s1843_s20, %s743_s21, %s1393_s8, %s1393_s8, %s1394_s12  }
 0x1ed PF: > { %p1045_p4 = scmp.ge.s32.totalorder %s1379_s27, 2  ;;  %s771_s23 = sand.u32 1, %s1367_s24  }
 0x1ee   : > { %p1930_p8 = scmp.ne.s32.totalorder %s1919_s11, 0  ;;  %s772_s17 = scalar_lea.sflag [#allocation4], %s771_s23 }
 0x1f0   : > { %p1031_p9 = pnand %p1045_p4, %p1930_p8 }
 0x1f2   : > { %1362 = dma.done.wait (!%p1031_p9), %s772_s17, 2048  }
 0x1f3   : > { %1364 = vsyncadd (!%p1031_p9), %s772_s17, 4294965248  ;;  %p25_p7 = scmp.ge.s32.totalorder %s1597_s13, 6   ;;  %s1931_s24 = smov %s1371_s25 }
 0x1f4   : > { %s1932_s25 = smov %s1375_s26  ;;  %s1933_s26 = smov %s1609_s29 }
 0x1f5   : > { %s1934_s27 = smov %s1597_s13  ;;  %27 = sbr.rel (!%p25_p7) target bundleno = 15 (0xf), region = 126 }
 0x1fc   :  { %777 = vsyncpa [#allocation3], 1 }
 0x1fd   :  { %779 = vsyncpa [#allocation3 + $0x1], 1 }
 0x1fe   :  { %780 = vsyncpa [#allocation6], 1 }
 0x1ff   :  { %782 = vsyncpa [#allocation6 + $0x1], 1 }
 0x200   :  { %783 = vsyncpa [#allocation9], 1 }
 0x201   :  { %784 = vsyncpa [#allocation12], 1 }
 0x202   :  { %785 = vsyncpa [#allocation4], 1 }
 0x203   :  { %787 = vsyncpa [#allocation4 + $0x1], 1 }

// kernel: basic_block_forward.6
= control target key start
LH: loop header
LB: loop body
LE: loop exit
PB: predicated region body
PF: predicated region fallthrough
CT: control target
= control target key end

     0   :  { %s3977_s0 = inlined_call_operand.hbm [shape: bf16[512,1152], index: 0, kind: input, shape index: {}]   ;;  %s3978_s1 = inlined_call_operand.hbm [shape: bf16[1152,128], index: 1, kind: input, shape index: {}]   ;;  %s3979_s2 = inlined_call_operand.hbm [shape: bf16[512,4], index: 2, kind: input, shape index: {}]   ;;  %s3980_s3 = inlined_call_operand.hbm [shape: bf16[4,128], index: 3, kind: input, shape index: {}]   ;;  %s3981_s4 = inlined_call_operand.hbm [shape: f32[512,128], index: 4, kind: output, shape index: {0}]   ;;  %s3982_s5 = inlined_call_operand.hbm [shape: f32[2,128], index: 5, kind: output, shape index: {1}]   ;;  %s3983_s6 = inlined_call_operand.hbm [shape: f32[2,128], index: 6, kind: output, shape index: {2}]  }
   0x1   :  { %3998 = sst [smem:[#allocation23_spill]] %s3977_s0 }
   0x2   :  { %3999 = sst [smem:[#allocation24_spill]] %s3978_s1 }
   0x3   :  { %12 = vsyncpa [#allocation3], 0 }
   0x4   :  { %14 = vsyncpa [#allocation3 + $0x1], 0 }
   0x5   :  { %15 = vsyncpa [#allocation6], 0 }
   0x6   :  { %16 = vsyncpa [#allocation4], 0 }
   0x7   :  { %18 = vsyncpa [#allocation4 + $0x1], 0 }
   0x8   :  { %19 = vsyncpa [#allocation11], 0  ;;  %s3444_s21 = smov 0   ;;  %s3446_s22 = smov 0  }
   0x9   :  { %s3448_s23 = smov 0   ;;  %s3450_s24 = smov 0  }
   0xa LB: > { %4000 = sst [smem:[#allocation19_spill]] %s3389_s23  ;;  %s3465_s25 = sadd.s32 4294967295, %s3393_s24   ;;  %s3393_s24 = sphi %s3450_s24, %s4038_s24   ;;  %s3389_s23 = sphi %s3448_s23, %s4040_s23   ;;  %s3385_s22 = sphi %s3446_s22, %s4042_s22   ;;  %s3381_s21 = sphi %s3444_s21, %s4041_s21  }
   0xb   : > { %s2343_s26 = sadd.s32 4294967294, %s3393_s24   ;;  %p45_p0 = scmp.ne.s32.totalorder %s3385_s22, %s3381_s21 }
   0xc   : > { %p3984_p1 = scmp.eq.s32.totalorder %s3465_s25, 0  ;;  %p143_p3 = scmp.eq.s32.totalorder %s2343_s26, 3 }
   0xd   : > { %p2344_p5 = scmp.ge.s32.totalorder %s3393_s24, 1  ;;  %p192_p7 = scmp.lt.s32.totalorder %s3393_s24, 5 }
   0xe   : > { %p3474_p4 = por %p3984_p1, %p45_p0  ;;  %p3479_p6 = por %p143_p3, %p45_p0 }
   0xf   : > { %p3485_p9 = pnand %p2344_p5, %p192_p7  ;;  %s3395_s30 = smov [#allocation5]  }
  0x10   : > { %s4001_s27 = scalar_select %p3474_p4, 1, 0 }
  0x11   : > { %s4002_s28 = scalar_select %p3479_p6, 1, 0 }
  0x12   : > { %s4004_s29 = scalar_select %p3485_p9, 1, 0 }
  0x13   : > { %4003 = sst [smem:[#allocation20_spill]] %s4002_s28  ;;  %s204_s7 = sshll.u32 %s3395_s30, 4  ;;  %s205_s7 = int_to_ptr.vmem [resolvable:$true] %s204_s7 }
  0x14   : > { %p2888_p10 = pneg %p3485_p9  ;;  %s3498_s9 = sadd.s32 1, %s3393_s24  }
  0x15   : > { %4006 = sst [smem:[#allocation21_spill]] %s3498_s9  ;;  %s32_s10 = sadd.s32 1, %s3389_s23 }
  0x16   : > { %p3493_p11 = pnand %p2888_p10, %p3984_p1  ;;  %s29_s11 = ssub.s32 %s3393_s24, %s3498_s9 }
  0x17   : > { %s4007_s1 = sld [smem:[#allocation24_spill]] }
  0x18   : > { %p3989_p13 = pneg %p3493_p11 }
  0x1d   : > { %s3143_s14 = scalar_lea.hbm %s4007_s1, 9216 }
  0x1e   : > { %p3144_p12 = scmp.ne.s32.totalorder %s4007_s1, %s3143_s14  ;;  %p3150_p5 = scmp.lt.u32.totalorder %s3143_s14, %s4007_s1 }
  0x20   : > { %p3146_p0 = pnand %p3989_p13, %p3144_p12 }
  0x22   : > { %p3147_p3 = pneg %p3146_p0 }
  0x24   : > { %p3152_p7 = pnand %p3150_p5, %p3147_p3 }
  0x26   : > { %3155 = shalt.err (!%p3152_p7)
}
  0x27   : > { %s3156_s19 = scalar_lea.vmem %s205_s7, 9216  ;;  %p3164_p2 = scmp.lt.s32.totalorder %s205_s7, %s205_s7 }
  0x28   : > { %p3157_p10 = scmp.ne.s32.totalorder %s205_s7, %s3156_s19  ;;  %p3165_p6 = scmp.lt.s32.totalorder %s3156_s19, %s3156_s19 }
  0x2a   : > { %p3159_p8 = pnand %p3157_p10, %p3989_p13  ;;  %p3166_p4 = por %p3165_p6, %p3164_p2 }
  0x2c   : > { %p3160_p1 = pneg %p3159_p8 }
  0x2e   : > { %p3167_p9 = pnand %p3166_p4, %p3160_p1 }
  0x30   : > { %3170 = shalt.err (!%p3167_p9)
}
  0x31   : > { %s3987_s20 = smov 64   ;;  %s3988_s26 = smov 4  }
  0x32   : > { %2891 = dma.hbm_to_vmem [thread:$0]  (!%p3493_p11), %s4007_s1, 9216, %s205_s7, [#allocation6], %s3987_s20, %s3987_s20, %s3988_s26  }
  0x33   : > { %p30_p1 = scmp.eq.s32.totalorder %s29_s11, 0  ;;  %p39_p2 = scmp.ne.s32.totalorder %s3389_s23, %s3385_s22 }
  0x34   : > { %p40_p4 = scmp.eq.s32.totalorder %s3393_s24, 0  ;;  %p2908_p6 = scmp.lt.s32.totalorder %s3393_s24, 4 }
  0x35   : > { %s3533_s13 = scalar_select %p30_p1, %s3389_s23, %s32_s10  }
  0x36   : > { %p41_p8 = por %p40_p4, %p39_p2  ;;  %p4009_p9 = scmp.eq.s32.totalorder %s3465_s25, 3 }
  0x37   : > { %4008 = sst [smem:[#allocation22_spill]] %s3533_s13  ;;  %s229_s15 = sand.u32 1, %s3393_s24  }
  0x38   : > { %p3537_p12 = por %p4009_p9, %p39_p2  ;;  %s231_s16 = sand.u32 1, %s3389_s23  }
  0x39   : > { %s2863_s17 = smul.u32 576, %s231_s16  ;;  %p3544_p0 = pnand %p2908_p6, %p41_p8 }
  0x3a   : > { %s4010_s14 = scalar_select %p3537_p12, 1, 0 }
  0x3b   : > { %s2864_s18 = smul.u32 9216, %s3393_s24  ;;  %s4012_s0 = sld [smem:[#allocation23_spill]] }
  0x3c   : > { %s4011_s19 = scalar_select %p3544_p0, 1, 0 }
  0x3d   : > { %s233_s30 = scalar_lea.vmem [#allocation2], %s2863_s17  ;;  %s3555_s20 = sshll.u32 %s231_s16, 6 }
  0x3e   : > { %s241_s12 = sshll.u32 %s233_s30, 4  ;;  %s3557_s26 = scalar_lea.sflag [#allocation3], %s229_s15  ;;  %s3553_s12 = int_to_ptr.vmem [resolvable:$true] %s241_s12 }
  0x3f   : > { %p3995_p5 = pneg %p3544_p0 }
  0x41   : > { %s3551_s10 = scalar_lea.hbm %s4012_s0, %s2864_s18  ;;  %s3176_s11 = scalar_lea.hbm %s4012_s0, 36864 }
  0x42   : > { %s3171_s1 = scalar_lea.hbm %s3551_s10, 9216  ;;  %p3177_p1 = scmp.lt.u32.totalorder %s3551_s10, %s4012_s0 }
  0x43   : > { %p3172_p3 = scmp.ne.s32.totalorder %s3551_s10, %s3171_s1  ;;  %p3178_p2 = scmp.lt.u32.totalorder %s3176_s11, %s3171_s1 }
  0x44   : > { %p3180_p6 = scmp.lt.u32.totalorder %s3171_s1, %s3551_s10 }
  0x45   : > { %p3174_p7 = pnand %p3995_p5, %p3172_p3  ;;  %p3179_p4 = por %p3178_p2, %p3177_p1 }
  0x47   : > { %p3175_p10 = pneg %p3174_p7  ;;  %p3181_p8 = por %p3180_p6, %p3179_p4 }
  0x49   : > { %p3182_p9 = pnand %p3181_p8, %p3175_p10 }
  0x4b   : > { %3185 = shalt.err (!%p3182_p9)
}
  0x4c   : > { %s3186_s15 = scalar_lea.vmem %s3553_s12, 9216  ;;  %s3398_s16 = smov [#allocation2]  }
  0x4d   : > { %p3187_p3 = scmp.ne.s32.totalorder %s3553_s12, %s3186_s15  ;;  %s3191_s18 = sshll.u32 %s3398_s16, 4  ;;  %s3192_s18 = int_to_ptr.vmem [resolvable:$false] %s3191_s18 }
  0x4e   : > { %s3193_s7 = scalar_lea.vmem %s3192_s18, 18432  ;;  %p3194_p12 = scmp.lt.s32.totalorder %s3553_s12, %s3192_s18 }
  0x4f   : > { %p3189_p7 = pnand %p3187_p3, %p3995_p5  ;;  %p3195_p1 = scmp.lt.s32.totalorder %s3193_s7, %s3186_s15 }
  0x51   : > { %p3190_p13 = pneg %p3189_p7  ;;  %p3196_p2 = por %p3195_p1, %p3194_p12 }
  0x53   : > { %p3197_p4 = pnand %p3196_p2, %p3190_p13 }
  0x55   : > { %3200 = shalt.err (!%p3197_p4)
}
  0x56   : > { %s3399_s1 = smov 576   ;;  %s3400_s11 = smov 36  }
  0x57   : > { %2898 = dma.hbm_to_vmem [thread:$0]  (!%p3544_p0), %s3551_s10, 9216, %s3553_s12, %s3557_s26, %s3399_s1, %s3399_s1, %s3400_s11  }
  0x58   : > { %s3401_s17 = smov [#allocation8]   ;;  %s2529_s16 = sshll.u32 %s3393_s24, 10 }
  0x59   : > { %s218_s30 = sshll.u32 %s3401_s17, 4  ;;  %s3589_s15 = scalar_lea.hbm %s3979_s2, %s2529_s16  ;;  %s219_s30 = int_to_ptr.vmem [resolvable:$true] %s218_s30 }
  0x5a   : > { %s3201_s23 = scalar_lea.hbm %s3980_s3, 32  ;;  %p4013_p12 = pneg %p3493_p11 }
  0x5b   : > { %p3202_p13 = scmp.ne.s32.totalorder %s3980_s3, %s3201_s23  ;;  %p3208_p8 = scmp.lt.u32.totalorder %s3201_s23, %s3980_s3 }
  0x5d   : > { %p3204_p10 = pnand %p3202_p13, %p4013_p12 }
  0x5f   : > { %p3205_p6 = pneg %p3204_p10 }
  0x61   : > { %p3210_p9 = pnand %p3208_p8, %p3205_p6 }
  0x63   : > { %3213 = shalt.err (!%p3210_p9)
}
  0x64   : > { %s3214_s0 = scalar_lea.vmem %s219_s30, 32  ;;  %p4014_p7 = pmov %p4013_p12 }
  0x65   : > { %p3215_p3 = scmp.ne.s32.totalorder %s219_s30, %s3214_s0  ;;  %p3222_p4 = scmp.lt.s32.totalorder %s219_s30, %s219_s30 }
  0x66   : > { %p3223_p5 = scmp.lt.s32.totalorder %s3214_s0, %s3214_s0 }
  0x67   : > { %p3217_p1 = pnand %p3215_p3, %p4014_p7 }
  0x68   : > { %p3224_p0 = por %p3223_p5, %p3222_p4 }
  0x69   : > { %p3218_p2 = pneg %p3217_p1 }
  0x6b   : > { %p3225_p12 = pnand %p3224_p0, %p3218_p2 }
  0x6d   : > { %3228 = shalt.err (!%p3225_p12)
}
  0x6e   : > { %2894 = dma.hbm_to_vmem [thread:$0]  (!%p3493_p11), %s3980_s3, 32, %s219_s30, [#allocation6]  }
  0x6f   : > { %s255_s23 = scalar_lea.vmem [#allocation7], %s3555_s20  ;;  %s3229_s1 = scalar_lea.hbm %s3589_s15, 1024 }
  0x70   : > { %s262_s13 = sshll.u32 %s255_s23, 4  ;;  %p3230_p5 = scmp.ne.s32.totalorder %s3589_s15, %s3229_s1  ;;  %s3612_s13 = int_to_ptr.vmem [resolvable:$true] %s262_s13 }
  0x71   : > { %p4015_p0 = scmp.ne.s32.totalorder %s4011_s19, 0  ;;  %s3234_s17 = scalar_lea.hbm %s3979_s2, 4096 }
  0x72   : > { %p3235_p8 = scmp.lt.u32.totalorder %s3589_s15, %s3979_s2  ;;  %p3236_p9 = scmp.lt.u32.totalorder %s3234_s17, %s3229_s1 }
  0x73   : > { %p4016_p13 = pneg %p4015_p0  ;;  %p3238_p3 = scmp.lt.u32.totalorder %s3229_s1, %s3589_s15 }
  0x74   : > { %p3237_p11 = por %p3236_p9, %p3235_p8 }
  0x75   : > { %p3232_p10 = pnand %p3230_p5, %p4016_p13 }
  0x76   : > { %p3239_p7 = por %p3238_p3, %p3237_p11 }
  0x77   : > { %p3233_p6 = pneg %p3232_p10 }
  0x79   : > { %p3240_p1 = pnand %p3239_p7, %p3233_p6 }
  0x7b   : > { %3243 = shalt.err (!%p3240_p1)
}
  0x7c   : > { %s3244_s20 = scalar_lea.vmem %s3612_s13, 1024  ;;  %p4017_p4 = pmov %p4016_p13 }
  0x7d   : > { %p3245_p2 = scmp.ne.s32.totalorder %s3612_s13, %s3244_s20  ;;  %s3402_s30 = smov [#allocation7]  }
  0x7e   : > { %s3249_s7 = sshll.u32 %s3402_s30, 4  ;;  %s3250_s7 = int_to_ptr.vmem [resolvable:$false] %s3249_s7 }
  0x7f   : > { %p3247_p12 = pnand %p3245_p2, %p4017_p4  ;;  %s3251_s10 = scalar_lea.vmem %s3250_s7, 2048 }
  0x80   : > { %p3252_p13 = scmp.lt.s32.totalorder %s3612_s13, %s3250_s7  ;;  %p3253_p10 = scmp.lt.s32.totalorder %s3251_s10, %s3244_s20 }
  0x81   : > { %p3248_p5 = pneg %p3247_p12 }
  0x82   : > { %p3254_p8 = por %p3253_p10, %p3252_p13 }
  0x84   : > { %p3255_p9 = pnand %p3254_p8, %p3248_p5 }
  0x86   : > { %3258 = shalt.err (!%p3255_p9)
}
  0x87   : > { %s4018_s12 = smov 4   ;;  %s4019_s0 = smov 64  }
  0x88   : > { %2901 = dma.hbm_to_vmem [thread:$0]  (!%p4015_p0), %s3589_s15, 1024, %s3612_s13, %s3557_s26, %s4019_s0, %s4019_s0, %s4018_s12  }
  0x89   : > { %p4020_p6 = scmp.ne.s32.totalorder %s4004_s29, 0 }
  0x8a   : > { %s276_s28 = sand.u32 (!%p4020_p6), 1, %s3465_s25   ;;  %s3645_s9 = sand.u32 (!%p4020_p6), 1, %s3385_s22  }
  0x8b   : > { %274 = sbr.rel (%p4020_p6) target bundleno = 642 (0x282), region = 36  ;;  %s277_s1 = scalar_lea.sflag (!%p4020_p6), [#allocation3], %s276_s28 }
  0x8c   : > { %s2865_s23 = smul.u32 (!%p4020_p6), 576, %s3645_s9  ;;  %p4021_p11 = scmp.ne.s32.totalorder (!%p4020_p6), %s4001_s27, 0 }
  0x8e   : > { %s3648_s19 = scalar_lea.vmem (!%p4020_p6), [#allocation2], %s2865_s23 }
  0x92   : > { %3356 = dma.done.wait (%p4021_p11), %s277_s1, 9216  }
  0x93   : > { %3358 = vsyncadd (%p4021_p11), %s277_s1, 4294958080  ;;  %p4022_p0 = scmp.eq.s32.totalorder %s3465_s25, 0 }
  0x95   : > { %3360 = dma.done.wait (%p4022_p0), [#allocation6], 9216   ;;  %p4023_p3 = pmov %p4022_p0 }
  0x96   : > { %s2356_s29 = sshll.u32 %s3645_s9, 6 }
  0x97   : > { %3362 = vsyncadd (%p4023_p3), [#allocation6], 4294958080  ;;  %s3659_s26 = scalar_lea.vmem [#allocation7], %s2356_s29 }
  0x98   : > { %3364 = dma.done.wait (%p4021_p11), %s277_s1, 1024  }
  0x99   : > { %3366 = vsyncadd (%p4021_p11), %s277_s1, 4294966272  ;;  %p4024_p7 = pmov %p4022_p0 }
  0x9a   : > { %p4025_p1 = pmov %p4022_p0 }
  0x9b   : > { %3368 = dma.done.wait (%p4024_p7), [#allocation6], 32  }
  0x9c   : > { %3370 = vsyncadd (%p4025_p1), [#allocation6], 4294967264  ;;  %s2358_s15 = sshll.u32 %s3645_s9, 7  ;;  %p4026_p2 = scmp.ne.s32.totalorder %s3465_s25, 0 }
  0x9d   : > { %s3670_s13 = scalar_lea.vmem [#allocation9], %s2358_s15  ;;  %v3403_v0 = vmov (!%p4026_p2), 0.0  }
  0x9e   : > { %338 = sbr.rel (%p4026_p2) target bundleno = 165 (0xa5), region = 56  ;;  %339 = vst [vmem:[#allocation10] sm:$0x3] (!%p4026_p2), %v3403_v0  ;;  %340 = vst [vmem:[#allocation12] sm:$0x3] (!%p4026_p2), %v3403_v0 }
  0xa5 PF: > { %v2959_v1 = vld [vmem:[#allocation5 + $0x40] sm:$0xff]   ;;  %v2963_v5 = vld [vmem:[#allocation5 + $0x48] sm:$0xff]   ;;  %v2967_v9 = vld [vmem:[#allocation5 + $0x50] sm:$0xff]   ;;  %vm2011_vm0 = vcmask 1041408   ;;  %vm1986_vm1 = vcmask 31744   ;;  %s2530_s27 = sshll.u32 %s3465_s25, 11 }
  0xa6   : > { %v2960_v2 = vld [vmem:[#allocation5 + $0xc0] sm:$0xff]   ;;  %2531 = vmatprep.subr.bf16.mxu0 %v2959_v1  ;;  %v2964_v6 = vld [vmem:[#allocation5 + $0xc8] sm:$0xff]   ;;  %v2968_v10 = vld [vmem:[#allocation5 + $0xd0] sm:$0xff]   ;;  %s2188_s8 = sshll.u32 %s3670_s13, 4  ;;  %s3879_s16 = scalar_lea.hbm %s3981_s4, %s2530_s27  ;;  %s3881_s8 = int_to_ptr.vmem [resolvable:$true] %s2188_s8 }
  0xa7   : > { %v2961_v3 = vld [vmem:[#allocation5] sm:$0xff]   ;;  %2595 = vmatprep.subr.bf16.mxu1 %v2960_v2  ;;  %v2965_v7 = vld [vmem:[#allocation5 + $0x8] sm:$0xff]   ;;  %v2969_v11 = vld [vmem:[#allocation5 + $0x10] sm:$0xff]   ;;  %s2175_s18 = scalar_lea.sflag [#allocation4], %s3645_s9  ;;  %s3259_s20 = scalar_lea.vmem %s3881_s8, 2048 }
  0xa8   : > { %v2962_v4 = vld [vmem:[#allocation5 + $0x80] sm:$0xff]   ;;  %2532 = vmatpush3.bf16.msra.mxu0 %v2961_v3  ;;  %v2966_v8 = vld [vmem:[#allocation5 + $0x88] sm:$0xff]   ;;  %v2970_v12 = vld [vmem:[#allocation5 + $0x90] sm:$0xff]   ;;  %p3260_p4 = scmp.ne.s32.totalorder %s3881_s8, %s3259_s20  ;;  %p4027_p12 = scmp.ne.s32.totalorder %s4010_s14, 0 }
  0xa9   : > { %2596 = vmatpush3.bf16.msra.mxu1 %v2962_v4  ;;  %2533 = vmatprep.subr.bf16.mxu0 %v2963_v5  ;;  %v2971_v13 = vld [vmem:[#allocation5 + $0x58] sm:$0xff]   ;;  %v2975_v17 = vld [vmem:[#allocation5 + $0x60] sm:$0xff]   ;;  %v2979_v21 = vld [vmem:[#allocation5 + $0x68] sm:$0xff]   ;;  %s3404_s30 = smov [#allocation9]  }
  0xaa   : > { %2597 = vmatprep.subr.bf16.mxu1 %v2964_v6  ;;  %v2972_v14 = vld [vmem:[#allocation5 + $0xd8] sm:$0xff]   ;;  %v2976_v18 = vld [vmem:[#allocation5 + $0xe0] sm:$0xff]   ;;  %v2980_v22 = vld [vmem:[#allocation5 + $0xe8] sm:$0xff]   ;;  %p3261_p5 = pnand %p3260_p4, %p4027_p12  ;;  %s3263_s7 = sshll.u32 %s3404_s30, 4  ;;  %s3264_s7 = int_to_ptr.vmem [resolvable:$false] %s3263_s7 }
  0xab   : > { %v2973_v15 = vld [vmem:[#allocation5 + $0x18] sm:$0xff]   ;;  %v2977_v19 = vld [vmem:[#allocation5 + $0x20] sm:$0xff]   ;;  %v2981_v23 = vld [vmem:[#allocation5 + $0x28] sm:$0xff]   ;;  %s3265_s10 = scalar_lea.vmem %s3264_s7, 4096  ;;  %p3266_p10 = scmp.lt.s32.totalorder %s3881_s8, %s3264_s7 }
  0xac   : > { %2534 = vmatpush3.bf16.msra.mxu0 %v2965_v7  ;;  %v2974_v16 = vld [vmem:[#allocation5 + $0x98] sm:$0xff]   ;;  %v2978_v20 = vld [vmem:[#allocation5 + $0xa0] sm:$0xff]   ;;  %v2982_v24 = vld [vmem:[#allocation5 + $0xa8] sm:$0xff]   ;;  %p3262_p13 = pneg %p3261_p5  ;;  %p3267_p8 = scmp.lt.s32.totalorder %s3265_s10, %s3259_s20 }
  0xad   : > { %2598 = vmatpush3.bf16.msra.mxu1 %v2966_v8  ;;  %2535 = vmatprep.subr.bf16.mxu0 %v2967_v9  ;;  %v2983_v25 = vld [vmem:[#allocation5 + $0x70] sm:$0xff]   ;;  %v2987_v29 = vld [vmem:[#allocation5 + $0x78] sm:$0xff]   ;;  %v2991_v33 = vld [vmem:[%s3648_s19] ss:$36 sps:$4 sm:$0xff]  }
  0xae   : > { %2599 = vmatprep.subr.bf16.mxu1 %v2968_v10  ;;  %v2984_v26 = vld [vmem:[#allocation5 + $0xf0] sm:$0xff]   ;;  %v2988_v30 = vld [vmem:[#allocation5 + $0xf8] sm:$0xff]   ;;  %v2993_v34 = vld [vmem:[%s3648_s19 + $0x4] ss:$36 sps:$4 sm:$0xff]   ;;  %p3268_p9 = por %p3267_p8, %p3266_p10 }
  0xaf   : > { %v2985_v27 = vld [vmem:[#allocation5 + $0x30] sm:$0xff]   ;;  %v2989_v31 = vld [vmem:[#allocation5 + $0x38] sm:$0xff]   ;;  %v2994_v35 = vld [vmem:[%s3648_s19 + $0x8] ss:$36 sps:$4 sm:$0xff]   ;;  %1397 = vmatprep.mubr.bf16.mxu0 %v2993_v34 }
  0xb0   : > { %2536 = vmatpush3.bf16.msra.mxu0 %v2969_v11  ;;  %v2986_v28 = vld [vmem:[#allocation5 + $0xb0] sm:$0xff]   ;;  %v2990_v32 = vld [vmem:[#allocation5 + $0xb8] sm:$0xff]   ;;  %v2997_v37 = vld [vmem:[#allocation5 + $0x140] sm:$0xff]   ;;  %p3269_p6 = pnand %p3268_p9, %p3262_p13 }
  0xb1   : > { %2600 = vmatpush3.bf16.msra.mxu1 %v2970_v12  ;;  %2537 = vmatprep.subr.bf16.mxu0 %v2971_v13  ;;  %v2996_v36 = vld [vmem:[%s3648_s19 + $0xc] ss:$36 sps:$4 sm:$0xff]   ;;  %v2998_v38 = vld [vmem:[#allocation5 + $0x100] sm:$0xff]   ;;  %v3003_v42 = vld [vmem:[%s3648_s19 + $0x54] ss:$36 sps:$4 sm:$0xff]  }
  0xb2   : > { %2601 = vmatprep.subr.bf16.mxu1 %v2972_v14  ;;  %1494 = vmatprep.mubr.bf16.mxu1 %v2996_v36  ;;  %v2999_v39 = vld [vmem:[#allocation5 + $0x1c0] sm:$0xff]   ;;  %v3001_v41 = vld [vmem:[%s3648_s19 + $0x4c] ss:$36 sps:$4 sm:$0xff]   ;;  %v3011_v49 = vld [vmem:[%s3648_s19 + $0x94] ss:$36 sps:$4 sm:$0xff]  }
  0xb3   : > { %v3000_v40 = vld [vmem:[#allocation5 + $0x180] sm:$0xff]   ;;  %v3005_v43 = vld [vmem:[%s3648_s19 + $0x48] ss:$36 sps:$4 sm:$0xff]   ;;  %v3006_v44 = vld [vmem:[%s3648_s19 + $0x50] ss:$36 sps:$4 sm:$0xff]  }
  0xb4   : > { %2538 = vmatpush3.bf16.msra.mxu0 %v2973_v15  ;;  %v3007_v45 = vld [vmem:[#allocation5 + $0x148] sm:$0xff]   ;;  %v3013_v50 = vld [vmem:[%s3648_s19 + $0x9c] ss:$36 sps:$4 sm:$0xff]   ;;  %v3015_v51 = vld [vmem:[%s3648_s19 + $0x90] ss:$36 sps:$4 sm:$0xff]  }
  0xb5   : > { %2602 = vmatpush3.bf16.msra.mxu1 %v2974_v16  ;;  %2539 = vmatprep.subr.bf16.mxu0 %v2975_v17  ;;  %v3008_v46 = vld [vmem:[#allocation5 + $0x108] sm:$0xff]   ;;  %v3016_v52 = vld [vmem:[%s3648_s19 + $0x98] ss:$36 sps:$4 sm:$0xff]   ;;  %v3017_v53 = vld [vmem:[#allocation5 + $0x150] sm:$0xff]  }
  0xb6   : > { %2603 = vmatprep.subr.bf16.mxu1 %v2976_v18  ;;  %v3009_v47 = vld [vmem:[#allocation5 + $0x1c8] sm:$0xff]   ;;  %v3018_v54 = vld [vmem:[#allocation5 + $0x110] sm:$0xff]   ;;  %v3021_v57 = vld [vmem:[%s3648_s19 + $0xdc] ss:$36 sps:$4 sm:$0xff]  }
  0xb7   : > { %v3010_v48 = vld [vmem:[#allocation5 + $0x188] sm:$0xff]   ;;  %v3019_v55 = vld [vmem:[#allocation5 + $0x1d0] sm:$0xff]   ;;  %v3025_v59 = vld [vmem:[%s3648_s19 + $0xd8] ss:$36 sps:$4 sm:$0xff]  }
  0xb8   : > { %2540 = vmatpush3.bf16.msra.mxu0 %v2977_v19  ;;  %v3020_v56 = vld [vmem:[#allocation5 + $0x190] sm:$0xff]   ;;  %v3023_v58 = vld [vmem:[%s3648_s19 + $0xe4] ss:$36 sps:$4 sm:$0xff]   ;;  %v3027_v61 = vld [vmem:[#allocation5 + $0x158] sm:$0xff]  }
  0xb9   : > { %2604 = vmatpush3.bf16.msra.mxu1 %v2978_v20  ;;  %2541 = vmatprep.subr.bf16.mxu0 %v2979_v21  ;;  %v3026_v60 = vld [vmem:[%s3648_s19 + $0xe0] ss:$36 sps:$4 sm:$0xff]   ;;  %v3028_v62 = vld [vmem:[#allocation5 + $0x118] sm:$0xff]   ;;  %v3033_v2 = vld [vmem:[%s3648_s19 + $0x12c] ss:$36 sps:$4 sm:$0xff]  }
  0xba   : > { %2605 = vmatprep.subr.bf16.mxu1 %v2980_v22  ;;  %v3029_v63 = vld [vmem:[#allocation5 + $0x1d8] sm:$0xff]   ;;  %v3031_v1 = vld [vmem:[%s3648_s19 + $0x124] ss:$36 sps:$4 sm:$0xff]   ;;  %v3041_v9 = vld [vmem:[%s3648_s19 + $0x16c] ss:$36 sps:$4 sm:$0xff]  }
  0xbb   : > { %v3030_v0 = vld [vmem:[#allocation5 + $0x198] sm:$0xff]   ;;  %v3035_v3 = vld [vmem:[%s3648_s19 + $0x120] ss:$36 sps:$4 sm:$0xff]   ;;  %v3036_v5 = vld [vmem:[%s3648_s19 + $0x128] ss:$36 sps:$4 sm:$0xff]  }
  0xbc   : > { %2542 = vmatpush3.bf16.msra.mxu0 %v2981_v23  ;;  %v3037_v4 = vld [vmem:[#allocation5 + $0x160] sm:$0xff]   ;;  %v3043_v10 = vld [vmem:[%s3648_s19 + $0x174] ss:$36 sps:$4 sm:$0xff]   ;;  %v3047_v11 = vld [vmem:[#allocation5 + $0x168] sm:$0xff]  }
  0xbd   : > { %2606 = vmatpush3.bf16.msra.mxu1 %v2982_v24  ;;  %2543 = vmatprep.subr.bf16.mxu0 %v2983_v25  ;;  %v3038_v6 = vld [vmem:[#allocation5 + $0x120] sm:$0xff]   ;;  %v3048_v12 = vld [vmem:[#allocation5 + $0x128] sm:$0xff]   ;;  %v3046_v16 = vld [vmem:[%s3648_s19 + $0x170] ss:$36 sps:$4 sm:$0xff]  }
  0xbe   : > { %2607 = vmatprep.subr.bf16.mxu1 %v2984_v26  ;;  %v3039_v7 = vld [vmem:[#allocation5 + $0x1e0] sm:$0xff]   ;;  %v3045_v13 = vld [vmem:[%s3648_s19 + $0x168] ss:$36 sps:$4 sm:$0xff]   ;;  %v3051_v17 = vld [vmem:[%s3648_s19 + $0x1b4] ss:$36 sps:$4 sm:$0xff]  }
  0xbf   : > { %v3040_v8 = vld [vmem:[#allocation5 + $0x1a0] sm:$0xff]   ;;  %v3049_v14 = vld [vmem:[#allocation5 + $0x1e8] sm:$0xff]   ;;  %v3057_v19 = vld [vmem:[#allocation5 + $0x170] sm:$0xff]  }
  0xc0   : > { %2544 = vmatpush3.bf16.msra.mxu0 %v2985_v27  ;;  %v3050_v15 = vld [vmem:[#allocation5 + $0x1a8] sm:$0xff]   ;;  %v3053_v18 = vld [vmem:[%s3648_s19 + $0x1bc] ss:$36 sps:$4 sm:$0xff]   ;;  %v3058_v20 = vld [vmem:[#allocation5 + $0x130] sm:$0xff]  }
  0xc1   : > { %2608 = vmatpush3.bf16.msra.mxu1 %v2986_v28  ;;  %2545 = vmatprep.subr.bf16.mxu0 %v2987_v29  ;;  %v3059_v21 = vld [vmem:[#allocation5 + $0x1f0] sm:$0xff]   ;;  %v3056_v24 = vld [vmem:[%s3648_s19 + $0x1b8] ss:$36 sps:$4 sm:$0xff]   ;;  %v3063_v26 = vld [vmem:[%s3648_s19 + $0x204] ss:$36 sps:$4 sm:$0xff]  }
  0xc2   : > { %2609 = vmatprep.subr.bf16.mxu1 %v2988_v30  ;;  %v3060_v22 = vld [vmem:[#allocation5 + $0x1b0] sm:$0xff]   ;;  %v3061_v25 = vld [vmem:[%s3648_s19 + $0x1fc] ss:$36 sps:$4 sm:$0xff]  }
  0xc3   : > { %v3055_v23 = vld [vmem:[%s3648_s19 + $0x1b0] ss:$36 sps:$4 sm:$0xff]   ;;  %v3067_v27 = vld [vmem:[#allocation5 + $0x178] sm:$0xff]   ;;  %v3077_v34 = vld [vmem:[#allocation5 + $0x200] sm:$0xff]  }
  0xc4   : > { %2546 = vmatpush3.bf16.msra.mxu0 %v2989_v31  ;;  %v3068_v28 = vld [vmem:[#allocation5 + $0x138] sm:$0xff]  }
  0xc5   : > { %2610 = vmatpush3.bf16.msra.mxu1 %v2990_v32  ;;  %2659 = vmatprep.subr.bf16.mxu0 %v2997_v37  ;;  %v3069_v29 = vld [vmem:[#allocation5 + $0x1f8] sm:$0xff]   ;;  %v3066_v32 = vld [vmem:[%s3648_s19 + $0x200] ss:$36 sps:$4 sm:$0xff]   ;;  %v3071_v37 = vld [vmem:[%s3648_s19 + $0x10] ss:$36 sps:$4 sm:$0xff]  }
  0xc6   : > { %2723 = vmatprep.subr.bf16.mxu1 %v2999_v39  ;;  %v3070_v30 = vld [vmem:[#allocation5 + $0x1b8] sm:$0xff]  }
  0xc7   : > { %1398 = vmatmul.mubr.bf16.vlgmr.msra.gmra.mrb[0].mxu0 %v2991_v33  ;;  %v3065_v31 = vld [vmem:[%s3648_s19 + $0x1f8] ss:$36 sps:$4 sm:$0xff]  }
  0xc8   : > { %1495 = vmatmul.mubr.bf16.vlgmr.msra.gmra.mrb[0].mxu1 %v2994_v35  ;;  %2660 = vmatpush3.bf16.msra.mxu0 %v2998_v38  ;;  %v3073_v33 = vld [vmem:[%s3648_s19 + $0x14] ss:$36 sps:$4 sm:$0xff]   ;;  %v1945_v35 = vld [vmem:[#allocation8] sm:$0x3] }
  0xc9   : > { %2724 = vmatpush3.bf16.msra.mxu1 %v3000_v40  ;;  %1405 = vmatprep.mubr.bf16.mxu0 %v3001_v41  ;;  %v3076_v36 = vld [vmem:[%s3648_s19 + $0x1c] ss:$36 sps:$4 sm:$0xff]   ;;  %v3080_v40 = vld [vmem:[%s3648_s19 + $0x64] ss:$36 sps:$4 sm:$0xff]   ;;  %v2013_v41 = vsel %vm2011_vm0, %v1945_v35, 0 }
  0xca   : > { %1502 = vmatprep.mubr.bf16.mxu1 %v3003_v42  ;;  %2661 = vmatprep.subr.bf16.mxu0 %v3007_v45  ;;  %v3074_v38 = vld [vmem:[%s3648_s19 + $0x18] ss:$36 sps:$4 sm:$0xff]   ;;  %v3084_v42 = vld [vmem:[#allocation5 + $0x208] sm:$0xff]   ;;  %v3083_v45 = vld [vmem:[%s3648_s19 + $0x60] ss:$36 sps:$4 sm:$0xff]  }
  0xcb   : > { %2725 = vmatprep.subr.bf16.mxu1 %v3009_v47  ;;  %v3078_v39 = vld [vmem:[%s3648_s19 + $0x5c] ss:$36 sps:$4 sm:$0xff]   ;;  %v3087_v47 = vld [vmem:[%s3648_s19 + $0xac] ss:$36 sps:$4 sm:$0xff]  }
  0xcc   : > { %2662 = vmatpush3.bf16.msra.mxu0 %v3008_v46  ;;  %v3085_v46 = vld [vmem:[%s3648_s19 + $0xa4] ss:$36 sps:$4 sm:$0xff]  }
  0xcd   : > { %2726 = vmatpush3.bf16.msra.mxu1 %v3010_v48  ;;  %2663 = vmatprep.subr.bf16.mxu0 %v3017_v53  ;;  %v3098_v48 = vld [vmem:[#allocation5 + $0x218] sm:$0xff]  }
  0xce   : > { %2727 = vmatprep.subr.bf16.mxu1 %v3019_v55  ;;  %v3094_v53 = vld [vmem:[%s3648_s19 + $0xf4] ss:$36 sps:$4 sm:$0xff]   ;;  %v3096_v55 = vld [vmem:[%s3648_s19 + $0xe8] ss:$36 sps:$4 sm:$0xff]  }
  0xcf   : > { %1406 = vmatmul.mubr.bf16.gmra.mrb[4].mxu0 %v3005_v43  ;;  %v3091_v43 = vld [vmem:[#allocation5 + $0x210] sm:$0xff]  }
  0xd0   : > { %1503 = vmatmul.mubr.bf16.gmra.mrb[4].mxu1 %v3006_v44  ;;  %1413 = vmatprep.mubr.bf16.mxu0 %v3011_v49  ;;  %v3082_v44 = vld [vmem:[%s3648_s19 + $0x58] ss:$36 sps:$4 sm:$0xff]   ;;  %v3105_v49 = vld [vmem:[#allocation5 + $0x220] sm:$0xff]  }
  0xd1   : > { %1510 = vmatprep.mubr.bf16.mxu1 %v3013_v50  ;;  %2664 = vmatpush3.bf16.msra.mxu0 %v3018_v54  ;;  %v3089_v50 = vld [vmem:[%s3648_s19 + $0xa0] ss:$36 sps:$4 sm:$0xff]   ;;  %v3112_v54 = vld [vmem:[#allocation5 + $0x228] sm:$0xff]  }
  0xd2   : > { %2728 = vmatpush3.bf16.msra.mxu1 %v3020_v56  ;;  %2665 = vmatprep.subr.bf16.mxu0 %v3027_v61  ;;  %v3119_v56 = vld [vmem:[#allocation5 + $0x230] sm:$0xff]  }
  0xd3   : > { %2729 = vmatprep.subr.bf16.mxu1 %v3029_v63  ;;  %v3103_v61 = vld [vmem:[%s3648_s19 + $0x130] ss:$36 sps:$4 sm:$0xff]   ;;  %v3106_v63 = vld [vmem:[%s3648_s19 + $0x17c] ss:$36 sps:$4 sm:$0xff]  }
  0xd5   : > { %2666 = vmatpush3.bf16.msra.mxu0 %v3028_v62  ;;  %v3104_v62 = vld [vmem:[%s3648_s19 + $0x138] ss:$36 sps:$4 sm:$0xff]  }
  0xd6   : > { %2730 = vmatpush3.bf16.msra.mxu1 %v3030_v0  ;;  %2667 = vmatprep.subr.bf16.mxu0 %v3037_v4  ;;  %v3108_v0 = vld [vmem:[%s3648_s19 + $0x184] ss:$36 sps:$4 sm:$0xff]   ;;  %v3115_v4 = vld [vmem:[%s3648_s19 + $0x1cc] ss:$36 sps:$4 sm:$0xff]  }
  0xd7   : > { %1414 = vmatmul.mubr.bf16.gmra.mrb[8].mxu0 %v3015_v51  ;;  %2731 = vmatprep.subr.bf16.mxu1 %v3039_v7  ;;  %v3090_v51 = vld [vmem:[%s3648_s19 + $0xa8] ss:$36 sps:$4 sm:$0xff]  }
  0xd8   : > { %1511 = vmatmul.mubr.bf16.gmra.mrb[8].mxu1 %v3016_v52  ;;  %1421 = vmatprep.mubr.bf16.mxu0 %v3021_v57  ;;  %v3092_v52 = vld [vmem:[%s3648_s19 + $0xec] ss:$36 sps:$4 sm:$0xff]  }
  0xd9   : > { %1518 = vmatprep.mubr.bf16.mxu1 %v3023_v58  ;;  %2668 = vmatpush3.bf16.msra.mxu0 %v3038_v6  ;;  %v3097_v57 = vld [vmem:[%s3648_s19 + $0xf0] ss:$36 sps:$4 sm:$0xff]   ;;  %v3118_v6 = vld [vmem:[%s3648_s19 + $0x1c8] ss:$36 sps:$4 sm:$0xff]  }
  0xda   : > { %2732 = vmatpush3.bf16.msra.mxu1 %v3040_v8  ;;  %2669 = vmatprep.subr.bf16.mxu0 %v3047_v11  ;;  %v3099_v58 = vld [vmem:[%s3648_s19 + $0x134] ss:$36 sps:$4 sm:$0xff]   ;;  %v3120_v7 = vld [vmem:[%s3648_s19 + $0x20c] ss:$36 sps:$4 sm:$0xff]   ;;  %v3127_v11 = vld [vmem:[%s3648_s19 + $0x20] ss:$36 sps:$4 sm:$0xff]  }
  0xdb   : > { %2733 = vmatprep.subr.bf16.mxu1 %v3049_v14  ;;  %v3122_v8 = vld [vmem:[%s3648_s19 + $0x214] ss:$36 sps:$4 sm:$0xff]   ;;  %v3130_v14 = vld [vmem:[%s3659_s26 + $0x8] sm:$0xff]  }
  0xdd   : > { %2670 = vmatpush3.bf16.msra.mxu0 %v3048_v12  ;;  %v3128_v12 = vld [vmem:[%s3659_s26] sm:$0xff]  }
  0xde   : > { %2734 = vmatpush3.bf16.msra.mxu1 %v3050_v15  ;;  %2671 = vmatprep.subr.bf16.mxu0 %v3057_v19  ;;  %v3131_v15 = vld [vmem:[%s3648_s19 + $0xb0] ss:$36 sps:$4 sm:$0xff]   ;;  %v3135_v19 = vld [vmem:[%s3648_s19 + $0x140] ss:$36 sps:$4 sm:$0xff]  }
  0xdf   : > { %1422 = vmatmul.mubr.bf16.gmra.mrb[12].mxu0 %v3025_v59  ;;  %2735 = vmatprep.subr.bf16.mxu1 %v3059_v21  ;;  %v3101_v59 = vld [vmem:[%s3648_s19 + $0x13c] ss:$36 sps:$4 sm:$0xff]   ;;  %v3137_v21 = vld [vmem:[%s3648_s19 + $0x188] ss:$36 sps:$4 sm:$0xff]  }
  0xe0   : > { %1519 = vmatmul.mubr.bf16.gmra.mrb[12].mxu1 %v3026_v60  ;;  %1429 = vmatprep.mubr.bf16.mxu0 %v3031_v1  ;;  %v3126_v60 = vld [vmem:[#allocation5 + $0x238] sm:$0xff]  }
  0xe1   : > { %1526 = vmatprep.mubr.bf16.mxu1 %v3033_v2  ;;  %2672 = vmatpush3.bf16.msra.mxu0 %v3058_v20  ;;  %v3110_v1 = vld [vmem:[%s3648_s19 + $0x178] ss:$36 sps:$4 sm:$0xff]   ;;  %v3111_v2 = vld [vmem:[%s3648_s19 + $0x180] ss:$36 sps:$4 sm:$0xff]  }
  0xe2   : > { %2736 = vmatpush3.bf16.msra.mxu1 %v3060_v22  ;;  %2673 = vmatprep.subr.bf16.mxu0 %v3067_v27  ;;  %v3136_v20 = vld [vmem:[%s3659_s26 + $0x20] sm:$0xff]   ;;  %v3138_v22 = vld [vmem:[%s3659_s26 + $0x28] sm:$0xff]  }
  0xe3   : > { %2737 = vmatprep.subr.bf16.mxu1 %v3069_v29 }
  0xe5   : > { %2674 = vmatpush3.bf16.msra.mxu0 %v3068_v28 }
  0xe6   : > { %2738 = vmatpush3.bf16.msra.mxu1 %v3070_v30  ;;  %2812 = vmatprep.subr.bf16.mxu0 %v3077_v34 }
  0xe7   : > { %1430 = vmatmul.mubr.bf16.gmra.mrb[16].mxu0 %v3035_v3  ;;  %2862 = vmatprep.subr.msk.bf16.mxu1 %vm2011_vm0, %v1945_v35  ;;  %v3113_v3 = vld [vmem:[%s3648_s19 + $0x1c4] ss:$36 sps:$4 sm:$0xff]  }
  0xe8   : > { %1527 = vmatmul.mubr.bf16.gmra.mrb[16].mxu1 %v3036_v5  ;;  %1437 = vmatprep.mubr.bf16.mxu0 %v3041_v9  ;;  %v3117_v5 = vld [vmem:[%s3648_s19 + $0x1c0] ss:$36 sps:$4 sm:$0xff]   ;;  %v3124_v9 = vld [vmem:[%s3648_s19 + $0x208] ss:$36 sps:$4 sm:$0xff]  }
  0xe9   : > { %1534 = vmatprep.mubr.bf16.mxu1 %v3043_v10  ;;  %v3125_v10 = vld [vmem:[%s3648_s19 + $0x210] ss:$36 sps:$4 sm:$0xff]  }
  0xef   : > { %1438 = vmatmul.mubr.bf16.gmra.mrb[20].mxu0 %v3045_v13  ;;  %v3129_v13 = vld [vmem:[%s3648_s19 + $0x68] ss:$36 sps:$4 sm:$0xff]  }
  0xf0   : > { %1535 = vmatmul.mubr.bf16.gmra.mrb[20].mxu1 %v3046_v16  ;;  %1445 = vmatprep.mubr.bf16.mxu0 %v3051_v17  ;;  %v3132_v16 = vld [vmem:[%s3659_s26 + $0x10] sm:$0xff]   ;;  %v3133_v17 = vld [vmem:[%s3648_s19 + $0xf8] ss:$36 sps:$4 sm:$0xff]  }
  0xf1   : > { %1542 = vmatprep.mubr.bf16.mxu1 %v3053_v18  ;;  %v3134_v18 = vld [vmem:[%s3659_s26 + $0x18] sm:$0xff]  }
  0xf7   : > { %1446 = vmatmul.mubr.bf16.gmra.mrb[24].mxu0 %v3055_v23  ;;  %v3139_v23 = vld [vmem:[%s3648_s19 + $0x1d0] ss:$36 sps:$4 sm:$0xff]  }
  0xf8   : > { %1543 = vmatmul.mubr.bf16.gmra.mrb[24].mxu1 %v3056_v24  ;;  %1453 = vmatprep.mubr.bf16.mxu0 %v3061_v25  ;;  %v3140_v24 = vld [vmem:[%s3659_s26 + $0x30] sm:$0xff]   ;;  %v3141_v25 = vld [vmem:[%s3648_s19 + $0x218] ss:$36 sps:$4 sm:$0xff]  }
  0xf9   : > { %1550 = vmatprep.mubr.bf16.mxu1 %v3063_v26  ;;  %v3142_v26 = vld [vmem:[%s3659_s26 + $0x38] sm:$0xff]  }
  0xff   : > { %1454 = vmatmul.mubr.bf16.gmra.mrb[28].mxu0 %v3065_v31 }
 0x100   : > { %1551 = vmatmul.mubr.bf16.gmra.mrb[28].mxu1 %v3066_v32  ;;  %1591 = vmatprep.mubr.bf16.mxu0 %v3073_v33 }
 0x101   : > { %1688 = vmatprep.mubr.bf16.mxu1 %v3076_v36 }
 0x107   : > { %1592 = vmatmul.mubr.bf16.vlgmr.msra.gmra.mrb[32].mxu0 %v3071_v37 }
 0x108   : > { %1689 = vmatmul.mubr.bf16.vlgmr.msra.gmra.mrb[32].mxu1 %v3074_v38  ;;  %2813 = vmatpush3.bf16.msra.mxu0 %v3077_v34 }
 0x109   : > { %2845 = vmatpush3.bf16.msra.mxu1 %v2013_v41  ;;  %1599 = vmatprep.mubr.bf16.mxu0 %v3078_v39 }
 0x10a   : > { %1696 = vmatprep.mubr.bf16.mxu1 %v3080_v40  ;;  %2814 = vmatprep.subr.bf16.mxu0 %v3084_v42 }
 0x10c   : > { %2815 = vmatpush3.bf16.msra.mxu0 %v3084_v42 }
 0x10d   : > { %2816 = vmatprep.subr.bf16.mxu0 %v3091_v43 }
 0x10f   : > { %1600 = vmatmul.mubr.bf16.gmra.mrb[36].mxu0 %v3082_v44 }
 0x110   : > { %1697 = vmatmul.mubr.bf16.gmra.mrb[36].mxu1 %v3083_v45  ;;  %1607 = vmatprep.mubr.bf16.mxu0 %v3085_v46 }
 0x111   : > { %1704 = vmatprep.mubr.bf16.mxu1 %v3087_v47  ;;  %2817 = vmatpush3.bf16.msra.mxu0 %v3091_v43 }
 0x112   : > { %2818 = vmatprep.subr.bf16.mxu0 %v3098_v48 }
 0x115   : > { %2819 = vmatpush3.bf16.msra.mxu0 %v3098_v48 }
 0x116   : > { %2820 = vmatprep.subr.bf16.mxu0 %v3105_v49 }
 0x117   : > { %1608 = vmatmul.mubr.bf16.gmra.mrb[40].mxu0 %v3089_v50 }
 0x118   : > { %1705 = vmatmul.mubr.bf16.gmra.mrb[40].mxu1 %v3090_v51  ;;  %1615 = vmatprep.mubr.bf16.mxu0 %v3092_v52 }
 0x119   : > { %1712 = vmatprep.mubr.bf16.mxu1 %v3094_v53  ;;  %2821 = vmatpush3.bf16.msra.mxu0 %v3105_v49 }
 0x11a   : > { %2822 = vmatprep.subr.bf16.mxu0 %v3112_v54 }
 0x11d   : > { %2823 = vmatpush3.bf16.msra.mxu0 %v3112_v54 }
 0x11e   : > { %2824 = vmatprep.subr.bf16.mxu0 %v3119_v56 }
 0x11f   : > { %1616 = vmatmul.mubr.bf16.gmra.mrb[44].mxu0 %v3096_v55 }
 0x120   : > { %1713 = vmatmul.mubr.bf16.gmra.mrb[44].mxu1 %v3097_v57  ;;  %1623 = vmatprep.mubr.bf16.mxu0 %v3099_v58 }
 0x121   : > { %1720 = vmatprep.mubr.bf16.mxu1 %v3101_v59  ;;  %2825 = vmatpush3.bf16.msra.mxu0 %v3119_v56 }
 0x122   : > { %2826 = vmatprep.subr.bf16.mxu0 %v3126_v60 }
 0x125   : > { %2827 = vmatpush3.bf16.msra.mxu0 %v3126_v60 }
 0x127   : > { %1624 = vmatmul.mubr.bf16.gmra.mrb[48].mxu0 %v3103_v61 }
 0x128   : > { %1721 = vmatmul.mubr.bf16.gmra.mrb[48].mxu1 %v3104_v62  ;;  %1631 = vmatprep.mubr.bf16.mxu0 %v3106_v63 }
 0x129   : > { %1728 = vmatprep.mubr.bf16.mxu1 %v3108_v0 }
 0x12f   : > { %1632 = vmatmul.mubr.bf16.gmra.mrb[52].mxu0 %v3110_v1 }
 0x130   : > { %1729 = vmatmul.mubr.bf16.gmra.mrb[52].mxu1 %v3111_v2  ;;  %1639 = vmatprep.mubr.bf16.mxu0 %v3113_v3 }
 0x131   : > { %1736 = vmatprep.mubr.bf16.mxu1 %v3115_v4 }
 0x137   : > { %1640 = vmatmul.mubr.bf16.gmra.mrb[56].mxu0 %v3117_v5 }
 0x138   : > { %1737 = vmatmul.mubr.bf16.gmra.mrb[56].mxu1 %v3118_v6  ;;  %1647 = vmatprep.mubr.bf16.mxu0 %v3120_v7 }
 0x139   : > { %1744 = vmatprep.mubr.bf16.mxu1 %v3122_v8 }
 0x13f   : > { %1648 = vmatmul.mubr.bf16.gmra.mrb[60].mxu0 %v3124_v9 }
 0x140   : > { %1745 = vmatmul.mubr.bf16.gmra.mrb[60].mxu1 %v3125_v10  ;;  %2828 = vmatprep.mubr.bf16.mxu0 %v3127_v11 }
 0x141   : > { %2846 = vmatprep.mubr.msk.bf16.mxu1 %vm1986_vm1, %v3128_v12 }
 0x147   : > { %2829 = vmatmul.mubr.bf16.vlgmr.msra.gmra.mrb[64].mxu0 %v3129_v13 }
 0x148   : > { %2847 = vmatmul.mubr.msk.bf16.vlgmr.msra.gmra.mrb[64].mxu1 %vm1986_vm1, %v3130_v14  ;;  %2832 = vmatprep.mubr.bf16.mxu0 %v3131_v15 }
 0x149   : > { %2850 = vmatprep.mubr.msk.bf16.mxu1 %vm1986_vm1, %v3132_v16 }
 0x14f   : > { %2833 = vmatmul.mubr.bf16.gmra.mrb[68].mxu0 %v3133_v17 }
 0x150   : > { %2851 = vmatmul.mubr.msk.bf16.gmra.mrb[68].mxu1 %vm1986_vm1, %v3134_v18  ;;  %2836 = vmatprep.mubr.bf16.mxu0 %v3135_v19 }
 0x151   : > { %2854 = vmatprep.mubr.msk.bf16.mxu1 %vm1986_vm1, %v3136_v20 }
 0x157   : > { %2837 = vmatmul.mubr.bf16.gmra.mrb[72].mxu0 %v3137_v21 }
 0x158   : > { %2855 = vmatmul.mubr.msk.bf16.gmra.mrb[72].mxu1 %vm1986_vm1, %v3138_v22  ;;  %2840 = vmatprep.mubr.bf16.mxu0 %v3139_v23 }
 0x159   : > { %2858 = vmatprep.mubr.msk.bf16.mxu1 %vm1986_vm1, %v3140_v24 }
 0x15f   : > { %2841 = vmatmul.mubr.bf16.gmra.mrb[76].mxu0 %v3141_v25 }
 0x160   : > { %2859 = vmatmul.mubr.msk.bf16.gmra.mrb[76].mxu1 %vm1986_vm1, %v3142_v26 }
 0x19a   : > { %v2547_v27 = vpop.f32.mrb[0].mxu0 }
 0x19b   : > { %v2611_v28 = vpop.f32.mrb[0].mxu1  ;;  %v2548_v29 = vpop.f32.mrb[1].mxu0 }
 0x19c   : > { %v2549_v30 = vadd.f32 %v2548_v29, %v2547_v27  ;;  %v2612_v31 = vpop.f32.mrb[1].mxu1  ;;  %v2550_v32 = vpop.f32.mrb[2].mxu0 }
 0x19d   : > { %v2613_v33 = vadd.f32 %v2612_v31, %v2611_v28  ;;  %v2614_v34 = vpop.f32.mrb[2].mxu1  ;;  %v2551_v35 = vpop.f32.mrb[3].mxu0 }
 0x19e   : > { %v2552_v36 = vadd.f32 %v2551_v35, %v2550_v32  ;;  %v2615_v37 = vpop.f32.mrb[3].mxu1 }
 0x19f   : > { %v3762_v38 = vadd.f32 %v2613_v33, %v2549_v30  ;;  %v2616_v39 = vadd.f32 %v2615_v37, %v2614_v34 }
 0x1a1   : > { %v3764_v40 = vadd.f32 %v2616_v39, %v2552_v36 }
 0x1a2   : > { %v2553_v41 = vpop.f32.mrb[4].mxu0 }
 0x1a3   : > { %v2617_v42 = vpop.f32.mrb[4].mxu1  ;;  %v2554_v43 = vpop.f32.mrb[5].mxu0 }
 0x1a4   : > { %v2555_v44 = vadd.f32 %v2554_v43, %v2553_v41  ;;  %v2618_v45 = vpop.f32.mrb[5].mxu1  ;;  %v2556_v46 = vpop.f32.mrb[6].mxu0 }
 0x1a5   : > { %v2619_v47 = vadd.f32 %v2618_v45, %v2617_v42  ;;  %v2620_v48 = vpop.f32.mrb[6].mxu1  ;;  %v2557_v49 = vpop.f32.mrb[7].mxu0 }
 0x1a6   : > { %v2558_v50 = vadd.f32 %v2557_v49, %v2556_v46  ;;  %v2621_v51 = vpop.f32.mrb[7].mxu1 }
 0x1a7   : > { %v3766_v52 = vadd.f32 %v2619_v47, %v2555_v44  ;;  %v2622_v53 = vadd.f32 %v2621_v51, %v2620_v48 }
 0x1a9   : > { %v3768_v54 = vadd.f32 %v2622_v53, %v2558_v50 }
 0x1aa   : > { %v2559_v55 = vpop.f32.mrb[8].mxu0 }
 0x1ab   : > { %v2623_v56 = vpop.f32.mrb[8].mxu1  ;;  %v2560_v57 = vpop.f32.mrb[9].mxu0 }
 0x1ac   : > { %v2561_v58 = vadd.f32 %v2560_v57, %v2559_v55  ;;  %v2624_v59 = vpop.f32.mrb[9].mxu1  ;;  %v2562_v60 = vpop.f32.mrb[10].mxu0 }
 0x1ad   : > { %v2625_v61 = vadd.f32 %v2624_v59, %v2623_v56  ;;  %v2626_v62 = vpop.f32.mrb[10].mxu1  ;;  %v2563_v63 = vpop.f32.mrb[11].mxu0 }
 0x1ae   : > { %v2564_v0 = vadd.f32 %v2563_v63, %v2562_v60  ;;  %v2627_v1 = vpop.f32.mrb[11].mxu1 }
 0x1af   : > { %v3770_v2 = vadd.f32 %v2625_v61, %v2561_v58  ;;  %v2628_v3 = vadd.f32 %v2627_v1, %v2626_v62 }
 0x1b1   : > { %v3772_v4 = vadd.f32 %v2628_v3, %v2564_v0 }
 0x1b2   : > { %v2565_v5 = vpop.f32.mrb[12].mxu0 }
 0x1b3   : > { %v2629_v6 = vpop.f32.mrb[12].mxu1  ;;  %v2566_v7 = vpop.f32.mrb[13].mxu0 }
 0x1b4   : > { %v2567_v8 = vadd.f32 %v2566_v7, %v2565_v5  ;;  %v2630_v9 = vpop.f32.mrb[13].mxu1  ;;  %v2568_v10 = vpop.f32.mrb[14].mxu0 }
 0x1b5   : > { %v2631_v11 = vadd.f32 %v2630_v9, %v2629_v6  ;;  %v2632_v12 = vpop.f32.mrb[14].mxu1  ;;  %v2569_v13 = vpop.f32.mrb[15].mxu0 }
 0x1b6   : > { %v2570_v14 = vadd.f32 %v2569_v13, %v2568_v10  ;;  %v2633_v15 = vpop.f32.mrb[15].mxu1 }
 0x1b7   : > { %v3774_v16 = vadd.f32 %v2631_v11, %v2567_v8  ;;  %v2634_v17 = vadd.f32 %v2633_v15, %v2632_v12 }
 0x1b9   : > { %v3776_v18 = vadd.f32 %v2634_v17, %v2570_v14 }
 0x1ba   : > { %v2571_v19 = vpop.f32.mrb[16].mxu0 }
 0x1bb   : > { %v2635_v20 = vpop.f32.mrb[16].mxu1  ;;  %v2572_v21 = vpop.f32.mrb[17].mxu0 }
 0x1bc   : > { %v2573_v22 = vadd.f32 %v2572_v21, %v2571_v19  ;;  %v2636_v23 = vpop.f32.mrb[17].mxu1  ;;  %v2574_v24 = vpop.f32.mrb[18].mxu0 }
 0x1bd   : > { %v2637_v25 = vadd.f32 %v2636_v23, %v2635_v20  ;;  %v2638_v26 = vpop.f32.mrb[18].mxu1  ;;  %v2575_v27 = vpop.f32.mrb[19].mxu0 }
 0x1be   : > { %v2576_v28 = vadd.f32 %v2575_v27, %v2574_v24  ;;  %v2639_v29 = vpop.f32.mrb[19].mxu1 }
 0x1bf   : > { %v3778_v30 = vadd.f32 %v2637_v25, %v2573_v22  ;;  %v2640_v31 = vadd.f32 %v2639_v29, %v2638_v26 }
 0x1c1   : > { %v3780_v32 = vadd.f32 %v2640_v31, %v2576_v28 }
 0x1c2   : > { %v2577_v33 = vpop.f32.mrb[20].mxu0 }
 0x1c3   : > { %v2641_v34 = vpop.f32.mrb[20].mxu1  ;;  %v2578_v35 = vpop.f32.mrb[21].mxu0 }
 0x1c4   : > { %v2579_v36 = vadd.f32 %v2578_v35, %v2577_v33  ;;  %v2642_v37 = vpop.f32.mrb[21].mxu1  ;;  %v2580_v39 = vpop.f32.mrb[22].mxu0 }
 0x1c5   : > { %v2643_v41 = vadd.f32 %v2642_v37, %v2641_v34  ;;  %v2644_v42 = vpop.f32.mrb[22].mxu1  ;;  %v2581_v43 = vpop.f32.mrb[23].mxu0 }
 0x1c6   : > { %v2582_v44 = vadd.f32 %v2581_v43, %v2580_v39  ;;  %v2645_v45 = vpop.f32.mrb[23].mxu1 }
 0x1c7   : > { %v3782_v46 = vadd.f32 %v2643_v41, %v2579_v36  ;;  %v2646_v47 = vadd.f32 %v2645_v45, %v2644_v42 }
 0x1c9   : > { %v3784_v48 = vadd.f32 %v2646_v47, %v2582_v44 }
 0x1ca   : > { %v2583_v49 = vpop.f32.mrb[24].mxu0 }
 0x1cb   : > { %v2647_v50 = vpop.f32.mrb[24].mxu1  ;;  %v2584_v51 = vpop.f32.mrb[25].mxu0 }
 0x1cc   : > { %v2585_v53 = vadd.f32 %v2584_v51, %v2583_v49  ;;  %v2648_v55 = vpop.f32.mrb[25].mxu1  ;;  %v2586_v56 = vpop.f32.mrb[26].mxu0 }
 0x1cd   : > { %v2649_v57 = vadd.f32 %v2648_v55, %v2647_v50  ;;  %v2650_v58 = vpop.f32.mrb[26].mxu1  ;;  %v2587_v59 = vpop.f32.mrb[27].mxu0 }
 0x1ce   : > { %v2588_v60 = vadd.f32 %v2587_v59, %v2586_v56  ;;  %v2651_v61 = vpop.f32.mrb[27].mxu1 }
 0x1cf   : > { %v3786_v62 = vadd.f32 %v2649_v57, %v2585_v53  ;;  %v2652_v63 = vadd.f32 %v2651_v61, %v2650_v58 }
 0x1d1   : > { %v3788_v0 = vadd.f32 %v2652_v63, %v2588_v60 }
 0x1d2   : > { %v2589_v1 = vpop.f32.mrb[28].mxu0 }
 0x1d3   : > { %v2653_v3 = vpop.f32.mrb[28].mxu1  ;;  %v2590_v5 = vpop.f32.mrb[29].mxu0 }
 0x1d4   : > { %v2591_v6 = vadd.f32 %v2590_v5, %v2589_v1  ;;  %v2654_v7 = vpop.f32.mrb[29].mxu1  ;;  %v2592_v8 = vpop.f32.mrb[30].mxu0 }
 0x1d5   : > { %v2655_v9 = vadd.f32 %v2654_v7, %v2653_v3  ;;  %v2656_v10 = vpop.f32.mrb[30].mxu1  ;;  %v2593_v11 = vpop.f32.mrb[31].mxu0 }
 0x1d6   : > { %v2594_v12 = vadd.f32 %v2593_v11, %v2592_v8  ;;  %v2657_v13 = vpop.f32.mrb[31].mxu1 }
 0x1d7   : > { %v3790_v14 = vadd.f32 %v2655_v9, %v2591_v6  ;;  %v2658_v15 = vadd.f32 %v2657_v13, %v2656_v10 }
 0x1d9   : > { %v3792_v17 = vadd.f32 %v2658_v15, %v2594_v12 }
 0x1da   : > { %v2675_v19 = vpop.f32.mrb[32].mxu0 }
 0x1db   : > { %v2676_v20 = vpop.f32.mrb[33].mxu0  ;;  %v2739_v21 = vpop.f32.mrb[32].mxu1 }
 0x1dc   : > { %v2677_v22 = vadd.f32 %v2676_v20, %v2675_v19  ;;  %v2678_v23 = vpop.f32.mrb[34].mxu0  ;;  %v2740_v24 = vpop.f32.mrb[33].mxu1 }
 0x1dd   : > { %v2741_v25 = vadd.f32 %v2740_v24, %v2739_v21  ;;  %v2679_v26 = vpop.f32.mrb[35].mxu0  ;;  %v2742_v27 = vpop.f32.mrb[34].mxu1 }
 0x1de   : > { %v1594_v28 = vadd.f32 %v2677_v22, %v3762_v38  ;;  %v2680_v29 = vadd.f32 %v2679_v26, %v2678_v23  ;;  %v2743_v31 = vpop.f32.mrb[35].mxu1 }
 0x1df   : > { %v2744_v33 = vadd.f32 %v2743_v31, %v2742_v27 }
 0x1e0   : > { %v1597_v34 = vadd.f32 %v2680_v29, %v3764_v40  ;;  %v3796_v35 = vadd.f32 %v2741_v25, %v1594_v28 }
 0x1e2   : > { %v2681_v36 = vpop.f32.mrb[36].mxu0  ;;  %v3798_v37 = vadd.f32 %v2744_v33, %v1597_v34 }
 0x1e3   : > { %v2682_v39 = vpop.f32.mrb[37].mxu0  ;;  %v2745_v41 = vpop.f32.mrb[36].mxu1 }
 0x1e4   : > { %v2683_v42 = vadd.f32 %v2682_v39, %v2681_v36  ;;  %v2684_v43 = vpop.f32.mrb[38].mxu0  ;;  %v2746_v44 = vpop.f32.mrb[37].mxu1 }
 0x1e5   : > { %v2747_v45 = vadd.f32 %v2746_v44, %v2745_v41  ;;  %v2685_v47 = vpop.f32.mrb[39].mxu0  ;;  %v2748_v49 = vpop.f32.mrb[38].mxu1 }
 0x1e6   : > { %v1602_v38 = vadd.f32 %v2683_v42, %v3766_v52  ;;  %v2686_v50 = vadd.f32 %v2685_v47, %v2684_v43  ;;  %v2749_v51 = vpop.f32.mrb[39].mxu1 }
 0x1e7   : > { %v2750_v53 = vadd.f32 %v2749_v51, %v2748_v49 }
 0x1e8   : > { %v1605_v40 = vadd.f32 %v2686_v50, %v3768_v54  ;;  %v3802_v55 = vadd.f32 %v2747_v45, %v1602_v38 }
 0x1ea   : > { %v2687_v56 = vpop.f32.mrb[40].mxu0  ;;  %v3804_v57 = vadd.f32 %v2750_v53, %v1605_v40 }
 0x1eb   : > { %v2688_v58 = vpop.f32.mrb[41].mxu0  ;;  %v2751_v59 = vpop.f32.mrb[40].mxu1 }
 0x1ec   : > { %v2689_v60 = vadd.f32 %v2688_v58, %v2687_v56  ;;  %v2690_v61 = vpop.f32.mrb[42].mxu0  ;;  %v2752_v63 = vpop.f32.mrb[41].mxu1 }
 0x1ed   : > { %v2753_v1 = vadd.f32 %v2752_v63, %v2751_v59  ;;  %v2691_v3 = vpop.f32.mrb[43].mxu0  ;;  %v2754_v5 = vpop.f32.mrb[42].mxu1 }
 0x1ee   : > { %v1610_v52 = vadd.f32 %v2689_v60, %v3770_v2  ;;  %v2692_v6 = vadd.f32 %v2691_v3, %v2690_v61  ;;  %v2755_v7 = vpop.f32.mrb[43].mxu1 }
 0x1ef   : > { %v2756_v8 = vadd.f32 %v2755_v7, %v2754_v5 }
 0x1f0   : > { %v1613_v54 = vadd.f32 %v2692_v6, %v3772_v4  ;;  %v3808_v9 = vadd.f32 %v2753_v1, %v1610_v52 }
 0x1f2   : > { %v2693_v10 = vpop.f32.mrb[44].mxu0  ;;  %v3810_v11 = vadd.f32 %v2756_v8, %v1613_v54 }
 0x1f3   : > { %v2694_v12 = vpop.f32.mrb[45].mxu0  ;;  %v2757_v13 = vpop.f32.mrb[44].mxu1 }
 0x1f4   : > { %v2695_v15 = vadd.f32 %v2694_v12, %v2693_v10  ;;  %v2696_v19 = vpop.f32.mrb[46].mxu0  ;;  %v2758_v20 = vpop.f32.mrb[45].mxu1 }
 0x1f5   : > { %v2759_v21 = vadd.f32 %v2758_v20, %v2757_v13  ;;  %v2697_v22 = vpop.f32.mrb[47].mxu0  ;;  %v2760_v23 = vpop.f32.mrb[46].mxu1 }
 0x1f6   : > { %v1618_v2 = vadd.f32 %v2695_v15, %v3774_v16  ;;  %v2698_v24 = vadd.f32 %v2697_v22, %v2696_v19  ;;  %v2761_v25 = vpop.f32.mrb[47].mxu1 }
 0x1f7   : > { %v2762_v26 = vadd.f32 %v2761_v25, %v2760_v23 }
 0x1f8   : > { %v1621_v4 = vadd.f32 %v2698_v24, %v3776_v18  ;;  %v3814_v27 = vadd.f32 %v2759_v21, %v1618_v2 }
 0x1fa   : > { %v2699_v28 = vpop.f32.mrb[48].mxu0  ;;  %v3816_v29 = vadd.f32 %v2762_v26, %v1621_v4 }
 0x1fb   : > { %v2700_v31 = vpop.f32.mrb[49].mxu0  ;;  %v2763_v33 = vpop.f32.mrb[48].mxu1 }
 0x1fc   : > { %v2701_v34 = vadd.f32 %v2700_v31, %v2699_v28  ;;  %v2702_v36 = vpop.f32.mrb[50].mxu0  ;;  %v2764_v39 = vpop.f32.mrb[49].mxu1 }
 0x1fd   : > { %v2765_v41 = vadd.f32 %v2764_v39, %v2763_v33  ;;  %v2703_v42 = vpop.f32.mrb[51].mxu0  ;;  %v2766_v43 = vpop.f32.mrb[50].mxu1 }
 0x1fe   : > { %v1626_v16 = vadd.f32 %v2701_v34, %v3778_v30  ;;  %v2704_v44 = vadd.f32 %v2703_v42, %v2702_v36  ;;  %v2767_v45 = vpop.f32.mrb[51].mxu1 }
 0x1ff   : > { %v2768_v47 = vadd.f32 %v2767_v45, %v2766_v43 }
 0x200   : > { %v1629_v18 = vadd.f32 %v2704_v44, %v3780_v32  ;;  %v3820_v49 = vadd.f32 %v2765_v41, %v1626_v16 }
 0x202   : > { %v2705_v38 = vpop.f32.mrb[52].mxu0  ;;  %v3822_v50 = vadd.f32 %v2768_v47, %v1629_v18 }
 0x203   : > { %v2706_v51 = vpop.f32.mrb[53].mxu0  ;;  %v2769_v53 = vpop.f32.mrb[52].mxu1 }
 0x204   : > { %v2707_v40 = vadd.f32 %v2706_v51, %v2705_v38  ;;  %v2708_v56 = vpop.f32.mrb[54].mxu0  ;;  %v2770_v58 = vpop.f32.mrb[53].mxu1 }
 0x205   : > { %v2771_v59 = vadd.f32 %v2770_v58, %v2769_v53  ;;  %v2709_v60 = vpop.f32.mrb[55].mxu0  ;;  %v2772_v61 = vpop.f32.mrb[54].mxu1 }
 0x206   : > { %v1634_v30 = vadd.f32 %v2707_v40, %v3782_v46  ;;  %v2710_v63 = vadd.f32 %v2709_v60, %v2708_v56  ;;  %v2773_v1 = vpop.f32.mrb[55].mxu1 }
 0x207   : > { %v2774_v3 = vadd.f32 %v2773_v1, %v2772_v61 }
 0x208   : > { %v1637_v32 = vadd.f32 %v2710_v63, %v3784_v48  ;;  %v3826_v5 = vadd.f32 %v2771_v59, %v1634_v30 }
 0x20a   : > { %v2711_v52 = vpop.f32.mrb[56].mxu0  ;;  %v3828_v6 = vadd.f32 %v2774_v3, %v1637_v32 }
 0x20b   : > { %v2712_v7 = vpop.f32.mrb[57].mxu0  ;;  %v2775_v8 = vpop.f32.mrb[56].mxu1 }
 0x20c   : > { %v2713_v54 = vadd.f32 %v2712_v7, %v2711_v52  ;;  %v2714_v10 = vpop.f32.mrb[58].mxu0  ;;  %v2776_v12 = vpop.f32.mrb[57].mxu1 }
 0x20d   : > { %v2777_v13 = vadd.f32 %v2776_v12, %v2775_v8  ;;  %v2715_v15 = vpop.f32.mrb[59].mxu0  ;;  %v2778_v19 = vpop.f32.mrb[58].mxu1 }
 0x20e   : > { %v1642_v46 = vadd.f32 %v2713_v54, %v3786_v62  ;;  %v2716_v20 = vadd.f32 %v2715_v15, %v2714_v10  ;;  %v2779_v21 = vpop.f32.mrb[59].mxu1 }
 0x20f   : > { %v2780_v22 = vadd.f32 %v2779_v21, %v2778_v19 }
 0x210   : > { %v1645_v48 = vadd.f32 %v2716_v20, %v3788_v0  ;;  %v3832_v23 = vadd.f32 %v2777_v13, %v1642_v46 }
 0x212   : > { %v2717_v2 = vpop.f32.mrb[60].mxu0  ;;  %v3834_v24 = vadd.f32 %v2780_v22, %v1645_v48 }
 0x213   : > { %v2718_v25 = vpop.f32.mrb[61].mxu0  ;;  %v2781_v26 = vpop.f32.mrb[60].mxu1 }
 0x214   : > { %v2719_v4 = vadd.f32 %v2718_v25, %v2717_v2  ;;  %v2720_v28 = vpop.f32.mrb[62].mxu0  ;;  %v2782_v31 = vpop.f32.mrb[61].mxu1 }
 0x215   : > { %v2783_v33 = vadd.f32 %v2782_v31, %v2781_v26  ;;  %v2721_v34 = vpop.f32.mrb[63].mxu0  ;;  %v2784_v36 = vpop.f32.mrb[62].mxu1 }
 0x216   : > { %v1650_v62 = vadd.f32 %v2719_v4, %v3790_v14  ;;  %v2722_v39 = vadd.f32 %v2721_v34, %v2720_v28  ;;  %v2785_v41 = vpop.f32.mrb[63].mxu1 }
 0x217   : > { %v2786_v42 = vadd.f32 %v2785_v41, %v2784_v36 }
 0x218   : > { %v1653_v0 = vadd.f32 %v2722_v39, %v3792_v17  ;;  %v3838_v43 = vadd.f32 %v2783_v33, %v1650_v62 }
 0x21a   : > { %v2830_v16 = vpop.f32.mrb[64].mxu0  ;;  %v3840_v44 = vadd.f32 %v2786_v42, %v1653_v0 }
 0x21b   : > { %v1796_v45 = vadd.f32 %v2830_v16, %v3802_v55  ;;  %v2848_v47 = vpop.f32.mrb[64].mxu1  ;;  %v1787_v18 = vpop.f32.mrb[65].mxu0 }
 0x21c   : > { %v1788_v38 = vadd.f32 %v1787_v18, %v3796_v35  ;;  %v2049_v14 = vpop.f32.mrb[65].mxu1  ;;  %v2831_v51 = vpop.f32.mrb[66].mxu0  ;;  %v2136_v35 = vmul.f32 %v2848_v47, %v2848_v47 }
 0x21d   : > { %1852 = vst [vmem:[%s3670_s13 + $0x10] sm:$0xff] %v1796_v45  ;;  %v2134_v53 = vmul.f32 %v2049_v14, %v2049_v14  ;;  %v1799_v40 = vadd.f32 %v2831_v51, %v3804_v57  ;;  %v2849_v17 = vpop.f32.mrb[66].mxu1  ;;  %v1790_v56 = vpop.f32.mrb[67].mxu0  ;;  %v1890_v32 = vmul.f32 %v1796_v45, %v1796_v45 }
 0x21e   : > { %1850 = vst [vmem:[%s3670_s13] sm:$0xff] %v1788_v38  ;;  %v1791_v58 = vadd.f32 %v1790_v56, %v3798_v37  ;;  %v2052_v59 = vpop.f32.mrb[67].mxu1  ;;  %v1888_v61 = vmul.f32 %v1788_v38, %v1788_v38  ;;  %v2137_v8 = vmul.f32 %v2849_v17, %v2849_v17 }
 0x21f   : > { %1853 = vst [vmem:[%s3670_s13 + $0x18] sm:$0xff] %v1799_v40  ;;  %v2113_v60 = vadd.f32 %v2052_v59, %v2049_v14  ;;  %v2135_v55 = vmul.f32 %v2052_v59, %v2052_v59  ;;  %v1891_v15 = vmul.f32 %v1799_v40, %v1799_v40 }
 0x220   : > { %1851 = vst [vmem:[%s3670_s13 + $0x8] sm:$0xff] %v1791_v58  ;;  %v1867_v30 = vadd.f32 %v1791_v58, %v1788_v38  ;;  %v1889_v63 = vmul.f32 %v1791_v58, %v1791_v58 }
 0x221   : > { %v2114_v1 = vadd.f32 %v2848_v47, %v2113_v60  ;;  %v2150_v3 = vadd.f32 %v2135_v55, %v2134_v53 }
 0x222   : > { %v1868_v52 = vadd.f32 %v1867_v30, %v1796_v45  ;;  %v1904_v57 = vadd.f32 %v1889_v63, %v1888_v61  ;;  %v2834_v7 = vpop.f32.mrb[68].mxu0 }
 0x223   : > { %v2151_v54 = vadd.f32 %v2150_v3, %v2136_v35  ;;  %v1812_v37 = vadd.f32 %v2834_v7, %v3814_v27  ;;  %v2852_v10 = vpop.f32.mrb[68].mxu1  ;;  %v1803_v12 = vpop.f32.mrb[69].mxu0  ;;  %v2115_v13 = vadd.f32 %v2849_v17, %v2114_v1 }
 0x224   : > { %v1905_v19 = vadd.f32 %v1904_v57, %v1890_v32  ;;  %v1804_v46 = vadd.f32 %v1803_v12, %v3808_v9  ;;  %v1869_v20 = vadd.f32 %v1868_v52, %v1799_v40  ;;  %v2065_v21 = vpop.f32.mrb[69].mxu1  ;;  %v2835_v22 = vpop.f32.mrb[70].mxu0  ;;  %v2140_v47 = vmul.f32 %v2852_v10, %v2852_v10 }
 0x225   : > { %1856 = vst [vmem:[%s3670_s13 + $0x30] sm:$0xff] %v1812_v37  ;;  %v2116_v48 = vadd.f32 %v2115_v13, %v2065_v21  ;;  %v2138_v2 = vmul.f32 %v2065_v21, %v2065_v21  ;;  %v2152_v25 = vadd.f32 %v2151_v54, %v2137_v8  ;;  %v2853_v26 = vpop.f32.mrb[70].mxu1  ;;  %v1806_v4 = vpop.f32.mrb[71].mxu0  ;;  %v1815_v33 = vadd.f32 %v2835_v22, %v3816_v29 }
 0x226   : > { %1854 = vst [vmem:[%s3670_s13 + $0x20] sm:$0xff] %v1804_v46  ;;  %v1870_v27 = vadd.f32 %v1869_v20, %v1804_v46  ;;  %v1892_v28 = vmul.f32 %v1804_v46, %v1804_v46  ;;  %v1906_v31 = vadd.f32 %v1905_v19, %v1891_v15  ;;  %v2068_v34 = vpop.f32.mrb[71].mxu1  ;;  %v1807_v9 = vadd.f32 %v1806_v4, %v3810_v11 }
 0x227   : > { %v2153_v36 = vadd.f32 %v2152_v25, %v2138_v2  ;;  %v2117_v62 = vadd.f32 %v2116_v48, %v2068_v34  ;;  %1857 = vst [vmem:[%s3670_s13 + $0x38] sm:$0xff] %v1815_v33  ;;  %v2139_v41 = vmul.f32 %v2068_v34, %v2068_v34  ;;  %v1894_v45 = vmul.f32 %v1812_v37, %v1812_v37 }
 0x228   : > { %v1907_v39 = vadd.f32 %v1906_v31, %v1892_v28  ;;  %1855 = vst [vmem:[%s3670_s13 + $0x28] sm:$0xff] %v1807_v9  ;;  %v1871_v42 = vadd.f32 %v1870_v27, %v1807_v9  ;;  %v1893_v0 = vmul.f32 %v1807_v9, %v1807_v9  ;;  %v2141_v17 = vmul.f32 %v2853_v26, %v2853_v26 }
 0x229   : > { %v2118_v16 = vadd.f32 %v2852_v10, %v2117_v62  ;;  %v2154_v18 = vadd.f32 %v2153_v36, %v2139_v41  ;;  %v1895_v55 = vmul.f32 %v1815_v33, %v1815_v33 }
 0x22a   : > { %v2838_v38 = vpop.f32.mrb[72].mxu0  ;;  %v1872_v14 = vadd.f32 %v1871_v42, %v1812_v37  ;;  %v1908_v51 = vadd.f32 %v1907_v39, %v1893_v0 }
 0x22b   : > { %v1828_v29 = vadd.f32 %v2838_v38, %v3826_v5  ;;  %v2856_v53 = vpop.f32.mrb[72].mxu1  ;;  %v1819_v11 = vpop.f32.mrb[73].mxu0  ;;  %v2119_v40 = vadd.f32 %v2853_v26, %v2118_v16  ;;  %v2155_v56 = vadd.f32 %v2154_v18, %v2140_v47 }
 0x22c   : > { %v1820_v58 = vadd.f32 %v1819_v11, %v3820_v49  ;;  %v2081_v59 = vpop.f32.mrb[73].mxu1  ;;  %v2839_v60 = vpop.f32.mrb[74].mxu0  ;;  %v1909_v61 = vadd.f32 %v1908_v51, %v1894_v45  ;;  %v1873_v30 = vadd.f32 %v1872_v14, %v1815_v33  ;;  %v2144_v19 = vmul.f32 %v2856_v53, %v2856_v53 }
 0x22d   : > { %1860 = vst [vmem:[%s3670_s13 + $0x50] sm:$0xff] %v1828_v29  ;;  %v2120_v63 = vadd.f32 %v2119_v40, %v2081_v59  ;;  %v2857_v35 = vpop.f32.mrb[74].mxu1  ;;  %v1822_v1 = vpop.f32.mrb[75].mxu0  ;;  %v2142_v3 = vmul.f32 %v2081_v59, %v2081_v59  ;;  %v2156_v32 = vadd.f32 %v2155_v56, %v2141_v17  ;;  %v1831_v52 = vadd.f32 %v2839_v60, %v3828_v6 }
 0x22e   : > { %1858 = vst [vmem:[%s3670_s13 + $0x40] sm:$0xff] %v1820_v58  ;;  %v1896_v5 = vmul.f32 %v1820_v58, %v1820_v58  ;;  %v2084_v57 = vpop.f32.mrb[75].mxu1  ;;  %v1874_v7 = vadd.f32 %v1873_v30, %v1820_v58  ;;  %v1910_v49 = vadd.f32 %v1909_v61, %v1895_v55  ;;  %v1823_v8 = vadd.f32 %v1822_v1, %v3822_v50 }
 0x22f   : > { %v2157_v54 = vadd.f32 %v2156_v32, %v2142_v3  ;;  %1861 = vst [vmem:[%s3670_s13 + $0x58] sm:$0xff] %v1831_v52  ;;  %v2121_v37 = vadd.f32 %v2120_v63, %v2084_v57  ;;  %v2143_v10 = vmul.f32 %v2084_v57, %v2084_v57  ;;  %v1898_v6 = vmul.f32 %v1828_v29, %v1828_v29 }
 0x230   : > { %v1911_v12 = vadd.f32 %v1910_v49, %v1896_v5  ;;  %1859 = vst [vmem:[%s3670_s13 + $0x48] sm:$0xff] %v1823_v8  ;;  %v1875_v13 = vadd.f32 %v1874_v7, %v1823_v8  ;;  %v1897_v15 = vmul.f32 %v1823_v8, %v1823_v8  ;;  %v2145_v26 = vmul.f32 %v2857_v35, %v2857_v35 }
 0x231   : > { %v2122_v46 = vadd.f32 %v2856_v53, %v2121_v37  ;;  %v2158_v20 = vadd.f32 %v2157_v54, %v2143_v10  ;;  %v1899_v34 = vmul.f32 %v1831_v52, %v1831_v52 }
 0x232   : > { %v2842_v21 = vpop.f32.mrb[76].mxu0  ;;  %v1876_v22 = vadd.f32 %v1875_v13, %v1828_v29  ;;  %v1912_v48 = vadd.f32 %v1911_v12, %v1897_v15 }
 0x233   : > { %v3867_v50 = vadd.f32 %v2842_v21, %v3838_v43  ;;  %v2860_v2 = vpop.f32.mrb[76].mxu1  ;;  %v1835_v25 = vpop.f32.mrb[77].mxu0  ;;  %v2159_v4 = vadd.f32 %v2158_v20, %v2144_v19  ;;  %v2123_v31 = vadd.f32 %v2857_v35, %v2122_v46 }
 0x234   : > { %v1836_v27 = vadd.f32 %v1835_v25, %v3832_v23  ;;  %v2097_v28 = vpop.f32.mrb[77].mxu1  ;;  %v2843_v33 = vpop.f32.mrb[78].mxu0  ;;  %v1913_v36 = vadd.f32 %v1912_v48, %v1898_v6  ;;  %v1877_v9 = vadd.f32 %v1876_v22, %v1831_v52  ;;  %v2148_v11 = vmul.f32 %v2860_v2, %v2860_v2 }
 0x235   : > { %1864 = vst [vmem:[%s3670_s13 + $0x70] sm:$0xff] %v3867_v50  ;;  %v2146_v43 = vmul.f32 %v2097_v28, %v2097_v28  ;;  %v2861_v62 = vpop.f32.mrb[78].mxu1  ;;  %v1838_v39 = vpop.f32.mrb[79].mxu0  ;;  %v2124_v42 = vadd.f32 %v2123_v31, %v2097_v28  ;;  %v2160_v0 = vadd.f32 %v2159_v4, %v2145_v26  ;;  %v1847_v16 = vadd.f32 %v2843_v33, %v3840_v44 }
 0x236   : > { %1862 = vst [vmem:[%s3670_s13 + $0x60] sm:$0xff] %v1836_v27  ;;  %v1900_v41 = vmul.f32 %v1836_v27, %v1836_v27  ;;  %v2100_v23 = vpop.f32.mrb[79].mxu1  ;;  %v1878_v45 = vadd.f32 %v1877_v9, %v1836_v27  ;;  %v1914_v47 = vadd.f32 %v1913_v36, %v1899_v34  ;;  %v1839_v18 = vadd.f32 %v1838_v39, %v3834_v24 }
 0x237   : > { %v2161_v38 = vadd.f32 %v2160_v0, %v2146_v43  ;;  %1865 = vst [vmem:[%s3670_s13 + $0x78] sm:$0xff] %v1847_v16  ;;  %v2125_v14 = vadd.f32 %v2124_v42, %v2100_v23  ;;  %v2147_v44 = vmul.f32 %v2100_v23, %v2100_v23 }
 0x238   : > { %v1915_v51 = vadd.f32 %v1914_v47, %v1900_v41  ;;  %1863 = vst [vmem:[%s3670_s13 + $0x68] sm:$0xff] %v1839_v18  ;;  %v1879_v29 = vadd.f32 %v1878_v45, %v1839_v18  ;;  %v1901_v53 = vmul.f32 %v1839_v18, %v1839_v18 }
 0x239   : > { %v2126_v40 = vadd.f32 %v2860_v2, %v2125_v14  ;;  %v2162_v17 = vadd.f32 %v2161_v38, %v2147_v44 }
 0x23a   : > { %3272 = shalt.err (!%p3269_p6)
}
 0x23b   : > { %s3273_s12 = scalar_lea.hbm %s3879_s16, 2048  ;;  %s3277_s23 = scalar_lea.hbm %s3981_s4, 8192 }
 0x23c   : > { %p3274_p11 = scmp.ne.s32.totalorder %s3879_s16, %s3273_s12  ;;  %p3278_p7 = scmp.lt.u32.totalorder %s3879_s16, %s3981_s4 }
 0x23d   : > { %p3279_p1 = scmp.lt.u32.totalorder %s3277_s23, %s3273_s12  ;;  %p3281_p4 = scmp.lt.u32.totalorder %s3273_s12, %s3879_s16 }
 0x23e   : > { %p3275_p0 = pnand %p3274_p11, %p4027_p12 }
 0x23f   : > { %p3280_p2 = por %p3279_p1, %p3278_p7 }
 0x240   : > { %p3276_p3 = pneg %p3275_p0 }
 0x241   : > { %p3282_p5 = por %p3281_p4, %p3280_p2 }
 0x243   : > { %p3283_p13 = pnand %p3282_p5, %p3276_p3 }
 0x245   : > { %3286 = shalt.err (!%p3283_p13)
}
 0x246   : > { %s3405_s29 = smov 128   ;;  %s3406_s26 = smov 8   ;;  %v1902_v24 = vmul.f32 %v3867_v50, %v3867_v50  ;;  %v1880_v56 = vadd.f32 %v1879_v29, %v3867_v50  ;;  %v1916_v58 = vadd.f32 %v1915_v51, %v1901_v53  ;;  %v2149_v59 = vmul.f32 %v2861_v62, %v2861_v62  ;;  %v2112_v48 = vld [vmem:[#allocation12] sm:$0x3]  ;;  %v1866_v25 = vld [vmem:[#allocation10] sm:$0x3] }
 0x247   : > { %2878 = dma.vmem_to_hbm [thread:$0]  (%p4027_p12), %s3881_s8, 2048, %s3879_s16, %s2175_s18, %s3405_s29, %s3405_s29, %s3406_s26   ;;  %v2127_v60 = vadd.f32 %v2861_v62, %v2126_v40  ;;  %v2163_v55 = vadd.f32 %v2162_v17, %v2148_v11  ;;  %v1903_v61 = vmul.f32 %v1847_v16, %v1847_v16  ;;  %vm1925_vm2 = vcmask 1040384  }
 0x248   : > { %v1881_v30 = vadd.f32 %v1880_v56, %v1847_v16  ;;  %v1917_v63 = vadd.f32 %v1916_v58, %v1902_v24  ;;  %s3407_s14 = smov [#allocation10]   ;;  %s3408_s15 = smov [#allocation12]  }
 0x249   : > { %v2128_v35 = vrot.slane %v2127_v60, 4  ;;  %v2164_v1 = vadd.f32 %v2163_v55, %v2149_v59  ;;  %s2202_s9 = sshll.u32 %s3407_s14, 4  ;;  %s2213_s13 = sshll.u32 %s3408_s15, 4  ;;  %s2203_s9 = int_to_ptr.vmem [resolvable:$true] %s2202_s9  ;;  %s3913_s13 = int_to_ptr.vmem [resolvable:$true] %s2213_s13 }
 0x24a   : > { %v1882_v5 = vrot.slane %v1881_v30, 4  ;;  %v1918_v3 = vadd.f32 %v1917_v63, %v1903_v61  ;;  %s3287_s27 = scalar_lea.vmem %s2203_s9, 32  ;;  %p4028_p10 = scmp.eq.s32.totalorder %s3465_s25, 3 }
 0x24b   : > { %v2129_v32 = vadd.f32 %v2128_v35, %v2127_v60  ;;  %v2165_v52 = vrot.slane %v2164_v1, 4  ;;  %p3288_p12 = scmp.ne.s32.totalorder %s2203_s9, %s3287_s27  ;;  %p3294_p6 = scmp.lt.s32.totalorder %s2203_s9, %s2203_s9 }
 0x24c   : > { %v1883_v57 = vadd.f32 %v1882_v5, %v1881_v30  ;;  %v1919_v7 = vrot.slane %v1918_v3, 4  ;;  %p3295_p11 = scmp.lt.s32.totalorder %s3287_s27, %s3287_s27 }
 0x24d   : > { %v2130_v49 = vrot.slane %v2129_v32, 2  ;;  %v2166_v8 = vadd.f32 %v2165_v52, %v2164_v1  ;;  %p3289_p8 = pnand %p3288_p12, %p4028_p10 }
 0x24e   : > { %v1884_v54 = vrot.slane %v1883_v57, 2  ;;  %v1920_v37 = vadd.f32 %v1919_v7, %v1918_v3  ;;  %p3296_p0 = por %p3295_p11, %p3294_p6 }
 0x24f   : > { %v2131_v10 = vadd.f32 %v2130_v49, %v2129_v32  ;;  %v2167_v12 = vrot.slane %v2166_v8, 2  ;;  %p3290_p9 = pneg %p3289_p8 }
 0x250   : > { %v1885_v13 = vadd.f32 %v1884_v54, %v1883_v57  ;;  %v1921_v15 = vrot.slane %v1920_v37, 2 }
 0x251   : > { %v2132_v19 = vrot.slane %v2131_v10, 1  ;;  %v2168_v46 = vadd.f32 %v2167_v12, %v2166_v8  ;;  %p3297_p3 = pnand %p3296_p0, %p3290_p9 }
 0x252   : > { %v1886_v20 = vrot.slane %v1885_v13, 1  ;;  %v1922_v21 = vadd.f32 %v1921_v15, %v1920_v37 }
 0x253   : > { %v2169_v6 = vrot.slane %v2168_v46, 1  ;;  %v2133_v50 = vadd.f32 %v2132_v19, %v2131_v10 }
 0x254   : > { %v1923_v22 = vrot.slane %v1922_v21, 1  ;;  %v1887_v26 = vadd.f32 %v1886_v20, %v1885_v13 }
 0x255   : > { %v2170_v2 = vadd.f32 %v2169_v6, %v2168_v46 }
 0x256   : > { %v1924_v4 = vadd.f32 %v1923_v22, %v1922_v21 }
 0x257   : > { %v2171_v27 = vsel %vm1925_vm2, %v2133_v50, %v2170_v2 }
 0x258   : > { %v1926_v28 = vsel %vm1925_vm2, %v1887_v26, %v1924_v4  ;;  %v2172_v31 = vadd.f32 %v2171_v27, %v2112_v48 }
 0x259   : > { %v1927_v33 = vadd.f32 %v1926_v28, %v1866_v25 }
 0x25a   : > { %2173 = vst [vmem:[#allocation12] sm:$0x3] %v2172_v31 }
 0x25b   : > { %1928 = vst [vmem:[#allocation10] sm:$0x3] %v1927_v33 }
 0x25c   : > { %3300 = shalt.err (!%p3297_p3)
}
 0x25d   : > { %s3301_s17 = scalar_lea.hbm %s3982_s5, 32  ;;  %p4029_p1 = pmov %p4028_p10 }
 0x25e   : > { %p3302_p7 = scmp.ne.s32.totalorder %s3982_s5, %s3301_s17  ;;  %p3307_p5 = scmp.lt.u32.totalorder %s3301_s17, %s3982_s5 }
 0x260   : > { %p3303_p2 = pnand %p3302_p7, %p4029_p1 }
 0x262   : > { %p3304_p4 = pneg %p3303_p2 }
 0x264   : > { %p3309_p13 = pnand %p3307_p5, %p3304_p4 }
 0x266   : > { %3312 = shalt.err (!%p3309_p13)
}
 0x267   : > { %p4030_p12 = pmov %p4029_p1  ;;  %s3313_s12 = scalar_lea.vmem %s3913_s13, 32 }
 0x268   : > { %p3314_p10 = scmp.ne.s32.totalorder %s3913_s13, %s3313_s12  ;;  %p4031_p8 = pmov %p4029_p1 }
 0x269   : > { %2880 = dma.vmem_to_hbm [thread:$0]  (%p4030_p12), %s2203_s9, 32, %s3982_s5, [#allocation11]  }
 0x26a   : > { %p3315_p9 = pnand %p3314_p10, %p4031_p8  ;;  %p3320_p11 = scmp.lt.s32.totalorder %s3913_s13, %s3913_s13 }
 0x26b   : > { %p3321_p0 = scmp.lt.s32.totalorder %s3313_s12, %s3313_s12 }
 0x26c   : > { %p3316_p6 = pneg %p3315_p9 }
 0x26d   : > { %p3322_p3 = por %p3321_p0, %p3320_p11 }
 0x26f   : > { %p3323_p7 = pnand %p3322_p3, %p3316_p6 }
 0x271   : > { %3326 = shalt.err (!%p3323_p7)
}
 0x272   : > { %s3327_s23 = scalar_lea.hbm %s3983_s6, 32  ;;  %p4032_p2 = pmov %p4031_p8 }
 0x273   : > { %p3328_p1 = scmp.ne.s32.totalorder %s3983_s6, %s3327_s23  ;;  %p3333_p13 = scmp.lt.u32.totalorder %s3327_s23, %s3983_s6 }
 0x275   : > { %p3329_p4 = pnand %p3328_p1, %p4032_p2 }
 0x277   : > { %p3330_p5 = pneg %p3329_p4 }
 0x279   : > { %p3335_p12 = pnand %p3333_p13, %p3330_p5 }
 0x27b   : > { %3338 = shalt.err (!%p3335_p12)
}
 0x27c   : > { %p4033_p10 = pmov %p4032_p2  ;;  %p4034_p8 = pmov %p4032_p2 }
 0x27e   : > { %2882 = dma.vmem_to_hbm [thread:$0]  (%p4033_p10), %s3913_s13, 32, %s3983_s6, [#allocation11]  }
 0x27f   : > { %3372 = dma.done.wait (%p4034_p8), [#allocation11], 64   ;;  %p4035_p9 = pmov %p4032_p2 }
 0x281   : > { %3374 = vsyncadd (%p4035_p9), [#allocation11], 4294967232 }
 0x282 PF: > { %s4036_s15 = sld [smem:[#allocation20_spill]]  ;;  %p2915_p6 = scmp.ge.s32.totalorder %s3393_s24, 2 }
 0x283   : > { %s2233_s27 = sand.u32 1, %s3381_s21  }
 0x284   : > { %s2234_s8 = scalar_lea.sflag [#allocation4], %s2233_s27 }
 0x288   : > { %p4037_p11 = scmp.ne.s32.totalorder %s4036_s15, 0 }
 0x28a   : > { %p2903_p0 = pnand %p2915_p6, %p4037_p11 }
 0x28c   : > { %3376 = dma.done.wait (!%p2903_p0), %s2234_s8, 2048  }
 0x28d   : > { %3378 = vsyncadd (!%p2903_p0), %s2234_s8, 4294965248  ;;  %s4038_s24 = sld [smem:[#allocation21_spill]]  ;;  %s4039_s11 = sld [smem:[#allocation19_spill]] }
 0x28e   : > { %s4040_s23 = sld [smem:[#allocation22_spill]]  ;;  %s4041_s21 = smov %s3385_s22 }
 0x293   : > { %p22_p3 = scmp.ge.s32.totalorder %s4038_s24, 6   ;;  %s4042_s22 = smov %s4039_s11 }
 0x295   :  { %24 = sbr.rel (!%p22_p3) target bundleno = 10 (0xa), region = 120 }
 0x29c   :  { %2239 = vsyncpa [#allocation3], 1 }
 0x29d   :  { %2241 = vsyncpa [#allocation3 + $0x1], 1 }
 0x29e   :  { %2242 = vsyncpa [#allocation6], 1 }
 0x29f   :  { %2243 = vsyncpa [#allocation4], 1 }
 0x2a0   :  { %2245 = vsyncpa [#allocation4 + $0x1], 1 }
 0x2a1   :  { %2246 = vsyncpa [#allocation11], 1 }

</bundles_post_ra>
